<compile_context>
chip_gen: v5e
topology: v5e:2x2
jax: 0.10.0
libtpu: 0.0.40
codegen_flags: <defaults>
</compile_context>

<pallas_src>
import functools

import numpy as np
import jax
import jax.numpy as jnp
from jax.experimental import pallas as pl
from jax.experimental.pallas import tpu as pltpu

EPS = 1e-8
NEG_SLOPE = 0.2
RES_RATIO = 0.1


# ----------------------------- geometry helpers -----------------------------
def _geom(H, W):
    """Extended-flat layout geometry for an HxW image.

    An HxW, C-channel activation is stored as a (Pe, C) matrix: rows
    [M, M+P) hold the zero-padded (H+2)x(W+2) image flattened row-major,
    surrounded by M all-zero margin rows on each side, so every 3x3 conv tap
    of every output pixel is a plain row-shifted 2-D slice.
    """
    Hp, Wp = H + 2, W + 2
    P = Hp * Wp
    M = ((Wp + 1 + 7) // 8) * 8          # margin >= Wp+1, 8-aligned (sublane)
    Pe = P + 2 * M
    return Hp, Wp, P, M, Pe


def nhwc_to_ext_flat(x):
    N, H, W, C = x.shape
    _, _, P, M, _ = _geom(H, W)
    xp = jnp.pad(x, ((0, 0), (1, 1), (1, 1), (0, 0)))
    return jnp.pad(xp.reshape(N, P, C), ((0, 0), (M, M), (0, 0)))


def _interior_mask(H, W):
    """(P, 1) f32 mask: 1 on interior pixels of the padded grid, 0 on the ring."""
    Hp, Wp, P, _, _ = _geom(H, W)
    m = np.zeros((Hp, Wp, 1), np.float32)
    m[1:H + 1, 1:W + 1, :] = 1.0
    return jnp.asarray(m.reshape(P, 1))


# ------------------------------ kernel helpers ------------------------------
def _lrelu(x):
    return jnp.maximum(x, NEG_SLOPE * x)


def _pixelnorm(x):
    # PixelNormLayer: normalize over the channel (lane) dim; rsqrt -> EUP slot.
    return x * jax.lax.rsqrt(jnp.mean(x * x, axis=-1, keepdims=True) + EPS)


def _conv3x3_acc(x_ref, w_ref, H, W):
    """Sum of 9 shifted-window matmuls on the extended-flat input.

    x_ref: (Pe, Cin), w_ref: (9, Cin, Cout).  Returns (acc, center):
    acc is the raw conv result for the P padded-grid rows; center is the
    centre-tap input slice (the padded image itself), reused for fused 1x1
    shortcuts.
    """
    _, Wp, P, M, _ = _geom(H, W)
    cout = w_ref.shape[-1]
    acc = jnp.zeros((P, cout), jnp.float32)
    center = None
    for dh in range(3):
        for dw in range(3):
            off = M + (dh - 1) * Wp + (dw - 1)
            xt = x_ref[off:off + P, :]
            if dh == 1 and dw == 1:
                center = xt
            acc = acc + jnp.dot(xt, w_ref[dh * 3 + dw],
                                preferred_element_type=jnp.float32)
    return acc, center


def _store_ext(o_ref, val, H, W):
    """Write val (P rows) into the padded-grid rows; keep margins zero."""
    _, _, P, M, _ = _geom(H, W)
    o_ref[...] = jnp.zeros(o_ref.shape, o_ref.dtype)
    o_ref[M:M + P, :] = val


# ------------------------------ Pallas kernels ------------------------------
def conv_img_kernel(x_ref, w_ref, b_ref, mask_ref, o_ref, *, H, W):
    # conv_img: 3x3 conv + bias + LeakyReLU(0.2)
    acc, _ = _conv3x3_acc(x_ref, w_ref, H, W)
    val = _lrelu(acc + b_ref[...]) * mask_ref[...]
    _store_ext(o_ref, val, H, W)


def rb_conv0_kernel(x_ref, w_ref, mask_ref, o_ref, *, H, W):
    # conv_0 path: conv + PixelNorm + LeakyReLU
    acc, _ = _conv3x3_acc(x_ref, w_ref, H, W)
    val = _lrelu(_pixelnorm(acc)) * mask_ref[...]
    _store_ext(o_ref, val, H, W)


def rb_conv0_sc_kernel(x_ref, w_ref, ws_ref, mask_ref, dx_ref, xs_ref, *, H, W):
    # Fused conv_0 (+PixelNorm+LeakyReLU) and learned 1x1 shortcut (+PixelNorm):
    # the input activation is read once, two ext-flat outputs are produced.
    acc, xc = _conv3x3_acc(x_ref, w_ref, H, W)
    m = mask_ref[...]
    _store_ext(dx_ref, _lrelu(_pixelnorm(acc)) * m, H, W)
    xs = _pixelnorm(jnp.dot(xc, ws_ref[...],
                            preferred_element_type=jnp.float32)) * m
    _store_ext(xs_ref, xs, H, W)


def rb_conv1_kernel(x_ref, w_ref, xs_ref, mask_ref, o_ref, *, H, W):
    # conv_1 path: conv + PixelNorm, then out = LeakyReLU(x_s + res_ratio * dx)
    _, _, P, M, _ = _geom(H, W)
    acc, _ = _conv3x3_acc(x_ref, w_ref, H, W)
    xs = xs_ref[M:M + P, :]
    val = _lrelu(xs + RES_RATIO * _pixelnorm(acc)) * mask_ref[...]
    _store_ext(o_ref, val, H, W)


def pool_kernel(x_ref, o_ref):
    # AvgPool2d(3, stride=2, padding=1), count_include_pad=True.
    # x_ref: (Hq, 2, Wq, 2, C) phase-split padded image; o_ref: (Ho, Wo, C).
    Ho, Wo, _ = o_ref.shape
    acc = None
    for dh in range(3):
        for dw in range(3):
            t = x_ref[dh // 2:dh // 2 + Ho, dh % 2,
                      dw // 2:dw // 2 + Wo, dw % 2, :]
            acc = t if acc is None else acc + t
    o_ref[...] = acc * (1.0 / 9.0)


def fc_kernel(x_ref, w_ref, b_ref, o_ref):
    o_ref[...] = (jnp.dot(x_ref[...], w_ref[...],
                          preferred_element_type=jnp.float32) + b_ref[...])


# ------------------------------ kernel drivers ------------------------------
def _const_index_map(ndim):
    return lambda n: (0,) * ndim


def _call_conv(kernel, args, kinds, out_channels, flops=0, transcendentals=0):
    """Launch a fused conv kernel with grid over the batch dimension."""
    N, Pe, _ = args[0].shape
    in_specs = []
    for a, kind in zip(args, kinds):
        if kind == "act":
            in_specs.append(pl.BlockSpec((None, Pe, a.shape[2]),
                                         lambda n: (n, 0, 0)))
        else:  # weights / bias / mask: resident for all grid steps
            in_specs.append(pl.BlockSpec(a.shape, _const_index_map(a.ndim)))
    out_shapes = tuple(jax.ShapeDtypeStruct((N, Pe, c), jnp.float32)
                       for c in out_channels)
    out_specs = tuple(pl.BlockSpec((None, Pe, c), lambda n: (n, 0, 0))
                      for c in out_channels)
    bytes_accessed = 4 * (sum(int(np.prod(a.shape)) for a in args)
                          + sum(N * Pe * c for c in out_channels))
    single = len(out_channels) == 1
    return pl.pallas_call(
        kernel,
        grid=(N,),
        in_specs=in_specs,
        out_specs=out_specs[0] if single else out_specs,
        out_shape=out_shapes[0] if single else out_shapes,
        compiler_params=pltpu.CompilerParams(dimension_semantics=("parallel",)),
        cost_estimate=pl.CostEstimate(flops=int(flops),
                                      transcendentals=int(transcendentals),
                                      bytes_accessed=int(bytes_accessed)),
    )(*args)


def avg_pool_ext(x_ext, H, W, C):
    """AvgPool2d(3,2,1) on an ext-flat activation -> ext-flat at (H/2, W/2)."""
    N = x_ext.shape[0]
    Hp, Wp, P, M, _ = _geom(H, W)
    Ho, Wo = H // 2, W // 2
    Hq, Wq = Hp // 2, Wp // 2
    # free reshape: phase-split the padded image along both spatial axes
    xpad = x_ext[:, M:M + P, :].reshape(N * Hq, 2, Wq, 2, C)
    pooled = pl.pallas_call(
        pool_kernel,
        grid=(N,),
        in_specs=[pl.BlockSpec((Hq, 2, Wq, 2, C), lambda n: (n, 0, 0, 0, 0))],
        out_specs=pl.BlockSpec((Ho, Wo, C), lambda n: (n, 0, 0)),
        out_shape=jax.ShapeDtypeStruct((N * Ho, Wo, C), jnp.float32),
        compiler_params=pltpu.CompilerParams(dimension_semantics=("parallel",)),
    )(xpad)
    return nhwc_to_ext_flat(pooled.reshape(N, Ho, Wo, C))


def resnet_block(x_ext, bp, fin, fout, H, W):
    """ResNetBlock(fin, fout, bn=True, flag_pn=True, res_ratio=0.1)."""
    N = x_ext.shape[0]
    _, _, P, _, _ = _geom(H, W)
    fh = min(fin, fout)
    mask = _interior_mask(H, W)
    w0 = bp["w0"].reshape(9, fin, fh)
    w1 = bp["w1"].reshape(9, fh, fout)
    if fin != fout:
        dx, xs = _call_conv(
            functools.partial(rb_conv0_sc_kernel, H=H, W=W),
            [x_ext, w0, bp["ws"], mask],
            ["act", "const", "const", "const"],
            [fh, fout],
            flops=2 * N * P * (9 * fin * fh + fin * fout),
            transcendentals=2 * N * P)
    else:
        dx = _call_conv(
            functools.partial(rb_conv0_kernel, H=H, W=W),
            [x_ext, w0, mask],
            ["act", "const", "const"],
            [fh],
            flops=2 * N * P * 9 * fin * fh,
            transcendentals=N * P)
        xs = x_ext
    return _call_conv(
        functools.partial(rb_conv1_kernel, H=H, W=W),
        [dx, w1, xs, mask],
        ["act", "const", "act", "const"],
        [fout],
        flops=2 * N * P * 9 * fh * fout,
        transcendentals=N * P)


def linear(x, w, b):
    n, k = x.shape
    m = w.shape[1]
    return pl.pallas_call(
        fc_kernel,
        grid=(1,),
        in_specs=[pl.BlockSpec((n, k), lambda i: (0, 0)),
                  pl.BlockSpec((k, m), lambda i: (0, 0)),
                  pl.BlockSpec((1, m), lambda i: (0, 0))],
        out_specs=pl.BlockSpec((n, m), lambda i: (0, 0)),
        out_shape=jax.ShapeDtypeStruct((n, m), jnp.float32),
    )(x, w, b)


# ------------------------------- parameters --------------------------------
def build_params(key, size=16, nc=3, nf=8, nf_max=32, n_output=1):
    s0 = 4
    nlayers = int(np.log2(size / s0))
    nf0_final = min(nf_max, nf * 2 ** nlayers)
    keys = iter(jax.random.split(key, 128))
    params = {
        "conv_img_w": jax.random.normal(next(keys), (3, 3, nc, nf), jnp.float32)
        / np.sqrt(9 * nc),
        "conv_img_b": jax.random.normal(next(keys), (1, nf), jnp.float32) * 0.01,
    }
    # block configuration, mirroring ResNet_D.__init__
    cfgs = []
    a = min(nf, nf_max)
    b = min(nf * 2, nf_max)
    cfgs += [("rb", a, a), ("rb", a, b)]
    for i in range(1, nlayers + 1):
        a = min(nf * 2 ** i, nf_max)
        b = min(nf * 2 ** (i + 1), nf_max)
        cfgs += [("pool", 0, 0), ("rb", a, a), ("rb", a, b)]
    blocks = []
    for kind, fin, fout in cfgs:
        if kind == "pool":
            blocks.append(("pool", None))
        else:
            fh = min(fin, fout)
            bp = {
                "w0": jax.random.normal(next(keys), (3, 3, fin, fh), jnp.float32)
                / np.sqrt(9 * fin),
                "w1": jax.random.normal(next(keys), (3, 3, fh, fout), jnp.float32)
                / np.sqrt(9 * fh),
            }
            if fin != fout:
                bp["ws"] = (jax.random.normal(next(keys), (fin, fout), jnp.float32)
                            / np.sqrt(fin))
            blocks.append(("rb", (fin, fout, bp)))
    params["blocks"] = blocks
    fc_in = nf0_final * s0 * s0
    fc_w = jax.random.normal(next(keys), (fc_in, n_output), jnp.float32) / np.sqrt(fc_in)
    params["fc_w"] = fc_w                     # rows ordered (c, h, w): PyTorch flatten
    # bake the NCHW flatten into the weight: rows reordered to (h, w, c)
    params["fc_w_hwc"] = (fc_w.reshape(nf0_final, s0, s0, n_output)
                          .transpose(1, 2, 0, 3).reshape(fc_in, n_output))
    params["fc_b"] = jax.random.normal(next(keys), (1, n_output), jnp.float32) * 0.01
    return params


# --------------------------------- forward ---------------------------------
def resnet_d_forward(x_nchw, params):
    # NCHW at the API boundary (PyTorch convention) -> NHWC / ext-flat inside.
    x = jnp.transpose(x_nchw, (0, 2, 3, 1)).astype(jnp.float32)
    N, H, W, C = x.shape
    out = nhwc_to_ext_flat(x)

    w_img = params["conv_img_w"].reshape(9, C, -1)
    nf = w_img.shape[-1]
    _, _, P0, _, _ = _geom(H, W)
    out = _call_conv(
        functools.partial(conv_img_kernel, H=H, W=W),
        [out, w_img, params["conv_img_b"], _interior_mask(H, W)],
        ["act", "const", "const", "const"],
        [nf],
        flops=2 * N * P0 * 9 * C * nf)

    cur_H, cur_W, cur_C = H, W, nf
    for kind, payload in params["blocks"]:
        if kind == "pool":
            out = avg_pool_ext(out, cur_H, cur_W, cur_C)
            cur_H //= 2
            cur_W //= 2
        else:
            fin, fout, bp = payload
            out = resnet_block(out, bp, fin, fout, cur_H, cur_W)
            cur_C = fout

    # extract the interior pixels and flatten in (h, w, c) order; the fc weight
    # was permuted in build_params so no runtime NCHW transpose is needed.
    Hp, Wp, P, M, _ = _geom(cur_H, cur_W)
    feat = out[:, M:M + P, :].reshape(N, Hp, Wp, cur_C)[:, 1:cur_H + 1, 1:cur_W + 1, :]
    feat = feat.reshape(N, cur_H * cur_W * cur_C)
    return linear(feat, params["fc_w_hwc"], params["fc_b"])


# ----------------------------- pure-JAX reference ---------------------------
def ref_forward(x_nchw, params):
    x = jnp.transpose(x_nchw, (0, 2, 3, 1)).astype(jnp.float32)

    def conv3(v, w, bias=None):
        y = jax.lax.conv_general_dilated(
            v, w, (1, 1), ((1, 1), (1, 1)),
            dimension_numbers=("NHWC", "HWIO", "NHWC"),
            precision=jax.lax.Precision.HIGHEST)
        return y if bias is None else y + bias.reshape(1, 1, 1, -1)

    def conv1(v, w):
        return jax.lax.conv_general_dilated(
            v, w.reshape(1, 1, *w.shape), (1, 1), ((0, 0), (0, 0)),
            dimension_numbers=("NHWC", "HWIO", "NHWC"),
            precision=jax.lax.Precision.HIGHEST)

    lrelu = lambda v: jnp.maximum(v, NEG_SLOPE * v)
    pn = lambda v: v / jnp.sqrt(jnp.mean(v * v, axis=-1, keepdims=True) + EPS)

    def pool(v):
        s = jax.lax.reduce_window(
            v, 0.0, jax.lax.add, (1, 3, 3, 1), (1, 2, 2, 1),
            padding=((0, 0), (1, 1), (1, 1), (0, 0)))
        return s / 9.0

    out = lrelu(conv3(x, params["conv_img_w"], params["conv_img_b"]))
    for kind, payload in params["blocks"]:
        if kind == "pool":
            out = pool(out)
        else:
            fin, fout, bp = payload
            xs = pn(conv1(out, bp["ws"])) if fin != fout else out
            dx = lrelu(pn(conv3(out, bp["w0"])))
            dx = pn(conv3(dx, bp["w1"]))
            out = lrelu(xs + RES_RATIO * dx)
    N = out.shape[0]
    feat = jnp.transpose(out, (0, 3, 1, 2)).reshape(N, -1)
    return jnp.dot(feat, params["fc_w"],
                   precision=jax.lax.Precision.HIGHEST) + params["fc_b"]


# ----------------------------------- main -----------------------------------
if __name__ == "__main__":
    # Small config: size=16 -> nlayers=2, nf=8, nf_max=32, nf0_final=32, s0=4
    SIZE, NC, NF, NF_MAX, N_OUT = 16, 3, 8, 32, 1
    key = jax.random.PRNGKey(0)
    pkey, xkey = jax.random.split(key)
    params = build_params(pkey, size=SIZE, nc=NC, nf=NF, nf_max=NF_MAX, n_output=N_OUT)

    x = jax.random.normal(xkey, (2, NC, SIZE, SIZE), jnp.float32)  # NCHW like PyTorch

    out = resnet_d_forward(x, params)
    out = jax.block_until_ready(out)

    ref = jax.block_until_ready(ref_forward(x, params))
    np.testing.assert_allclose(np.asarray(out), np.asarray(ref), rtol=3e-3, atol=3e-3)
    assert out.shape == (2, N_OUT)

    print("KERNEL_OK")
</pallas_src>

<mosaic_0001>
module attributes {stable_mosaic.version = 11 : i64} {
  func.func @conv_img_kernel(%arg0: i32, %arg1: memref<1x372x3xf32, #tpu.memory_space<vmem>>, %arg2: memref<9x3x8xf32, #tpu.memory_space<vmem>>, %arg3: memref<1x8xf32, #tpu.memory_space<vmem>>, %arg4: memref<324x1xf32, #tpu.memory_space<vmem>>, %arg5: memref<1x372x8xf32, #tpu.memory_space<vmem>>) attributes {dimension_semantics = [#tpu.dimension_semantics<parallel>], iteration_bounds = array<i64: 2>, scalar_prefetch = 0 : i64, scratch_operands = 0 : i64, tpu.core_type = #tpu.core_type<tc>, window_params = [{transform_indices = @transform_0, window_bounds = array<i64: 1, 372, 3>}, {pipeline_mode = #tpu.pipeline_mode<synchronous>, transform_indices = @transform_1, window_bounds = array<i64: 9, 3, 8>}, {pipeline_mode = #tpu.pipeline_mode<synchronous>, transform_indices = @transform_2, window_bounds = array<i64: 1, 8>}, {pipeline_mode = #tpu.pipeline_mode<synchronous>, transform_indices = @transform_3, window_bounds = array<i64: 324, 1>}, {transform_indices = @transform_4, window_bounds = array<i64: 1, 372, 8>}]} {
    %cst = arith.constant 0.000000e+00 : f32
    %0 = vector.broadcast %cst : f32 to vector<324x8xf32>
    %c0 = arith.constant 0 : index
    %c5 = arith.constant 5 : index
    %c0_0 = arith.constant 0 : index
    %1 = vector.load %arg1[%c0, %c5, %c0_0] : memref<1x372x3xf32, #tpu.memory_space<vmem>>, vector<1x324x3xf32>
    %2 = vector.shape_cast %1 : vector<1x324x3xf32> to vector<324x3xf32>
    %c0_1 = arith.constant 0 : index
    %c0_2 = arith.constant 0 : index
    %c0_3 = arith.constant 0 : index
    %3 = vector.load %arg2[%c0_1, %c0_2, %c0_3] : memref<9x3x8xf32, #tpu.memory_space<vmem>>, vector<1x3x8xf32>
    %4 = vector.shape_cast %3 : vector<1x3x8xf32> to vector<3x8xf32>
    %cst_4 = arith.constant dense<0.000000e+00> : vector<324x8xf32>
    %5 = tpu.matmul %2, %4, %cst_4 {dimension_numbers = #tpu.dot_dimension_numbers<[1], [0], [0], [1], [0, 0, 1, 1], [], []>} : vector<324x3xf32>, vector<3x8xf32>, vector<324x8xf32> -> vector<324x8xf32>
    %6 = arith.addf %0, %5 : vector<324x8xf32>
    %c0_5 = arith.constant 0 : index
    %c6 = arith.constant 6 : index
    %c0_6 = arith.constant 0 : index
    %7 = vector.load %arg1[%c0_5, %c6, %c0_6] : memref<1x372x3xf32, #tpu.memory_space<vmem>>, vector<1x324x3xf32>
    %8 = vector.shape_cast %7 : vector<1x324x3xf32> to vector<324x3xf32>
    %c1 = arith.constant 1 : index
    %c0_7 = arith.constant 0 : index
    %c0_8 = arith.constant 0 : index
    %9 = vector.load %arg2[%c1, %c0_7, %c0_8] : memref<9x3x8xf32, #tpu.memory_space<vmem>>, vector<1x3x8xf32>
    %10 = vector.shape_cast %9 : vector<1x3x8xf32> to vector<3x8xf32>
    %cst_9 = arith.constant dense<0.000000e+00> : vector<324x8xf32>
    %11 = tpu.matmul %8, %10, %cst_9 {dimension_numbers = #tpu.dot_dimension_numbers<[1], [0], [0], [1], [0, 0, 1, 1], [], []>} : vector<324x3xf32>, vector<3x8xf32>, vector<324x8xf32> -> vector<324x8xf32>
    %12 = arith.addf %6, %11 : vector<324x8xf32>
    %c0_10 = arith.constant 0 : index
    %c7 = arith.constant 7 : index
    %c0_11 = arith.constant 0 : index
    %13 = vector.load %arg1[%c0_10, %c7, %c0_11] : memref<1x372x3xf32, #tpu.memory_space<vmem>>, vector<1x324x3xf32>
    %14 = vector.shape_cast %13 : vector<1x324x3xf32> to vector<324x3xf32>
    %c2 = arith.constant 2 : index
    %c0_12 = arith.constant 0 : index
    %c0_13 = arith.constant 0 : index
    %15 = vector.load %arg2[%c2, %c0_12, %c0_13] : memref<9x3x8xf32, #tpu.memory_space<vmem>>, vector<1x3x8xf32>
    %16 = vector.shape_cast %15 : vector<1x3x8xf32> to vector<3x8xf32>
    %cst_14 = arith.constant dense<0.000000e+00> : vector<324x8xf32>
    %17 = tpu.matmul %14, %16, %cst_14 {dimension_numbers = #tpu.dot_dimension_numbers<[1], [0], [0], [1], [0, 0, 1, 1], [], []>} : vector<324x3xf32>, vector<3x8xf32>, vector<324x8xf32> -> vector<324x8xf32>
    %18 = arith.addf %12, %17 : vector<324x8xf32>
    %c0_15 = arith.constant 0 : index
    %c23 = arith.constant 23 : index
    %c0_16 = arith.constant 0 : index
    %19 = vector.load %arg1[%c0_15, %c23, %c0_16] : memref<1x372x3xf32, #tpu.memory_space<vmem>>, vector<1x324x3xf32>
    %20 = vector.shape_cast %19 : vector<1x324x3xf32> to vector<324x3xf32>
    %c3 = arith.constant 3 : index
    %c0_17 = arith.constant 0 : index
    %c0_18 = arith.constant 0 : index
    %21 = vector.load %arg2[%c3, %c0_17, %c0_18] : memref<9x3x8xf32, #tpu.memory_space<vmem>>, vector<1x3x8xf32>
    %22 = vector.shape_cast %21 : vector<1x3x8xf32> to vector<3x8xf32>
    %cst_19 = arith.constant dense<0.000000e+00> : vector<324x8xf32>
    %23 = tpu.matmul %20, %22, %cst_19 {dimension_numbers = #tpu.dot_dimension_numbers<[1], [0], [0], [1], [0, 0, 1, 1], [], []>} : vector<324x3xf32>, vector<3x8xf32>, vector<324x8xf32> -> vector<324x8xf32>
    %24 = arith.addf %18, %23 : vector<324x8xf32>
    %c0_20 = arith.constant 0 : index
    %c24 = arith.constant 24 : index
    %c0_21 = arith.constant 0 : index
    %25 = vector.load %arg1[%c0_20, %c24, %c0_21] : memref<1x372x3xf32, #tpu.memory_space<vmem>>, vector<1x324x3xf32>
    %26 = vector.shape_cast %25 : vector<1x324x3xf32> to vector<324x3xf32>
    %c4 = arith.constant 4 : index
    %c0_22 = arith.constant 0 : index
    %c0_23 = arith.constant 0 : index
    %27 = vector.load %arg2[%c4, %c0_22, %c0_23] : memref<9x3x8xf32, #tpu.memory_space<vmem>>, vector<1x3x8xf32>
    %28 = vector.shape_cast %27 : vector<1x3x8xf32> to vector<3x8xf32>
    %cst_24 = arith.constant dense<0.000000e+00> : vector<324x8xf32>
    %29 = tpu.matmul %26, %28, %cst_24 {dimension_numbers = #tpu.dot_dimension_numbers<[1], [0], [0], [1], [0, 0, 1, 1], [], []>} : vector<324x3xf32>, vector<3x8xf32>, vector<324x8xf32> -> vector<324x8xf32>
    %30 = arith.addf %24, %29 : vector<324x8xf32>
    %c0_25 = arith.constant 0 : index
    %c25 = arith.constant 25 : index
    %c0_26 = arith.constant 0 : index
    %31 = vector.load %arg1[%c0_25, %c25, %c0_26] : memref<1x372x3xf32, #tpu.memory_space<vmem>>, vector<1x324x3xf32>
    %32 = vector.shape_cast %31 : vector<1x324x3xf32> to vector<324x3xf32>
    %c5_27 = arith.constant 5 : index
    %c0_28 = arith.constant 0 : index
    %c0_29 = arith.constant 0 : index
    %33 = vector.load %arg2[%c5_27, %c0_28, %c0_29] : memref<9x3x8xf32, #tpu.memory_space<vmem>>, vector<1x3x8xf32>
    %34 = vector.shape_cast %33 : vector<1x3x8xf32> to vector<3x8xf32>
    %cst_30 = arith.constant dense<0.000000e+00> : vector<324x8xf32>
    %35 = tpu.matmul %32, %34, %cst_30 {dimension_numbers = #tpu.dot_dimension_numbers<[1], [0], [0], [1], [0, 0, 1, 1], [], []>} : vector<324x3xf32>, vector<3x8xf32>, vector<324x8xf32> -> vector<324x8xf32>
    %36 = arith.addf %30, %35 : vector<324x8xf32>
    %c0_31 = arith.constant 0 : index
    %c41 = arith.constant 41 : index
    %c0_32 = arith.constant 0 : index
    %37 = vector.load %arg1[%c0_31, %c41, %c0_32] : memref<1x372x3xf32, #tpu.memory_space<vmem>>, vector<1x324x3xf32>
    %38 = vector.shape_cast %37 : vector<1x324x3xf32> to vector<324x3xf32>
    %c6_33 = arith.constant 6 : index
    %c0_34 = arith.constant 0 : index
    %c0_35 = arith.constant 0 : index
    %39 = vector.load %arg2[%c6_33, %c0_34, %c0_35] : memref<9x3x8xf32, #tpu.memory_space<vmem>>, vector<1x3x8xf32>
    %40 = vector.shape_cast %39 : vector<1x3x8xf32> to vector<3x8xf32>
    %cst_36 = arith.constant dense<0.000000e+00> : vector<324x8xf32>
    %41 = tpu.matmul %38, %40, %cst_36 {dimension_numbers = #tpu.dot_dimension_numbers<[1], [0], [0], [1], [0, 0, 1, 1], [], []>} : vector<324x3xf32>, vector<3x8xf32>, vector<324x8xf32> -> vector<324x8xf32>
    %42 = arith.addf %36, %41 : vector<324x8xf32>
    %c0_37 = arith.constant 0 : index
    %c42 = arith.constant 42 : index
    %c0_38 = arith.constant 0 : index
    %43 = vector.load %arg1[%c0_37, %c42, %c0_38] : memref<1x372x3xf32, #tpu.memory_space<vmem>>, vector<1x324x3xf32>
    %44 = vector.shape_cast %43 : vector<1x324x3xf32> to vector<324x3xf32>
    %c7_39 = arith.constant 7 : index
    %c0_40 = arith.constant 0 : index
    %c0_41 = arith.constant 0 : index
    %45 = vector.load %arg2[%c7_39, %c0_40, %c0_41] : memref<9x3x8xf32, #tpu.memory_space<vmem>>, vector<1x3x8xf32>
    %46 = vector.shape_cast %45 : vector<1x3x8xf32> to vector<3x8xf32>
    %cst_42 = arith.constant dense<0.000000e+00> : vector<324x8xf32>
    %47 = tpu.matmul %44, %46, %cst_42 {dimension_numbers = #tpu.dot_dimension_numbers<[1], [0], [0], [1], [0, 0, 1, 1], [], []>} : vector<324x3xf32>, vector<3x8xf32>, vector<324x8xf32> -> vector<324x8xf32>
    %48 = arith.addf %42, %47 : vector<324x8xf32>
    %c0_43 = arith.constant 0 : index
    %c43 = arith.constant 43 : index
    %c0_44 = arith.constant 0 : index
    %49 = vector.load %arg1[%c0_43, %c43, %c0_44] : memref<1x372x3xf32, #tpu.memory_space<vmem>>, vector<1x324x3xf32>
    %50 = vector.shape_cast %49 : vector<1x324x3xf32> to vector<324x3xf32>
    %c8 = arith.constant 8 : index
    %c0_45 = arith.constant 0 : index
    %c0_46 = arith.constant 0 : index
    %51 = vector.load %arg2[%c8, %c0_45, %c0_46] : memref<9x3x8xf32, #tpu.memory_space<vmem>>, vector<1x3x8xf32>
    %52 = vector.shape_cast %51 : vector<1x3x8xf32> to vector<3x8xf32>
    %cst_47 = arith.constant dense<0.000000e+00> : vector<324x8xf32>
    %53 = tpu.matmul %50, %52, %cst_47 {dimension_numbers = #tpu.dot_dimension_numbers<[1], [0], [0], [1], [0, 0, 1, 1], [], []>} : vector<324x3xf32>, vector<3x8xf32>, vector<324x8xf32> -> vector<324x8xf32>
    %54 = arith.addf %48, %53 : vector<324x8xf32>
    %c0_48 = arith.constant 0 : index
    %c0_49 = arith.constant 0 : index
    %55 = vector.load %arg3[%c0_48, %c0_49] : memref<1x8xf32, #tpu.memory_space<vmem>>, vector<1x8xf32>
    %56 = vector.broadcast %55 : vector<1x8xf32> to vector<324x8xf32>
    %57 = arith.addf %54, %56 : vector<324x8xf32>
    %cst_50 = arith.constant 2.000000e-01 : f32
    %58 = vector.broadcast %cst_50 : f32 to vector<324x8xf32>
    %59 = arith.mulf %58, %57 : vector<324x8xf32>
    %60 = arith.maximumf %57, %59 : vector<324x8xf32>
    %c0_51 = arith.constant 0 : index
    %c0_52 = arith.constant 0 : index
    %61 = vector.load %arg4[%c0_51, %c0_52] : memref<324x1xf32, #tpu.memory_space<vmem>>, vector<324x1xf32>
    %62 = vector.broadcast %61 : vector<324x1xf32> to vector<324x8xf32>
    %63 = arith.mulf %60, %62 : vector<324x8xf32>
    %cst_53 = arith.constant 0.000000e+00 : f32
    %64 = vector.broadcast %cst_53 : f32 to vector<372x8xf32>
    %c0_54 = arith.constant 0 : index
    %c0_55 = arith.constant 0 : index
    %c0_56 = arith.constant 0 : index
    %65 = vector.load %arg5[%c0_54, %c0_55, %c0_56] : memref<1x372x8xf32, #tpu.memory_space<vmem>>, vector<1x372x8xf32>
    %66 = vector.shape_cast %65 : vector<1x372x8xf32> to vector<372x8xf32>
    %67 = vector.shape_cast %64 : vector<372x8xf32> to vector<1x372x8xf32>
    tpu.vector_store %arg5[%c0_54, %c0_55, %c0_56], %67 {strides = array<i32>} : memref<1x372x8xf32, #tpu.memory_space<vmem>>, vector<1x372x8xf32>,
    %c0_57 = arith.constant 0 : index
    %c24_58 = arith.constant 24 : index
    %c0_59 = arith.constant 0 : index
    %68 = vector.load %arg5[%c0_57, %c24_58, %c0_59] : memref<1x372x8xf32, #tpu.memory_space<vmem>>, vector<1x324x8xf32>
    %69 = vector.shape_cast %68 : vector<1x324x8xf32> to vector<324x8xf32>
    %70 = vector.shape_cast %63 : vector<324x8xf32> to vector<1x324x8xf32>
    tpu.vector_store %arg5[%c0_57, %c24_58, %c0_59], %70 {strides = array<i32>} : memref<1x372x8xf32, #tpu.memory_space<vmem>>, vector<1x324x8xf32>,
    return
  }
  func.func @transform_0(%arg0: i32) -> (i32, i32, i32) {
    %c0_i32 = arith.constant 0 : i32
    %c0_i32_0 = arith.constant 0 : i32
    %c0_i32_1 = arith.constant 0 : i32
    return %arg0, %c0_i32, %c0_i32_0 : i32, i32, i32
  }
  func.func @transform_1(%arg0: i32) -> (i32, i32, i32) {
    %c0_i32 = arith.constant 0 : i32
    %c0_i32_0 = arith.constant 0 : i32
    %c0_i32_1 = arith.constant 0 : i32
    %c0_i32_2 = arith.constant 0 : i32
    return %c0_i32, %c0_i32_0, %c0_i32_1 : i32, i32, i32
  }
  func.func @transform_2(%arg0: i32) -> (i32, i32) {
    %c0_i32 = arith.constant 0 : i32
    %c0_i32_0 = arith.constant 0 : i32
    %c0_i32_1 = arith.constant 0 : i32
    return %c0_i32, %c0_i32_0 : i32, i32
  }
  func.func @transform_3(%arg0: i32) -> (i32, i32) {
    %c0_i32 = arith.constant 0 : i32
    %c0_i32_0 = arith.constant 0 : i32
    %c0_i32_1 = arith.constant 0 : i32
    return %c0_i32, %c0_i32_0 : i32, i32
  }
  func.func @transform_4(%arg0: i32) -> (i32, i32, i32) {
    %c0_i32 = arith.constant 0 : i32
    %c0_i32_0 = arith.constant 0 : i32
    %c0_i32_1 = arith.constant 0 : i32
    return %arg0, %c0_i32, %c0_i32_0 : i32, i32, i32
  }
}

</mosaic_0001>

<bundles_post_ra>
// kernel: tpu_custom_call.1
= control target key start
LH: loop header
LB: loop body
LE: loop exit
PB: predicated region body
PF: predicated region fallthrough
CT: control target
= control target key end

     0   :  { %s4275_s15 = smov 0   ;;  %s5802_s0 = inlined_call_operand.vmem [shape: f32[2,372,3], index: 0, kind: input, shape index: {}]   ;;  %s5803_s1 = inlined_call_operand.vmem [shape: f32[9,3,8], index: 1, kind: input, shape index: {}]   ;;  %s5804_s2 = inlined_call_operand.vmem [shape: f32[1,8], index: 2, kind: input, shape index: {}]   ;;  %s5805_s3 = inlined_call_operand.vmem [shape: f32[324,1], index: 3, kind: input, shape index: {}]   ;;  %s5806_s4 = inlined_call_operand.vmem [shape: f32[2,372,8], index: 4, kind: output, shape index: {}]  }
   0x1 LB: > { %s3826_s16 = sadd.s32 4294967295, %s4246_s15   ;;  %p3830_p0 = scmp.ge.s32.totalorder %s4246_s15, 1  ;;  %s4246_s15 = sphi %s4275_s15, %s14_s15  }
   0x2   : > { %p162_p1 = scmp.lt.s32.totalorder %s4246_s15, 3 }
   0x4   : > { %p163_p2 = pnand %p3830_p0, %p162_p1 }
   0x5   : > { %p188_p3 = scmp.lt.s32.totalorder (!%p163_p2), %s3826_s16, 1 }
   0x6   : > { %166 = sbr.rel (%p163_p2) target bundleno = 900 (0x384), region = 36 }
   0xb   : > { %v3833_v0 = vld [vmem:[%s5803_s1 + $0x4] sm:$0x7]  ;;  %vm407_vm0 = vcmask 1042432   ;;  %v3918_v1 = vld [vmem:[%s5803_s1 + $0x8] sm:$0x7]  ;;  %s5808_s16 = smov (!%p188_p3, %s3826_s16), 1 }
   0xc   : > { %4221 = vmatpush.msk.msra.mxu1 %vm407_vm0, %v3833_v0  ;;  %4222 = vmatpush.msk.msra.mxu2 %vm407_vm0, %v3833_v0  ;;  %v239_v2 = vld [vmem:[%s5803_s1] sm:$0x7]  ;;  %v4004_v3 = vld [vmem:[%s5803_s1 + $0x10] sm:$0x7]  ;;  %v3961_v4 = vld [vmem:[%s5803_s1 + $0xc] sm:$0x7] }
   0xd   : > { %3834 = vmatpush.msk.msra.mxu0 %vm407_vm0, %v3833_v0  ;;  %4223 = vmatpush.msk.msra.mxu3 %vm407_vm0, %v3833_v0  ;;  %s4224_s27 = smul.u32 376, %s5808_s16  ;;  %vm283_vm1 = vcmask 23552   ;;  %v4090_v37 = vld [vmem:[%s5803_s1 + $0x18] sm:$0x7]  ;;  %v4133_v38 = vld [vmem:[%s5803_s1 + $0x1c] sm:$0x7] }
   0xe   : > { %3919 = vmatpush.msk.msrb.mxu2 %vm407_vm0, %v3918_v1  ;;  %3876 = vmatpush.msk.msrb.mxu1 %vm407_vm0, %v239_v2  ;;  %v4047_v39 = vld [vmem:[%s5803_s1 + $0x14] sm:$0x7]  ;;  %v4176_v44 = vld [vmem:[%s5803_s1 + $0x20] sm:$0x7]  ;;  %vm3681_vm2 = vcmask 64512   ;;  %vm3728_vm3 = vcmask 60416  }
   0xf   : > { %4005 = vmatpush.msk.msrb.mxu0 %vm407_vm0, %v4004_v3  ;;  %3962 = vmatpush.msk.msrb.mxu3 %vm407_vm0, %v3961_v4  ;;  %s4314_s30 = scalar_lea.vmem %s5802_s0, %s4224_s27  ;;  %s5140_s23 = scalar_lea.vmem %s5806_s4, %s4224_s27 }
  0x10   : > { %v251_v5 = vld [vmem:[%s4314_s30 + $0x5e] sm:$0xff]  ;;  %v262_v6 = vld [vmem:[%s4314_s30 + $0xb6] sm:$0xff]  ;;  %v240_v7 = vld [vmem:[%s4314_s30 + $0x6] sm:$0xff] }
  0x11   : > { %3846 = vmatmul.msk.f32.vlgmr.msra.gmra.mxu1 %vm283_vm1, %v251_v5  ;;  %3857 = vmatmul.msk.f32.vlgmr.msra.gmra.mxu2 %vm283_vm1, %v262_v6  ;;  %v273_v8 = vld [vmem:[%s4314_s30 + $0x10e] sm:$0xff]  ;;  %v252_v9 = vld [vmem:[%s4314_s30 + $0x66] sm:$0xff]  ;;  %v263_v10 = vld [vmem:[%s4314_s30 + $0xbe] sm:$0xff] }
  0x12   : > { %3835 = vmatmul.msk.f32.vlgmr.msra.gmra.mxu0 %vm283_vm1, %v240_v7  ;;  %3868 = vmatmul.msk.f32.vlgmr.msra.gmra.mxu3 %vm283_vm1, %v273_v8  ;;  %v241_v11 = vld [vmem:[%s4314_s30 + $0xe] sm:$0xff]  ;;  %v274_v12 = vld [vmem:[%s4314_s30 + $0x116] sm:$0xff]  ;;  %v264_v14 = vld [vmem:[%s4314_s30 + $0xc6] sm:$0xff] }
  0x13   : > { %v253_v13 = vld [vmem:[%s4314_s30 + $0x6e] sm:$0xff]  ;;  %v242_v15 = vld [vmem:[%s4314_s30 + $0x16] sm:$0xff]  ;;  %v275_v16 = vld [vmem:[%s4314_s30 + $0x11e] sm:$0xff]  ;;  %4091 = vmatpush.msk.msra.mxu2 %vm407_vm0, %v4090_v37  ;;  %4134 = vmatpush.msk.msra.mxu3 %vm407_vm0, %v4133_v38 }
  0x14   : > { %v254_v17 = vld [vmem:[%s4314_s30 + $0x76] sm:$0xff]  ;;  %v265_v18 = vld [vmem:[%s4314_s30 + $0xce] sm:$0xff]  ;;  %v243_v19 = vld [vmem:[%s4314_s30 + $0x1e] sm:$0xff]  ;;  %4048 = vmatpush.msk.msra.mxu1 %vm407_vm0, %v4047_v39  ;;  %4177 = vmatpush.msk.msra.mxu0 %vm407_vm0, %v4176_v44 }
  0x15   : > { %v276_v20 = vld [vmem:[%s4314_s30 + $0x126] sm:$0xff]  ;;  %v255_v21 = vld [vmem:[%s4314_s30 + $0x7e] sm:$0xff]  ;;  %v266_v22 = vld [vmem:[%s4314_s30 + $0xd6] sm:$0xff] }
  0x16   : > { %v244_v23 = vld [vmem:[%s4314_s30 + $0x26] sm:$0xff]  ;;  %v277_v24 = vld [vmem:[%s4314_s30 + $0x12e] sm:$0xff]  ;;  %v267_v26 = vld [vmem:[%s4314_s30 + $0xde] sm:$0xff] }
  0x17   : > { %v256_v25 = vld [vmem:[%s4314_s30 + $0x86] sm:$0xff]  ;;  %v245_v27 = vld [vmem:[%s4314_s30 + $0x2e] sm:$0xff]  ;;  %v278_v28 = vld [vmem:[%s4314_s30 + $0x136] sm:$0xff] }
  0x18   : > { %v257_v29 = vld [vmem:[%s4314_s30 + $0x8e] sm:$0xff]  ;;  %v268_v30 = vld [vmem:[%s4314_s30 + $0xe6] sm:$0xff]  ;;  %v246_v31 = vld [vmem:[%s4314_s30 + $0x36] sm:$0xff] }
  0x19   : > { %3847 = vmatmul.msk.f32.gmra.mxu1 %vm283_vm1, %v252_v9  ;;  %3858 = vmatmul.msk.f32.gmra.mxu2 %vm283_vm1, %v263_v10  ;;  %v279_v32 = vld [vmem:[%s4314_s30 + $0x13e] sm:$0xff]  ;;  %v258_v33 = vld [vmem:[%s4314_s30 + $0x96] sm:$0xff]  ;;  %v269_v34 = vld [vmem:[%s4314_s30 + $0xee] sm:$0xff] }
  0x1a   : > { %3836 = vmatmul.msk.f32.gmra.mxu0 %vm283_vm1, %v241_v11  ;;  %3869 = vmatmul.msk.f32.gmra.mxu3 %vm283_vm1, %v274_v12  ;;  %v247_v35 = vld [vmem:[%s4314_s30 + $0x3e] sm:$0xff]  ;;  %v280_v36 = vld [vmem:[%s4314_s30 + $0x146] sm:$0xf]  ;;  %v270_v41 = vld [vmem:[%s4314_s30 + $0xf6] sm:$0xff] }
  0x1b   : > { %v259_v40 = vld [vmem:[%s4314_s30 + $0x9e] sm:$0xff]  ;;  %v248_v42 = vld [vmem:[%s4314_s30 + $0x46] sm:$0xff]  ;;  %v249_v47 = vld [vmem:[%s4314_s30 + $0x4e] sm:$0xff] }
  0x1c   : > { %v1167_v43 = vld [vmem:[%s4314_s30 + $0x17] sm:$0xff]  ;;  %v260_v45 = vld [vmem:[%s4314_s30 + $0xa6] sm:$0xff]  ;;  %v261_v49 = vld [vmem:[%s4314_s30 + $0xae] sm:$0xff] }
  0x1d   : > { %v271_v46 = vld [vmem:[%s4314_s30 + $0xfe] sm:$0xff]  ;;  %v272_v50 = vld [vmem:[%s4314_s30 + $0x106] sm:$0xff]  ;;  %v250_v51 = vld [vmem:[%s4314_s30 + $0x56] sm:$0xff] }
  0x1e   : > { %v1168_v48 = vld [vmem:[%s4314_s30 + $0x1f] sm:$0xff]  ;;  %v1169_v52 = vld [vmem:[%s4314_s30 + $0x27] sm:$0xff]  ;;  %v1170_v56 = vld [vmem:[%s4314_s30 + $0x2f] sm:$0xff] }
  0x1f   : > { %v198_v53 = vld [vmem:[%s4314_s30 + $0x5] sm:$0xff]  ;;  %v1517_v55 = vld [vmem:[%s4314_s30 + $0x18] sm:$0xff]  ;;  %v199_v57 = vld [vmem:[%s4314_s30 + $0xd] sm:$0xff] }
  0x20   : > { %v817_v54 = vld [vmem:[%s4314_s30 + $0x7] sm:$0xff]  ;;  %v818_v58 = vld [vmem:[%s4314_s30 + $0xf] sm:$0xff]  ;;  %v1171_v60 = vld [vmem:[%s4314_s30 + $0x37] sm:$0xff] }
  0x21   : > { %3848 = vmatmul.msk.f32.gmra.mxu1 %vm283_vm1, %v253_v13  ;;  %3859 = vmatmul.msk.f32.gmra.mxu2 %vm283_vm1, %v264_v14  ;;  %v1518_v59 = vld [vmem:[%s4314_s30 + $0x20] sm:$0xff]  ;;  %v200_v61 = vld [vmem:[%s4314_s30 + $0x15] sm:$0xff]  ;;  %v1519_v62 = vld [vmem:[%s4314_s30 + $0x28] sm:$0xff] }
  0x22   : > { %3837 = vmatmul.msk.f32.gmra.mxu0 %vm283_vm1, %v242_v15  ;;  %3870 = vmatmul.msk.f32.gmra.mxu3 %vm283_vm1, %v275_v16  ;;  %v1172_v63 = vld [vmem:[%s4314_s30 + $0x3f] sm:$0xff]  ;;  %v1520_v1 = vld [vmem:[%s4314_s30 + $0x30] sm:$0xff]  ;;  %v1173_v2 = vld [vmem:[%s4314_s30 + $0x47] sm:$0xff] }
  0x23   : > { %v201_v0 = vld [vmem:[%s4314_s30 + $0x1d] sm:$0xff]  ;;  %v202_v3 = vld [vmem:[%s4314_s30 + $0x25] sm:$0xff]  ;;  %v1174_v5 = vld [vmem:[%s4314_s30 + $0x4f] sm:$0xff] }
  0x24   : > { %v1521_v4 = vld [vmem:[%s4314_s30 + $0x38] sm:$0xff]  ;;  %v203_v7 = vld [vmem:[%s4314_s30 + $0x2d] sm:$0xff]  ;;  %v1522_v9 = vld [vmem:[%s4314_s30 + $0x40] sm:$0xff] }
  0x25   : > { %v1175_v10 = vld [vmem:[%s4314_s30 + $0x57] sm:$0xff]  ;;  %v1523_v15 = vld [vmem:[%s4314_s30 + $0x48] sm:$0xff] }
  0x26   : > { %v204_v13 = vld [vmem:[%s4314_s30 + $0x35] sm:$0xff] }
  0x27   : > { %v1179_v38 = vld [vmem:[%s4314_s30 + $0x77] sm:$0xff] }
  0x29   : > { %3849 = vmatmul.msk.f32.gmra.mxu1 %vm283_vm1, %v254_v17  ;;  %3860 = vmatmul.msk.f32.gmra.mxu2 %vm283_vm1, %v265_v18  ;;  %v1176_v17 = vld [vmem:[%s4314_s30 + $0x5f] sm:$0xff] }
  0x2a   : > { %3838 = vmatmul.msk.f32.gmra.mxu0 %vm283_vm1, %v243_v19  ;;  %3871 = vmatmul.msk.f32.gmra.mxu3 %vm283_vm1, %v276_v20  ;;  %v205_v20 = vld [vmem:[%s4314_s30 + $0x3d] sm:$0xff] }
  0x31   : > { %3850 = vmatmul.msk.f32.gmra.mxu1 %vm283_vm1, %v255_v21  ;;  %3861 = vmatmul.msk.f32.gmra.mxu2 %vm283_vm1, %v266_v22  ;;  %v1524_v22 = vld [vmem:[%s4314_s30 + $0x50] sm:$0xff] }
  0x32   : > { %3839 = vmatmul.msk.f32.gmra.mxu0 %vm283_vm1, %v244_v23  ;;  %3872 = vmatmul.msk.f32.gmra.mxu3 %vm283_vm1, %v277_v24  ;;  %v1177_v24 = vld [vmem:[%s4314_s30 + $0x67] sm:$0xff] }
  0x39   : > { %3851 = vmatmul.msk.f32.gmra.mxu1 %vm283_vm1, %v256_v25  ;;  %3862 = vmatmul.msk.f32.gmra.mxu2 %vm283_vm1, %v267_v26 }
  0x3a   : > { %3840 = vmatmul.msk.f32.gmra.mxu0 %vm283_vm1, %v245_v27  ;;  %3873 = vmatmul.msk.f32.gmra.mxu3 %vm283_vm1, %v278_v28  ;;  %v206_v27 = vld [vmem:[%s4314_s30 + $0x45] sm:$0xff] }
  0x41   : > { %3852 = vmatmul.msk.f32.gmra.mxu1 %vm283_vm1, %v257_v29  ;;  %3863 = vmatmul.msk.f32.gmra.mxu2 %vm283_vm1, %v268_v30  ;;  %v1525_v29 = vld [vmem:[%s4314_s30 + $0x58] sm:$0xff] }
  0x42   : > { %3841 = vmatmul.msk.f32.gmra.mxu0 %vm283_vm1, %v246_v31  ;;  %3874 = vmatmul.msk.f32.gmra.mxu3 %vm283_vm1, %v279_v32  ;;  %v1178_v31 = vld [vmem:[%s4314_s30 + $0x6f] sm:$0xff] }
  0x49   : > { %3853 = vmatmul.msk.f32.gmra.mxu1 %vm283_vm1, %v258_v33  ;;  %3864 = vmatmul.msk.f32.gmra.mxu2 %vm283_vm1, %v269_v34  ;;  %v207_v34 = vld [vmem:[%s4314_s30 + $0x4d] sm:$0xff] }
  0x4a   : > { %3842 = vmatmul.msk.f32.gmra.mxu0 %vm283_vm1, %v247_v35  ;;  %3875 = vmatmul.msk.f32.gmra.mxu3 %vm283_vm1, %v280_v36  ;;  %v1526_v36 = vld [vmem:[%s4314_s30 + $0x60] sm:$0xff] }
  0x51   : > { %3854 = vmatmul.msk.f32.gmra.mxu1 %vm283_vm1, %v259_v40  ;;  %3865 = vmatmul.msk.f32.gmra.mxu2 %vm283_vm1, %v270_v41  ;;  %v208_v41 = vld [vmem:[%s4314_s30 + $0x55] sm:$0xff] }
  0x52   : > { %3843 = vmatmul.msk.f32.gmra.mxu0 %vm283_vm1, %v248_v42  ;;  %3963 = vmatmul.msk.f32.vlgmr.msrb.gmra.mxu3 %vm283_vm1, %v1167_v43 }
  0x59   : > { %3855 = vmatmul.msk.f32.gmra.mxu1 %vm283_vm1, %v260_v45  ;;  %3866 = vmatmul.msk.f32.gmra.mxu2 %vm283_vm1, %v271_v46  ;;  %v1180_v45 = vld [vmem:[%s4314_s30 + $0x7f] sm:$0xff] }
  0x5a   : > { %3844 = vmatmul.msk.f32.gmra.mxu0 %vm283_vm1, %v249_v47  ;;  %3964 = vmatmul.msk.f32.gmra.mxu3 %vm283_vm1, %v1168_v48 }
  0x61   : > { %3856 = vmatmul.msk.f32.gmra.mxu1 %vm283_vm1, %v261_v49  ;;  %3867 = vmatmul.msk.f32.gmra.mxu2 %vm283_vm1, %v272_v50  ;;  %v1528_v50 = vld [vmem:[%s4314_s30 + $0x70] sm:$0xff] }
  0x62   : > { %3845 = vmatmul.msk.f32.gmra.mxu0 %vm283_vm1, %v250_v51  ;;  %3965 = vmatmul.msk.f32.gmra.mxu3 %vm283_vm1, %v1169_v52 }
  0x69   : > { %3877 = vmatmul.msk.f32.vlgmr.msrb.gmra.mxu1 %vm283_vm1, %v198_v53  ;;  %3920 = vmatmul.msk.f32.vlgmr.msrb.gmra.mxu2 %vm283_vm1, %v817_v54 }
  0x6a   : > { %4006 = vmatmul.msk.f32.vlgmr.msrb.gmra.mxu0 %vm283_vm1, %v1517_v55  ;;  %3966 = vmatmul.msk.f32.gmra.mxu3 %vm283_vm1, %v1170_v56  ;;  %v210_v55 = vld [vmem:[%s4314_s30 + $0x65] sm:$0xff] }
  0x71   : > { %3878 = vmatmul.msk.f32.gmra.mxu1 %vm283_vm1, %v199_v57  ;;  %3921 = vmatmul.msk.f32.gmra.mxu2 %vm283_vm1, %v818_v58  ;;  %v1529_v57 = vld [vmem:[%s4314_s30 + $0x78] sm:$0xff] }
  0x72   : > { %4007 = vmatmul.msk.f32.gmra.mxu0 %vm283_vm1, %v1518_v59  ;;  %3967 = vmatmul.msk.f32.gmra.mxu3 %vm283_vm1, %v1171_v60  ;;  %v1182_v59 = vld [vmem:[%s4314_s30 + $0x8f] sm:$0xff] }
  0x79   : > { %3879 = vmatmul.msk.f32.gmra.mxu1 %vm283_vm1, %v200_v61  ;;  %3922 = vmatmul.msk.f32.gmra.mxu2 %vm283_vm1, %v1167_v43  ;;  %v1527_v43 = vld [vmem:[%s4314_s30 + $0x68] sm:$0xff] }
  0x7a   : > { %4008 = vmatmul.msk.f32.gmra.mxu0 %vm283_vm1, %v1519_v62  ;;  %3968 = vmatmul.msk.f32.gmra.mxu3 %vm283_vm1, %v1172_v63  ;;  %v211_v62 = vld [vmem:[%s4314_s30 + $0x6d] sm:$0xff] }
  0x81   : > { %3880 = vmatmul.msk.f32.gmra.mxu1 %vm283_vm1, %v201_v0  ;;  %3923 = vmatmul.msk.f32.gmra.mxu2 %vm283_vm1, %v1168_v48  ;;  %v209_v48 = vld [vmem:[%s4314_s30 + $0x5d] sm:$0xff] }
  0x82   : > { %4009 = vmatmul.msk.f32.gmra.mxu0 %vm283_vm1, %v1520_v1  ;;  %3969 = vmatmul.msk.f32.gmra.mxu3 %vm283_vm1, %v1173_v2  ;;  %v1530_v0 = vld [vmem:[%s4314_s30 + $0x80] sm:$0xff] }
  0x89   : > { %3881 = vmatmul.msk.f32.gmra.mxu1 %vm283_vm1, %v202_v3  ;;  %3924 = vmatmul.msk.f32.gmra.mxu2 %vm283_vm1, %v1169_v52  ;;  %v1181_v52 = vld [vmem:[%s4314_s30 + $0x87] sm:$0xff] }
  0x8a   : > { %4010 = vmatmul.msk.f32.gmra.mxu0 %vm283_vm1, %v1521_v4  ;;  %3970 = vmatmul.msk.f32.gmra.mxu3 %vm283_vm1, %v1174_v5 }
  0x8e   : > { %v4457_v6 = vpop.f32.mrf.mxu1 }
  0x8f   : > { %v4460_v8 = vpop.f32.mrf.mxu0 }
  0x91   : > { %3882 = vmatmul.msk.f32.gmra.mxu1 %vm283_vm1, %v203_v7  ;;  %3925 = vmatmul.msk.f32.gmra.mxu2 %vm283_vm1, %v1170_v56 }
  0x92   : > { %4011 = vmatmul.msk.f32.gmra.mxu0 %vm283_vm1, %v1522_v9  ;;  %3971 = vmatmul.msk.f32.gmra.mxu3 %vm283_vm1, %v1175_v10  ;;  %v1531_v9 = vld [vmem:[%s4314_s30 + $0x88] sm:$0xff] }
  0x94   : > { %v4467_v11 = vpop.f32.mrf.mxu2 }
  0x95   : > { %v4476_v16 = vpop.f32.mrf.mxu3 }
  0x96   : > { %v4470_v12 = vpop.f32.mrf.mxu1 }
  0x97   : > { %v4473_v14 = vpop.f32.mrf.mxu0 }
  0x99   : > { %3883 = vmatmul.msk.f32.gmra.mxu1 %vm283_vm1, %v204_v13  ;;  %3926 = vmatmul.msk.f32.gmra.mxu2 %vm283_vm1, %v1171_v60  ;;  %v4599_v13 = vld [vmem:[%s4314_s30 + $0x9f] sm:$0xff] }
  0x9a   : > { %4012 = vmatmul.msk.f32.gmra.mxu0 %vm283_vm1, %v1523_v15  ;;  %3972 = vmatmul.msk.f32.gmra.mxu3 %vm283_vm1, %v1176_v17 }
  0x9c   : > { %v4482_v18 = vpop.f32.mrf.mxu2 }
  0x9d   : > { %v4491_v23 = vpop.f32.mrf.mxu3 }
  0x9e   : > { %v4485_v19 = vpop.f32.mrf.mxu1 }
  0x9f   : > { %v4488_v21 = vpop.f32.mrf.mxu0 }
  0xa1   : > { %3884 = vmatmul.msk.f32.gmra.mxu1 %vm283_vm1, %v205_v20  ;;  %3927 = vmatmul.msk.f32.gmra.mxu2 %vm283_vm1, %v1172_v63  ;;  %v213_v20 = vld [vmem:[%s4314_s30 + $0x7d] sm:$0xff] }
  0xa2   : > { %4013 = vmatmul.msk.f32.gmra.mxu0 %vm283_vm1, %v1524_v22  ;;  %3973 = vmatmul.msk.f32.gmra.mxu3 %vm283_vm1, %v1177_v24 }
  0xa4   : > { %v4497_v25 = vpop.f32.mrf.mxu2 }
  0xa5   : > { %v4506_v30 = vpop.f32.mrf.mxu3 }
  0xa6   : > { %v4500_v26 = vpop.f32.mrf.mxu1 }
  0xa7   : > { %v4503_v28 = vpop.f32.mrf.mxu0 }
  0xa9   : > { %3885 = vmatmul.msk.f32.gmra.mxu1 %vm283_vm1, %v206_v27  ;;  %3928 = vmatmul.msk.f32.gmra.mxu2 %vm283_vm1, %v1173_v2  ;;  %v1183_v2 = vld [vmem:[%s4314_s30 + $0x97] sm:$0xff] }
  0xaa   : > { %4014 = vmatmul.msk.f32.gmra.mxu0 %vm283_vm1, %v1525_v29  ;;  %3974 = vmatmul.msk.f32.gmra.mxu3 %vm283_vm1, %v1178_v31  ;;  %v4615_v29 = vld [vmem:[%s4314_s30 + $0xa7] sm:$0xff] }
  0xac   : > { %v4512_v32 = vpop.f32.mrf.mxu2 }
  0xad   : > { %v4521_v37 = vpop.f32.mrf.mxu3 }
  0xae   : > { %v4515_v33 = vpop.f32.mrf.mxu1 }
  0xaf   : > { %v4518_v35 = vpop.f32.mrf.mxu0 }
  0xb1   : > { %3886 = vmatmul.msk.f32.gmra.mxu1 %vm283_vm1, %v207_v34  ;;  %3929 = vmatmul.msk.f32.gmra.mxu2 %vm283_vm1, %v1174_v5  ;;  %v212_v5 = vld [vmem:[%s4314_s30 + $0x75] sm:$0xff] }
  0xb2   : > { %4015 = vmatmul.msk.f32.gmra.mxu0 %vm283_vm1, %v1526_v36  ;;  %3975 = vmatmul.msk.f32.gmra.mxu3 %vm283_vm1, %v1179_v38  ;;  %v214_v36 = vld [vmem:[%s4314_s30 + $0x85] sm:$0xff] }
  0xb4   : > { %v4527_v39 = vpop.f32.mrf.mxu2 }
  0xb5   : > { %v4536_v44 = vpop.f32.mrf.mxu3 }
  0xb6   : > { %v4530_v40 = vpop.f32.mrf.mxu1 }
  0xb7   : > { %v4533_v42 = vpop.f32.mrf.mxu0 }
  0xb9   : > { %3887 = vmatmul.msk.f32.gmra.mxu1 %vm283_vm1, %v208_v41  ;;  %3930 = vmatmul.msk.f32.gmra.mxu2 %vm283_vm1, %v1175_v10  ;;  %v1533_v41 = vld [vmem:[%s4314_s30 + $0x98] sm:$0xff] }
  0xba   : > { %4016 = vmatmul.msk.f32.gmra.mxu0 %vm283_vm1, %v1527_v43  ;;  %3976 = vmatmul.msk.f32.gmra.mxu3 %vm283_vm1, %v1180_v45 }
  0xbc   : > { %v4542_v46 = vpop.f32.mrf.mxu2 }
  0xbd   : > { %v4551_v51 = vpop.f32.mrf.mxu3 }
  0xbe   : > { %v4545_v47 = vpop.f32.mrf.mxu1 }
  0xbf   : > { %v4548_v49 = vpop.f32.mrf.mxu0 }
  0xc1   : > { %3888 = vmatmul.msk.f32.gmra.mxu1 %vm283_vm1, %v209_v48  ;;  %3931 = vmatmul.msk.f32.gmra.mxu2 %vm283_vm1, %v1176_v17 }
  0xc2   : > { %4017 = vmatmul.msk.f32.gmra.mxu0 %vm283_vm1, %v1528_v50  ;;  %3977 = vmatmul.msk.f32.gmra.mxu3 %vm283_vm1, %v1181_v52 }
  0xc4   : > { %v4557_v53 = vpop.f32.mrf.mxu2 }
  0xc5   : > { %v4566_v58 = vpop.f32.mrf.mxu3 }
  0xc6   : > { %v4560_v54 = vpop.f32.mrf.mxu1 }
  0xc7   : > { %v4563_v56 = vpop.f32.mrf.mxu0 }
  0xc9   : > { %3889 = vmatmul.msk.f32.gmra.mxu1 %vm283_vm1, %v210_v55  ;;  %3932 = vmatmul.msk.f32.gmra.mxu2 %vm283_vm1, %v1177_v24  ;;  %v1532_v24 = vld [vmem:[%s4314_s30 + $0x90] sm:$0xff] }
  0xca   : > { %4018 = vmatmul.msk.f32.gmra.mxu0 %vm283_vm1, %v1529_v57  ;;  %3978 = vmatmul.msk.f32.gmra.mxu3 %vm283_vm1, %v1182_v59 }
  0xcc   : > { %v4572_v60 = vpop.f32.mrf.mxu2 }
  0xcd   : > { %v4581_v1 = vpop.f32.mrf.mxu3 }
  0xce   : > { %v4575_v61 = vpop.f32.mrf.mxu1 }
  0xcf   : > { %v4578_v63 = vpop.f32.mrf.mxu0 }
  0xd1   : > { %3890 = vmatmul.msk.f32.gmra.mxu1 %vm283_vm1, %v211_v62  ;;  %3933 = vmatmul.msk.f32.gmra.mxu2 %vm283_vm1, %v1178_v31  ;;  %v215_v62 = vld [vmem:[%s4314_s30 + $0x8d] sm:$0xff] }
  0xd2   : > { %4019 = vmatmul.msk.f32.gmra.mxu0 %vm283_vm1, %v1530_v0  ;;  %3979 = vmatmul.msk.f32.gmra.mxu3 %vm283_vm1, %v1183_v2 }
  0xd4   : > { %v4587_v3 = vpop.f32.mrf.mxu2 }
  0xd5   : > { %v1353_v10 = vpop.f32.mrf.mxu3 }
  0xd6   : > { %v4590_v4 = vpop.f32.mrf.mxu1 }
  0xd7   : > { %v4593_v7 = vpop.f32.mrf.mxu0 }
  0xd9   : > { %3891 = vmatmul.msk.f32.gmra.mxu1 %vm283_vm1, %v212_v5  ;;  %3934 = vmatmul.msk.f32.gmra.mxu2 %vm283_vm1, %v1179_v38 }
  0xda   : > { %4020 = vmatmul.msk.f32.gmra.mxu0 %vm283_vm1, %v1531_v9  ;;  %3980 = vmatmul.msk.f32.gmra.mxu3 %vm283_vm1, %v4599_v13  ;;  %v1534_v9 = vld [vmem:[%s4314_s30 + $0xa0] sm:$0xff] }
  0xdc   : > { %v4602_v15 = vpop.f32.mrf.mxu2 }
  0xdd   : > { %v1356_v27 = vpop.f32.mrf.mxu3 }
  0xde   : > { %v4606_v17 = vpop.f32.mrf.mxu1 }
  0xdf   : > { %v4609_v22 = vpop.f32.mrf.mxu0 }
  0xe1   : > { %3892 = vmatmul.msk.f32.gmra.mxu1 %vm283_vm1, %v213_v20  ;;  %3935 = vmatmul.msk.f32.gmra.mxu2 %vm283_vm1, %v1180_v45  ;;  %v4627_v45 = vld [vmem:[%s4314_s30 + $0xaf] sm:$0xff] }
  0xe2   : > { %4021 = vmatmul.msk.f32.gmra.mxu0 %vm283_vm1, %v1532_v24  ;;  %3981 = vmatmul.msk.f32.gmra.mxu3 %vm283_vm1, %v4615_v29 }
  0xe4   : > { %v4618_v31 = vpop.f32.mrf.mxu2 }
  0xe5   : > { %v1359_v43 = vpop.f32.mrf.mxu3 }
  0xe6   : > { %v694_v34 = vpop.f32.mrf.mxu1 }
  0xe7   : > { %v1703_v38 = vpop.f32.mrf.mxu0  ;;  %v695_v48 = vadd.f32 %v694_v34, %v4460_v8  ;;  %v4640_v8 = vld [vmem:[%s4314_s30 + $0xb7] sm:$0xff] }
  0xe9   : > { %3893 = vmatmul.msk.f32.gmra.mxu1 %vm283_vm1, %v214_v36  ;;  %3936 = vmatmul.msk.f32.gmra.mxu2 %vm283_vm1, %v1181_v52 }
  0xea   : > { %4022 = vmatmul.msk.f32.gmra.mxu0 %vm283_vm1, %v1533_v41  ;;  %3982 = vmatmul.msk.f32.gmra.mxu3 %vm283_vm1, %v4627_v45 }
  0xec   : > { %v1003_v50 = vpop.f32.mrf.mxu2 }
  0xed   : > { %v1126_v55 = vadd.f32 %v1003_v50, %v695_v48  ;;  %v1362_v52 = vpop.f32.mrf.mxu3  ;;  %v1535_v50 = vld [vmem:[%s4314_s30 + $0xa8] sm:$0xff] }
  0xee   : > { %v697_v57 = vpop.f32.mrf.mxu1 }
  0xef   : > { %v1476_v0 = vadd.f32 %v1353_v10, %v1126_v55  ;;  %v1706_v5 = vpop.f32.mrf.mxu0  ;;  %v698_v24 = vadd.f32 %v697_v57, %v4473_v14  ;;  %v4653_v14 = vld [vmem:[%s4314_s30 + $0xbf] sm:$0xff] }
  0xf1   : > { %v4635_v20 = vadd.f32 %v1703_v38, %v1476_v0  ;;  %3894 = vmatmul.msk.f32.gmra.mxu1 %vm283_vm1, %v215_v62  ;;  %3937 = vmatmul.msk.f32.gmra.mxu2 %vm283_vm1, %v1182_v59  ;;  %v216_v38 = vld [vmem:[%s4314_s30 + $0x95] sm:$0xff] }
  0xf2   : > { %4023 = vmatmul.msk.f32.gmra.mxu0 %vm283_vm1, %v1534_v9  ;;  %3983 = vmatmul.msk.f32.gmra.mxu3 %vm283_vm1, %v4640_v8 }
  0xf4   : > { %v1006_v34 = vpop.f32.mrf.mxu2 }
  0xf5   : > { %v1127_v10 = vadd.f32 %v1006_v34, %v698_v24  ;;  %v1365_v59 = vpop.f32.mrf.mxu3  ;;  %v1536_v34 = vld [vmem:[%s4314_s30 + $0xb0] sm:$0xff] }
  0xf6   : > { %v700_v36 = vpop.f32.mrf.mxu1 }
  0xf7   : > { %v1477_v41 = vadd.f32 %v1356_v27, %v1127_v10  ;;  %v1709_v48 = vpop.f32.mrf.mxu0  ;;  %v701_v57 = vadd.f32 %v700_v36, %v4488_v21  ;;  %v4667_v21 = vld [vmem:[%s4314_s30 + $0xc7] sm:$0xff] }
  0xf9   : > { %v4648_v55 = vadd.f32 %v1706_v5, %v1477_v41  ;;  %3895 = vmatmul.msk.f32.gmra.mxu1 %vm283_vm1, %v216_v38  ;;  %3938 = vmatmul.msk.f32.gmra.mxu2 %vm283_vm1, %v1183_v2  ;;  %v217_v5 = vld [vmem:[%s4314_s30 + $0x9d] sm:$0xff] }
  0xfa   : > { %4024 = vmatmul.msk.f32.gmra.mxu0 %vm283_vm1, %v1535_v50  ;;  %3984 = vmatmul.msk.f32.gmra.mxu3 %vm283_vm1, %v4653_v14 }
  0xfc   : > { %v1009_v62 = vpop.f32.mrf.mxu2 }
  0xfd   : > { %v1128_v27 = vadd.f32 %v1009_v62, %v701_v57  ;;  %v1368_v2 = vpop.f32.mrf.mxu3  ;;  %v1537_v62 = vld [vmem:[%s4314_s30 + $0xb8] sm:$0xff] }
  0xfe   : > { %v703_v0 = vpop.f32.mrf.mxu1 }
  0xff   : > { %v1478_v9 = vadd.f32 %v1359_v43, %v1128_v27  ;;  %v1712_v24 = vpop.f32.mrf.mxu0  ;;  %v704_v36 = vadd.f32 %v703_v0, %v4503_v28  ;;  %v4681_v28 = vld [vmem:[%s4314_s30 + $0xcf] sm:$0xff] }
 0x101   : > { %v4661_v10 = vadd.f32 %v1709_v48, %v1478_v9  ;;  %3896 = vmatmul.msk.f32.gmra.mxu1 %vm283_vm1, %v217_v5  ;;  %3939 = vmatmul.msk.f32.gmra.mxu2 %vm283_vm1, %v4599_v13  ;;  %v218_v48 = vld [vmem:[%s4314_s30 + $0xa5] sm:$0xff] }
 0x102   : > { %4025 = vmatmul.msk.f32.gmra.mxu0 %vm283_vm1, %v1536_v34  ;;  %3985 = vmatmul.msk.f32.gmra.mxu3 %vm283_vm1, %v4667_v21 }
 0x104   : > { %v1012_v38 = vpop.f32.mrf.mxu2 }
 0x105   : > { %v1129_v43 = vadd.f32 %v1012_v38, %v704_v36  ;;  %v1371_v13 = vpop.f32.mrf.mxu3  ;;  %v1538_v38 = vld [vmem:[%s4314_s30 + $0xc0] sm:$0xff] }
 0x106   : > { %v706_v41 = vpop.f32.mrf.mxu1 }
 0x107   : > { %v1479_v50 = vadd.f32 %v1362_v52, %v1129_v43  ;;  %v1715_v57 = vpop.f32.mrf.mxu0  ;;  %v707_v0 = vadd.f32 %v706_v41, %v4518_v35  ;;  %v4695_v35 = vld [vmem:[%s4314_s30 + $0xd7] sm:$0xff] }
 0x109   : > { %v4675_v27 = vadd.f32 %v1712_v24, %v1479_v50  ;;  %3897 = vmatmul.msk.f32.gmra.mxu1 %vm283_vm1, %v218_v48  ;;  %3940 = vmatmul.msk.f32.gmra.mxu2 %vm283_vm1, %v4615_v29  ;;  %v219_v24 = vld [vmem:[%s4314_s30 + $0xad] sm:$0xff] }
 0x10a   : > { %4026 = vmatmul.msk.f32.gmra.mxu0 %vm283_vm1, %v1537_v62  ;;  %3986 = vmatmul.msk.f32.gmra.mxu3 %vm283_vm1, %v4681_v28 }
 0x10c   : > { %v1015_v5 = vpop.f32.mrf.mxu2 }
 0x10d   : > { %v1130_v52 = vadd.f32 %v1015_v5, %v707_v0  ;;  %v1374_v29 = vpop.f32.mrf.mxu3  ;;  %v1539_v5 = vld [vmem:[%s4314_s30 + $0xc8] sm:$0xff] }
 0x10e   : > { %v709_v9 = vpop.f32.mrf.mxu1 }
 0x10f   : > { %v1480_v34 = vadd.f32 %v1365_v59, %v1130_v52  ;;  %v1718_v36 = vpop.f32.mrf.mxu0  ;;  %v710_v41 = vadd.f32 %v709_v9, %v4533_v42  ;;  %v4709_v42 = vld [vmem:[%s4314_s30 + $0xdf] sm:$0xff] }
 0x111   : > { %v4689_v43 = vadd.f32 %v1715_v57, %v1480_v34  ;;  %3898 = vmatmul.msk.f32.gmra.mxu1 %vm283_vm1, %v219_v24  ;;  %3941 = vmatmul.msk.f32.gmra.mxu2 %vm283_vm1, %v4627_v45  ;;  %v220_v57 = vld [vmem:[%s4314_s30 + $0xb5] sm:$0xff] }
 0x112   : > { %4027 = vmatmul.msk.f32.gmra.mxu0 %vm283_vm1, %v1538_v38  ;;  %3987 = vmatmul.msk.f32.gmra.mxu3 %vm283_vm1, %v4695_v35 }
 0x114   : > { %v1018_v48 = vpop.f32.mrf.mxu2 }
 0x115   : > { %v1131_v59 = vadd.f32 %v1018_v48, %v710_v41  ;;  %v1377_v45 = vpop.f32.mrf.mxu3  ;;  %v1540_v48 = vld [vmem:[%s4314_s30 + $0xd0] sm:$0xff] }
 0x116   : > { %v712_v50 = vpop.f32.mrf.mxu1 }
 0x117   : > { %v1481_v62 = vadd.f32 %v1368_v2, %v1131_v59  ;;  %v1721_v0 = vpop.f32.mrf.mxu0  ;;  %v713_v9 = vadd.f32 %v712_v50, %v4548_v49  ;;  %v4723_v49 = vld [vmem:[%s4314_s30 + $0xe7] sm:$0xff] }
 0x119   : > { %v4703_v52 = vadd.f32 %v1718_v36, %v1481_v62  ;;  %3899 = vmatmul.msk.f32.gmra.mxu1 %vm283_vm1, %v220_v57  ;;  %3942 = vmatmul.msk.f32.gmra.mxu2 %vm283_vm1, %v4640_v8  ;;  %v221_v36 = vld [vmem:[%s4314_s30 + $0xbd] sm:$0xff] }
 0x11a   : > { %4028 = vmatmul.msk.f32.gmra.mxu0 %vm283_vm1, %v1539_v5  ;;  %3988 = vmatmul.msk.f32.gmra.mxu3 %vm283_vm1, %v4709_v42 }
 0x11c   : > { %v1021_v24 = vpop.f32.mrf.mxu2 }
 0x11d   : > { %v1132_v2 = vadd.f32 %v1021_v24, %v713_v9  ;;  %v1380_v8 = vpop.f32.mrf.mxu3  ;;  %v1541_v24 = vld [vmem:[%s4314_s30 + $0xd8] sm:$0xff] }
 0x11e   : > { %v715_v34 = vpop.f32.mrf.mxu1 }
 0x11f   : > { %v1482_v38 = vadd.f32 %v1371_v13, %v1132_v2  ;;  %v1724_v41 = vpop.f32.mrf.mxu0  ;;  %v716_v50 = vadd.f32 %v715_v34, %v4563_v56  ;;  %v4737_v56 = vld [vmem:[%s4314_s30 + $0xef] sm:$0xff] }
 0x121   : > { %v4717_v59 = vadd.f32 %v1721_v0, %v1482_v38  ;;  %3900 = vmatmul.msk.f32.gmra.mxu1 %vm283_vm1, %v221_v36  ;;  %3943 = vmatmul.msk.f32.gmra.mxu2 %vm283_vm1, %v4653_v14  ;;  %v222_v0 = vld [vmem:[%s4314_s30 + $0xc5] sm:$0xff] }
 0x122   : > { %4029 = vmatmul.msk.f32.gmra.mxu0 %vm283_vm1, %v1540_v48  ;;  %3989 = vmatmul.msk.f32.gmra.mxu3 %vm283_vm1, %v4723_v49 }
 0x124   : > { %v1024_v57 = vpop.f32.mrf.mxu2 }
 0x125   : > { %v1133_v13 = vadd.f32 %v1024_v57, %v716_v50  ;;  %v1383_v14 = vpop.f32.mrf.mxu3  ;;  %v1542_v57 = vld [vmem:[%s4314_s30 + $0xe0] sm:$0xff] }
 0x126   : > { %v718_v62 = vpop.f32.mrf.mxu1 }
 0x127   : > { %v1483_v5 = vadd.f32 %v1374_v29, %v1133_v13  ;;  %v1727_v9 = vpop.f32.mrf.mxu0  ;;  %v719_v34 = vadd.f32 %v718_v62, %v4578_v63  ;;  %v4751_v63 = vld [vmem:[%s4314_s30 + $0xf7] sm:$0xff] }
 0x129   : > { %v4731_v2 = vadd.f32 %v1724_v41, %v1483_v5  ;;  %3901 = vmatmul.msk.f32.gmra.mxu1 %vm283_vm1, %v222_v0  ;;  %3944 = vmatmul.msk.f32.gmra.mxu2 %vm283_vm1, %v4667_v21  ;;  %v223_v41 = vld [vmem:[%s4314_s30 + $0xcd] sm:$0xff] }
 0x12a   : > { %4030 = vmatmul.msk.f32.gmra.mxu0 %vm283_vm1, %v1541_v24  ;;  %3990 = vmatmul.msk.f32.gmra.mxu3 %vm283_vm1, %v4737_v56 }
 0x12c   : > { %v1027_v36 = vpop.f32.mrf.mxu2 }
 0x12d   : > { %v1134_v29 = vadd.f32 %v1027_v36, %v719_v34  ;;  %v1386_v21 = vpop.f32.mrf.mxu3  ;;  %v1543_v36 = vld [vmem:[%s4314_s30 + $0xe8] sm:$0xff] }
 0x12e   : > { %v721_v38 = vpop.f32.mrf.mxu1 }
 0x12f   : > { %v1484_v48 = vadd.f32 %v1377_v45, %v1134_v29  ;;  %v1730_v50 = vpop.f32.mrf.mxu0  ;;  %v722_v62 = vadd.f32 %v721_v38, %v4593_v7  ;;  %v4765_v7 = vld [vmem:[%s4314_s30 + $0xff] sm:$0xff] }
 0x131   : > { %v4745_v13 = vadd.f32 %v1727_v9, %v1484_v48  ;;  %3902 = vmatmul.msk.f32.gmra.mxu1 %vm283_vm1, %v223_v41  ;;  %3945 = vmatmul.msk.f32.gmra.mxu2 %vm283_vm1, %v4681_v28  ;;  %v224_v9 = vld [vmem:[%s4314_s30 + $0xd5] sm:$0xff] }
 0x132   : > { %4031 = vmatmul.msk.f32.gmra.mxu0 %vm283_vm1, %v1542_v57  ;;  %3991 = vmatmul.msk.f32.gmra.mxu3 %vm283_vm1, %v4751_v63 }
 0x134   : > { %v1030_v0 = vpop.f32.mrf.mxu2 }
 0x135   : > { %v1135_v45 = vadd.f32 %v1030_v0, %v722_v62  ;;  %v1389_v28 = vpop.f32.mrf.mxu3  ;;  %v1544_v0 = vld [vmem:[%s4314_s30 + $0xf0] sm:$0xff] }
 0x136   : > { %v724_v5 = vpop.f32.mrf.mxu1 }
 0x137   : > { %v1485_v24 = vadd.f32 %v1380_v8, %v1135_v45  ;;  %v1733_v34 = vpop.f32.mrf.mxu0  ;;  %v725_v38 = vadd.f32 %v724_v5, %v4609_v22  ;;  %v4779_v22 = vld [vmem:[%s4314_s30 + $0x107] sm:$0xff] }
 0x139   : > { %v4759_v29 = vadd.f32 %v1730_v50, %v1485_v24  ;;  %3903 = vmatmul.msk.f32.gmra.mxu1 %vm283_vm1, %v224_v9  ;;  %3946 = vmatmul.msk.f32.gmra.mxu2 %vm283_vm1, %v4695_v35  ;;  %v225_v50 = vld [vmem:[%s4314_s30 + $0xdd] sm:$0xff] }
 0x13a   : > { %4032 = vmatmul.msk.f32.gmra.mxu0 %vm283_vm1, %v1543_v36  ;;  %3992 = vmatmul.msk.f32.gmra.mxu3 %vm283_vm1, %v4765_v7 }
 0x13c   : > { %v1033_v41 = vpop.f32.mrf.mxu2 }
 0x13d   : > { %v1136_v8 = vadd.f32 %v1033_v41, %v725_v38  ;;  %v1392_v35 = vpop.f32.mrf.mxu3  ;;  %v1545_v41 = vld [vmem:[%s4314_s30 + $0xf8] sm:$0xff] }
 0x13e   : > { %v727_v48 = vpop.f32.mrf.mxu1 }
 0x13f   : > { %v1486_v57 = vadd.f32 %v1383_v14, %v1136_v8  ;;  %v1736_v62 = vpop.f32.mrf.mxu0  ;;  %v728_v5 = vadd.f32 %v727_v48, %v4457_v6  ;;  %v4793_v6 = vld [vmem:[%s4314_s30 + $0x10f] sm:$0xff] }
 0x141   : > { %v4773_v45 = vadd.f32 %v1733_v34, %v1486_v57  ;;  %3904 = vmatmul.msk.f32.gmra.mxu1 %vm283_vm1, %v225_v50  ;;  %3947 = vmatmul.msk.f32.gmra.mxu2 %vm283_vm1, %v4709_v42  ;;  %v226_v34 = vld [vmem:[%s4314_s30 + $0xe5] sm:$0xff] }
 0x142   : > { %4033 = vmatmul.msk.f32.gmra.mxu0 %vm283_vm1, %v1544_v0  ;;  %3993 = vmatmul.msk.f32.gmra.mxu3 %vm283_vm1, %v4779_v22 }
 0x144   : > { %v1036_v9 = vpop.f32.mrf.mxu2 }
 0x145   : > { %v1137_v14 = vadd.f32 %v1036_v9, %v728_v5  ;;  %v1395_v42 = vpop.f32.mrf.mxu3  ;;  %v1546_v9 = vld [vmem:[%s4314_s30 + $0x100] sm:$0xff] }
 0x146   : > { %v730_v24 = vpop.f32.mrf.mxu1 }
 0x147   : > { %v1487_v36 = vadd.f32 %v1386_v21, %v1137_v14  ;;  %v1739_v38 = vpop.f32.mrf.mxu0  ;;  %v731_v48 = vadd.f32 %v730_v24, %v4470_v12  ;;  %v4807_v12 = vld [vmem:[%s4314_s30 + $0x117] sm:$0xff] }
 0x149   : > { %v4787_v8 = vadd.f32 %v1736_v62, %v1487_v36  ;;  %3905 = vmatmul.msk.f32.gmra.mxu1 %vm283_vm1, %v226_v34  ;;  %3948 = vmatmul.msk.f32.gmra.mxu2 %vm283_vm1, %v4723_v49  ;;  %v227_v62 = vld [vmem:[%s4314_s30 + $0xed] sm:$0xff] }
 0x14a   : > { %4034 = vmatmul.msk.f32.gmra.mxu0 %vm283_vm1, %v1545_v41  ;;  %3994 = vmatmul.msk.f32.gmra.mxu3 %vm283_vm1, %v4793_v6 }
 0x14c   : > { %v1039_v50 = vpop.f32.mrf.mxu2 }
 0x14d   : > { %v1138_v21 = vadd.f32 %v1039_v50, %v731_v48  ;;  %v1398_v49 = vpop.f32.mrf.mxu3  ;;  %v1547_v50 = vld [vmem:[%s4314_s30 + $0x108] sm:$0xff] }
 0x14e   : > { %v733_v57 = vpop.f32.mrf.mxu1 }
 0x14f   : > { %v1488_v0 = vadd.f32 %v1389_v28, %v1138_v21  ;;  %v1742_v5 = vpop.f32.mrf.mxu0  ;;  %v734_v24 = vadd.f32 %v733_v57, %v4485_v19  ;;  %v4821_v19 = vld [vmem:[%s4314_s30 + $0x11f] sm:$0xff] }
 0x151   : > { %v4801_v14 = vadd.f32 %v1739_v38, %v1488_v0  ;;  %3906 = vmatmul.msk.f32.gmra.mxu1 %vm283_vm1, %v227_v62  ;;  %3949 = vmatmul.msk.f32.gmra.mxu2 %vm283_vm1, %v4737_v56  ;;  %v228_v38 = vld [vmem:[%s4314_s30 + $0xf5] sm:$0xff] }
 0x152   : > { %4035 = vmatmul.msk.f32.gmra.mxu0 %vm283_vm1, %v1546_v9  ;;  %3995 = vmatmul.msk.f32.gmra.mxu3 %vm283_vm1, %v4807_v12 }
 0x154   : > { %v1042_v34 = vpop.f32.mrf.mxu2 }
 0x155   : > { %v1139_v28 = vadd.f32 %v1042_v34, %v734_v24  ;;  %v1401_v56 = vpop.f32.mrf.mxu3  ;;  %v1548_v34 = vld [vmem:[%s4314_s30 + $0x110] sm:$0xff] }
 0x156   : > { %v736_v36 = vpop.f32.mrf.mxu1 }
 0x157   : > { %v1489_v41 = vadd.f32 %v1392_v35, %v1139_v28  ;;  %v1745_v48 = vpop.f32.mrf.mxu0  ;;  %v737_v57 = vadd.f32 %v736_v36, %v4500_v26  ;;  %v4835_v26 = vld [vmem:[%s4314_s30 + $0x127] sm:$0xff] }
 0x159   : > { %v4815_v21 = vadd.f32 %v1742_v5, %v1489_v41  ;;  %3907 = vmatmul.msk.f32.gmra.mxu1 %vm283_vm1, %v228_v38  ;;  %3950 = vmatmul.msk.f32.gmra.mxu2 %vm283_vm1, %v4751_v63  ;;  %v229_v5 = vld [vmem:[%s4314_s30 + $0xfd] sm:$0xff] }
 0x15a   : > { %4036 = vmatmul.msk.f32.gmra.mxu0 %vm283_vm1, %v1547_v50  ;;  %3996 = vmatmul.msk.f32.gmra.mxu3 %vm283_vm1, %v4821_v19 }
 0x15c   : > { %v1045_v62 = vpop.f32.mrf.mxu2 }
 0x15d   : > { %v1140_v35 = vadd.f32 %v1045_v62, %v737_v57  ;;  %v1404_v63 = vpop.f32.mrf.mxu3  ;;  %v1549_v62 = vld [vmem:[%s4314_s30 + $0x118] sm:$0xff] }
 0x15e   : > { %v739_v0 = vpop.f32.mrf.mxu1 }
 0x15f   : > { %v1490_v9 = vadd.f32 %v1395_v42, %v1140_v35  ;;  %v1748_v24 = vpop.f32.mrf.mxu0  ;;  %v740_v36 = vadd.f32 %v739_v0, %v4515_v33  ;;  %v4849_v33 = vld [vmem:[%s4314_s30 + $0x12f] sm:$0xff] }
 0x161   : > { %v4829_v28 = vadd.f32 %v1745_v48, %v1490_v9  ;;  %3908 = vmatmul.msk.f32.gmra.mxu1 %vm283_vm1, %v229_v5  ;;  %3951 = vmatmul.msk.f32.gmra.mxu2 %vm283_vm1, %v4765_v7  ;;  %v230_v48 = vld [vmem:[%s4314_s30 + $0x105] sm:$0xff] }
 0x162   : > { %4037 = vmatmul.msk.f32.gmra.mxu0 %vm283_vm1, %v1548_v34  ;;  %3997 = vmatmul.msk.f32.gmra.mxu3 %vm283_vm1, %v4835_v26 }
 0x164   : > { %v1048_v38 = vpop.f32.mrf.mxu2 }
 0x165   : > { %v1141_v42 = vadd.f32 %v1048_v38, %v740_v36  ;;  %v1407_v7 = vpop.f32.mrf.mxu3  ;;  %v1550_v38 = vld [vmem:[%s4314_s30 + $0x120] sm:$0xff] }
 0x166   : > { %v742_v41 = vpop.f32.mrf.mxu1 }
 0x167   : > { %v1491_v50 = vadd.f32 %v1398_v49, %v1141_v42  ;;  %v1751_v57 = vpop.f32.mrf.mxu0  ;;  %v743_v0 = vadd.f32 %v742_v41, %v4530_v40  ;;  %v4863_v40 = vld [vmem:[%s4314_s30 + $0x137] sm:$0xff] }
 0x169   : > { %v4843_v35 = vadd.f32 %v1748_v24, %v1491_v50  ;;  %3909 = vmatmul.msk.f32.gmra.mxu1 %vm283_vm1, %v230_v48  ;;  %3952 = vmatmul.msk.f32.gmra.mxu2 %vm283_vm1, %v4779_v22  ;;  %v231_v24 = vld [vmem:[%s4314_s30 + $0x10d] sm:$0xff] }
 0x16a   : > { %4038 = vmatmul.msk.f32.gmra.mxu0 %vm283_vm1, %v1549_v62  ;;  %3998 = vmatmul.msk.f32.gmra.mxu3 %vm283_vm1, %v4849_v33 }
 0x16c   : > { %v1051_v5 = vpop.f32.mrf.mxu2 }
 0x16d   : > { %v1142_v49 = vadd.f32 %v1051_v5, %v743_v0  ;;  %v1410_v22 = vpop.f32.mrf.mxu3  ;;  %v1551_v5 = vld [vmem:[%s4314_s30 + $0x128] sm:$0xff] }
 0x16e   : > { %v745_v9 = vpop.f32.mrf.mxu1 }
 0x16f   : > { %v1492_v34 = vadd.f32 %v1401_v56, %v1142_v49  ;;  %v1754_v36 = vpop.f32.mrf.mxu0  ;;  %v746_v41 = vadd.f32 %v745_v9, %v4545_v47  ;;  %v4877_v47 = vld [vmem:[%s4314_s30 + $0x13f] sm:$0xff] }
 0x171   : > { %v4857_v42 = vadd.f32 %v1751_v57, %v1492_v34  ;;  %3910 = vmatmul.msk.f32.gmra.mxu1 %vm283_vm1, %v231_v24  ;;  %3953 = vmatmul.msk.f32.gmra.mxu2 %vm283_vm1, %v4793_v6  ;;  %v232_v57 = vld [vmem:[%s4314_s30 + $0x115] sm:$0xff] }
 0x172   : > { %4039 = vmatmul.msk.f32.gmra.mxu0 %vm283_vm1, %v1550_v38  ;;  %3999 = vmatmul.msk.f32.gmra.mxu3 %vm283_vm1, %v4863_v40 }
 0x174   : > { %v1054_v48 = vpop.f32.mrf.mxu2 }
 0x175   : > { %v1143_v56 = vadd.f32 %v1054_v48, %v746_v41  ;;  %v1413_v6 = vpop.f32.mrf.mxu3  ;;  %v1552_v48 = vld [vmem:[%s4314_s30 + $0x130] sm:$0xff] }
 0x176   : > { %v748_v50 = vpop.f32.mrf.mxu1 }
 0x177   : > { %v1493_v62 = vadd.f32 %v1404_v63, %v1143_v56  ;;  %v1757_v0 = vpop.f32.mrf.mxu0  ;;  %v749_v9 = vadd.f32 %v748_v50, %v4560_v54  ;;  %v1205_v54 = vld [vmem:[%s4314_s30 + $0x147] sm:$0xff] }
 0x179   : > { %v4871_v49 = vadd.f32 %v1754_v36, %v1493_v62  ;;  %3911 = vmatmul.msk.f32.gmra.mxu1 %vm283_vm1, %v232_v57  ;;  %3954 = vmatmul.msk.f32.gmra.mxu2 %vm283_vm1, %v4807_v12  ;;  %v233_v36 = vld [vmem:[%s4314_s30 + $0x11d] sm:$0xff] }
 0x17a   : > { %4040 = vmatmul.msk.f32.gmra.mxu0 %vm283_vm1, %v1551_v5  ;;  %4000 = vmatmul.msk.f32.gmra.mxu3 %vm283_vm1, %v4877_v47  ;;  %v234_v5 = vld [vmem:[%s4314_s30 + $0x125] sm:$0xff] }
 0x17c   : > { %v1057_v24 = vpop.f32.mrf.mxu2 }
 0x17d   : > { %v1144_v63 = vadd.f32 %v1057_v24, %v749_v9  ;;  %v1416_v12 = vpop.f32.mrf.mxu3  ;;  %v1553_v24 = vld [vmem:[%s4314_s30 + $0x138] sm:$0xff] }
 0x17e   : > { %v751_v34 = vpop.f32.mrf.mxu1 }
 0x17f   : > { %v1494_v38 = vadd.f32 %v1407_v7, %v1144_v63  ;;  %v1760_v41 = vpop.f32.mrf.mxu0  ;;  %v752_v50 = vadd.f32 %v751_v34, %v4575_v61  ;;  %v1206_v61 = vld [vmem:[%s4314_s30 + $0x14f] sm:$0xff] }
 0x181   : > { %v4885_v56 = vadd.f32 %v1757_v0, %v1494_v38  ;;  %3912 = vmatmul.msk.f32.gmra.mxu1 %vm283_vm1, %v233_v36  ;;  %3955 = vmatmul.msk.f32.gmra.mxu2 %vm283_vm1, %v4821_v19 }
 0x182   : > { %4041 = vmatmul.msk.f32.gmra.mxu0 %vm283_vm1, %v1552_v48  ;;  %4001 = vmatmul.msk.f32.gmra.mxu3 %vm283_vm1, %v1205_v54  ;;  %v235_v48 = vld [vmem:[%s4314_s30 + $0x12d] sm:$0xff] }
 0x184   : > { %v1060_v57 = vpop.f32.mrf.mxu2 }
 0x185   : > { %v1145_v7 = vadd.f32 %v1060_v57, %v752_v50  ;;  %v1419_v63 = vpop.f32.mrf.mxu3  ;;  %v1554_v50 = vld [vmem:[%s4314_s30 + $0x140] sm:$0xff] }
 0x186   : > { %v754_v62 = vpop.f32.mrf.mxu1 }
 0x187   : > { %v1495_v0 = vadd.f32 %v1410_v22, %v1145_v7  ;;  %v1763_v9 = vpop.f32.mrf.mxu0  ;;  %v755_v19 = vadd.f32 %v754_v62, %v4590_v4  ;;  %v1207_v4 = vld [vmem:[%s4314_s30 + $0x157] sm:$0xf] }
 0x189   : > { %v4896_v36 = vadd.f32 %v1760_v41, %v1495_v0  ;;  %3913 = vmatmul.msk.f32.gmra.mxu1 %vm283_vm1, %v234_v5  ;;  %3956 = vmatmul.msk.f32.gmra.mxu2 %vm283_vm1, %v4835_v26  ;;  %v236_v0 = vld [vmem:[%s4314_s30 + $0x135] sm:$0xff] }
 0x18a   : > { %4042 = vmatmul.msk.f32.gmra.mxu0 %vm283_vm1, %v1553_v24  ;;  %4002 = vmatmul.msk.f32.gmra.mxu3 %vm283_vm1, %v1206_v61  ;;  %v1555_v61 = vld [vmem:[%s4314_s30 + $0x148] sm:$0xff] }
 0x18c   : > { %v1063_v34 = vpop.f32.mrf.mxu2 }
 0x18d   : > { %v1146_v22 = vadd.f32 %v1063_v34, %v755_v19  ;;  %v1422_v57 = vpop.f32.mrf.mxu3 }
 0x18e   : > { %v757_v38 = vpop.f32.mrf.mxu1 }
 0x18f   : > { %v1496_v41 = vadd.f32 %v1413_v6, %v1146_v22  ;;  %v1766_v54 = vpop.f32.mrf.mxu0  ;;  %v758_v26 = vadd.f32 %v757_v38, %v4606_v17  ;;  %v2567_v17 = vld [vmem:[%s4314_s30 + $0x2a] sm:$0xff] }
 0x191   : > { %v4907_v7 = vadd.f32 %v1763_v9, %v1496_v41  ;;  %3914 = vmatmul.msk.f32.gmra.mxu1 %vm283_vm1, %v235_v48  ;;  %3957 = vmatmul.msk.f32.gmra.mxu2 %vm283_vm1, %v4849_v33  ;;  %v237_v48 = vld [vmem:[%s4314_s30 + $0x13d] sm:$0xff] }
 0x192   : > { %4043 = vmatmul.msk.f32.gmra.mxu0 %vm283_vm1, %v1554_v50  ;;  %4003 = vmatmul.msk.f32.gmra.mxu3 %vm283_vm1, %v1207_v4  ;;  %v1556_v50 = vld [vmem:[%s4314_s30 + $0x150] sm:$0xff] }
 0x194   : > { %v1066_v62 = vpop.f32.mrf.mxu2 }
 0x195   : > { %v1147_v6 = vadd.f32 %v1066_v62, %v758_v26  ;;  %v1425_v19 = vpop.f32.mrf.mxu3 }
 0x196   : > { %v760_v5 = vpop.f32.mrf.mxu1 }
 0x197   : > { %v1497_v9 = vadd.f32 %v1416_v12, %v1147_v6  ;;  %v1769_v24 = vpop.f32.mrf.mxu0  ;;  %v761_v33 = vadd.f32 %v760_v5, %v4467_v11  ;;  %v2568_v11 = vld [vmem:[%s4314_s30 + $0x32] sm:$0xff]  ;;  %v238_v5 = vld [vmem:[%s4314_s30 + $0x145] sm:$0xf] }
 0x199   : > { %v4918_v34 = vadd.f32 %v1766_v54, %v1497_v9  ;;  %3915 = vmatmul.msk.f32.gmra.mxu1 %vm283_vm1, %v236_v0  ;;  %3958 = vmatmul.msk.f32.gmra.mxu2 %vm283_vm1, %v4863_v40  ;;  %v857_v0 = vld [vmem:[%s4314_s30 + $0x147] sm:$0xf] }
 0x19a   : > { %4044 = vmatmul.msk.f32.gmra.mxu0 %vm283_vm1, %v1555_v61  ;;  %4135 = vmatmul.msk.f32.vlgmr.msra.gmra.mxu3 %vm283_vm1, %v2567_v17  ;;  %v1557_v61 = vld [vmem:[%s4314_s30 + $0x158] sm:$0xf] }
 0x19c   : > { %v1069_v22 = vpop.f32.mrf.mxu2 }
 0x19d   : > { %v1148_v12 = vadd.f32 %v1069_v22, %v761_v33  ;;  %v1428_v4 = vpop.f32.mrf.mxu3 }
 0x19e   : > { %v763_v38 = vpop.f32.mrf.mxu1 }
 0x19f   : > { %v1498_v41 = vadd.f32 %v1419_v63, %v1148_v12  ;;  %v1772_v54 = vpop.f32.mrf.mxu0  ;;  %v764_v26 = vadd.f32 %v763_v38, %v4482_v18  ;;  %v2569_v18 = vld [vmem:[%s4314_s30 + $0x3a] sm:$0xff]  ;;  %v4248_v12 = vmov 0  }
 0x1a0   : > { %4235 = vset.pattern.permute.xlu0 %v4248_v12  ;;  %v3394_v38 = vld [vmem:[%s5805_s3] sm:$0xff]  ;;  %4236 = vset.pattern.permute.xlu1 %v4248_v12 }
 0x1a1   : > { %v4929_v40 = vadd.f32 %v1769_v24, %v1498_v41  ;;  %3916 = vmatmul.msk.f32.gmra.mxu1 %vm283_vm1, %v237_v48  ;;  %3959 = vmatmul.msk.f32.gmra.mxu2 %vm283_vm1, %v4877_v47  ;;  %v1867_v41 = vld [vmem:[%s4314_s30 + $0x19] sm:$0xff] }
 0x1a2   : > { %4045 = vmatmul.msk.f32.gmra.mxu0 %vm283_vm1, %v1556_v50  ;;  %4136 = vmatmul.msk.f32.gmra.mxu3 %vm283_vm1, %v2568_v11  ;;  %v2917_v11 = vld [vmem:[%s4314_s30 + $0x2b] sm:$0xff] }
 0x1a3   : > { %3437 = vperm.xlu0 %4235, %v3394_v38   ;;  %4237 = vset.pattern.permute.xlu2 %v4248_v12  ;;  %v2571_v12 = vld [vmem:[%s4314_s30 + $0x4a] sm:$0xff] }
 0x1a4   : > { %v1072_v62 = vpop.f32.mrf.mxu2 }
 0x1a5   : > { %v1149_v63 = vadd.f32 %v1072_v62, %v764_v26  ;;  %v1431_v17 = vpop.f32.mrf.mxu3 }
 0x1a6   : > { %v766_v6 = vpop.f32.mrf.mxu1 }
 0x1a7   : > { %v1499_v9 = vadd.f32 %v1422_v57, %v1149_v63  ;;  %v1775_v24 = vpop.f32.mrf.mxu0  ;;  %v767_v33 = vadd.f32 %v766_v6, %v4497_v25  ;;  %v2570_v63 = vld [vmem:[%s4314_s30 + $0x42] sm:$0xff] }
 0x1a9   : > { %v4941_v47 = vadd.f32 %v1772_v54, %v1499_v9  ;;  %3917 = vmatmul.msk.f32.gmra.mxu1 %vm283_vm1, %v238_v5  ;;  %3960 = vmatmul.msk.f32.gmra.mxu2 %vm283_vm1, %v857_v0  ;;  %v2217_v54 = vld [vmem:[%s4314_s30 + $0x29] sm:$0xff] }
 0x1aa   : > { %4046 = vmatmul.msk.f32.gmra.mxu0 %vm283_vm1, %v1557_v61  ;;  %4137 = vmatmul.msk.f32.gmra.mxu3 %vm283_vm1, %v2569_v18  ;;  %v3395_v0 = vld [vmem:[%s5805_s3 + $0x8] sm:$0xff]  ;;  %v2218_v61 = vld [vmem:[%s4314_s30 + $0x31] sm:$0xff] }
 0x1ab   : > { %3442 = vperm.xlu0 %4235, %v3395_v0  }
 0x1ac   : > { %v1075_v22 = vpop.f32.mrf.mxu2 }
 0x1ad   : > { %v1150_v57 = vadd.f32 %v1075_v22, %v767_v33  ;;  %v1434_v26 = vpop.f32.mrf.mxu3  ;;  %v2918_v22 = vld [vmem:[%s4314_s30 + $0x33] sm:$0xff] }
 0x1ae   : > { %v769_v48 = vpop.f32.mrf.mxu1 }
 0x1af   : > { %v1500_v50 = vadd.f32 %v1425_v19, %v1150_v57  ;;  %v1778_v25 = vpop.f32.mrf.mxu0  ;;  %v770_v6 = vadd.f32 %v769_v48, %v4512_v32 }
 0x1b1   : > { %v4955_v62 = vadd.f32 %v1775_v24, %v1500_v50  ;;  %4049 = vmatmul.msk.f32.vlgmr.msra.gmra.mxu1 %vm283_vm1, %v1867_v41  ;;  %4092 = vmatmul.msk.f32.vlgmr.msra.gmra.mxu2 %vm283_vm1, %v2217_v54  ;;  %v1868_v24 = vld [vmem:[%s4314_s30 + $0x21] sm:$0xff]  ;;  %v3396_v41 = vld [vmem:[%s5805_s3 + $0x10] sm:$0xff] }
 0x1b2   : > { %4178 = vmatmul.msk.f32.vlgmr.msra.gmra.mxu0 %vm283_vm1, %v2917_v11  ;;  %4138 = vmatmul.msk.f32.gmra.mxu3 %vm283_vm1, %v2570_v63 }
 0x1b3   : > { %3447 = vperm.xlu1 %4236, %v3396_v41  }
 0x1b4   : > { %v1078_v5 = vpop.f32.mrf.mxu2 }
 0x1b5   : > { %v1151_v19 = vadd.f32 %v1078_v5, %v770_v6  ;;  %v1437_v57 = vpop.f32.mrf.mxu3  ;;  %v2919_v6 = vld [vmem:[%s4314_s30 + $0x3b] sm:$0xff] }
 0x1b6   : > { %v772_v9 = vpop.f32.mrf.mxu1 }
 0x1b7   : > { %v1501_v18 = vadd.f32 %v1428_v4, %v1151_v19  ;;  %v1781_v33 = vpop.f32.mrf.mxu0  ;;  %v773_v38 = vadd.f32 %v772_v9, %v4527_v39  ;;  %v2572_v39 = vld [vmem:[%s4314_s30 + $0x52] sm:$0xff] }
 0x1b9   : > { %v4969_v32 = vadd.f32 %v1778_v25, %v1501_v18  ;;  %4050 = vmatmul.msk.f32.gmra.mxu1 %vm283_vm1, %v1868_v24  ;;  %4093 = vmatmul.msk.f32.gmra.mxu2 %vm283_vm1, %v2218_v61  ;;  %v2219_v25 = vld [vmem:[%s4314_s30 + $0x39] sm:$0xff] }
 0x1ba   : > { %4179 = vmatmul.msk.f32.gmra.mxu0 %vm283_vm1, %v2918_v22  ;;  %4139 = vmatmul.msk.f32.gmra.mxu3 %vm283_vm1, %v2571_v12  ;;  %v3397_v24 = vld [vmem:[%s5805_s3 + $0x18] sm:$0xff]  ;;  %v2920_v12 = vld [vmem:[%s4314_s30 + $0x43] sm:$0xff] }
 0x1bb   : > { %3452 = vperm.xlu1 %4236, %v3397_v24  }
 0x1bc   : > { %v1081_v48 = vpop.f32.mrf.mxu2 }
 0x1bd   : > { %v1152_v4 = vadd.f32 %v1081_v48, %v773_v38  ;;  %v1440_v5 = vpop.f32.mrf.mxu3 }
 0x1be   : > { %v775_v50 = vpop.f32.mrf.mxu1 }
 0x1bf   : > { %v1502_v11 = vadd.f32 %v1431_v17, %v1152_v4  ;;  %v1784_v63 = vpop.f32.mrf.mxu0  ;;  %v776_v0 = vadd.f32 %v775_v50, %v4542_v46  ;;  %v2573_v46 = vld [vmem:[%s4314_s30 + $0x5a] sm:$0xff] }
 0x1c1   : > { %v4982_v19 = vadd.f32 %v1781_v33, %v1502_v11  ;;  %4051 = vmatmul.msk.f32.gmra.mxu1 %vm283_vm1, %v2217_v54  ;;  %4094 = vmatmul.msk.f32.gmra.mxu2 %vm283_vm1, %v2219_v25  ;;  %v2220_v33 = vld [vmem:[%s4314_s30 + $0x41] sm:$0xff]  ;;  %v2221_v11 = vld [vmem:[%s4314_s30 + $0x49] sm:$0xff] }
 0x1c2   : > { %4180 = vmatmul.msk.f32.gmra.mxu0 %vm283_vm1, %v2919_v6  ;;  %4140 = vmatmul.msk.f32.gmra.mxu3 %vm283_vm1, %v2572_v39  ;;  %v2921_v39 = vld [vmem:[%s4314_s30 + $0x4b] sm:$0xff] }
 0x1c4   : > { %v1084_v9 = vpop.f32.mrf.mxu2 }
 0x1c5   : > { %v1153_v17 = vadd.f32 %v1084_v9, %v776_v0  ;;  %v1443_v38 = vpop.f32.mrf.mxu3 }
 0x1c6   : > { %v778_v18 = vpop.f32.mrf.mxu1 }
 0x1c7   : > { %v1503_v54 = vadd.f32 %v1434_v26, %v1153_v17  ;;  %v1787_v22 = vpop.f32.mrf.mxu0  ;;  %v779_v4 = vadd.f32 %v778_v18, %v4557_v53  ;;  %v2574_v53 = vld [vmem:[%s4314_s30 + $0x62] sm:$0xff]  ;;  %v2222_v18 = vld [vmem:[%s4314_s30 + $0x51] sm:$0xff] }
 0x1c9   : > { %v4995_v48 = vadd.f32 %v1784_v63, %v1503_v54  ;;  %4052 = vmatmul.msk.f32.gmra.mxu1 %vm283_vm1, %v2218_v61  ;;  %4095 = vmatmul.msk.f32.gmra.mxu2 %vm283_vm1, %v2220_v33 }
 0x1ca   : > { %4181 = vmatmul.msk.f32.gmra.mxu0 %vm283_vm1, %v2920_v12  ;;  %4141 = vmatmul.msk.f32.gmra.mxu3 %vm283_vm1, %v2573_v46  ;;  %v2922_v12 = vld [vmem:[%s4314_s30 + $0x53] sm:$0xff] }
 0x1cc   : > { %v1087_v41 = vpop.f32.mrf.mxu2 }
 0x1cd   : > { %v1154_v26 = vadd.f32 %v1087_v41, %v779_v4  ;;  %v1446_v61 = vpop.f32.mrf.mxu3  ;;  %v2575_v4 = vld [vmem:[%s4314_s30 + $0x6a] sm:$0xff] }
 0x1ce   : > { %v781_v50 = vpop.f32.mrf.mxu1 }
 0x1cf   : > { %v1504_v6 = vadd.f32 %v1437_v57, %v1154_v26  ;;  %v1790_v63 = vpop.f32.mrf.mxu0  ;;  %v782_v9 = vadd.f32 %v781_v50, %v4572_v60  ;;  %v3400_v26 = vld [vmem:[%s5805_s3 + $0x30] sm:$0xff] }
 0x1d0   : > { %3467 = vperm.xlu0 %4235, %v3400_v26  }
 0x1d1   : > { %v5005_v0 = vadd.f32 %v1787_v22, %v1504_v6  ;;  %4053 = vmatmul.msk.f32.gmra.mxu1 %vm283_vm1, %v2219_v25  ;;  %4096 = vmatmul.msk.f32.gmra.mxu2 %vm283_vm1, %v2221_v11  ;;  %v2223_v6 = vld [vmem:[%s4314_s30 + $0x59] sm:$0xff] }
 0x1d2   : > { %4182 = vmatmul.msk.f32.gmra.mxu0 %vm283_vm1, %v2921_v39  ;;  %4142 = vmatmul.msk.f32.gmra.mxu3 %vm283_vm1, %v2574_v53  ;;  %v2923_v39 = vld [vmem:[%s4314_s30 + $0x5b] sm:$0xff] }
 0x1d4   : > { %v1090_v17 = vpop.f32.mrf.mxu2 }
 0x1d5   : > { %v1155_v57 = vadd.f32 %v1090_v17, %v782_v9  ;;  %v1449_v46 = vpop.f32.mrf.mxu3 }
 0x1d6   : > { %v784_v24 = vpop.f32.mrf.mxu1 }
 0x1d7   : > { %v1505_v54 = vadd.f32 %v1440_v5, %v1155_v57  ;;  %v1793_v22 = vpop.f32.mrf.mxu0  ;;  %v785_v60 = vadd.f32 %v784_v24, %v4587_v3  ;;  %v2576_v3 = vld [vmem:[%s4314_s30 + $0x72] sm:$0xff]  ;;  %v3398_v24 = vld [vmem:[%s5805_s3 + $0x20] sm:$0xff] }
 0x1d8   : > { %3457 = vperm.xlu2 %4237, %v3398_v24  }
 0x1d9   : > { %v5015_v25 = vadd.f32 %v1790_v63, %v1505_v54  ;;  %4054 = vmatmul.msk.f32.gmra.mxu1 %vm283_vm1, %v2220_v33  ;;  %4097 = vmatmul.msk.f32.gmra.mxu2 %vm283_vm1, %v2222_v18 }
 0x1da   : > { %4183 = vmatmul.msk.f32.gmra.mxu0 %vm283_vm1, %v2922_v12  ;;  %4143 = vmatmul.msk.f32.gmra.mxu3 %vm283_vm1, %v2575_v4  ;;  %v2924_v4 = vld [vmem:[%s4314_s30 + $0x63] sm:$0xff] }
 0x1dc   : > { %v1093_v41 = vpop.f32.mrf.mxu2 }
 0x1dd   : > { %v1156_v5 = vadd.f32 %v1093_v41, %v785_v60  ;;  %v1452_v53 = vpop.f32.mrf.mxu3 }
 0x1de   : > { %v787_v50 = vpop.f32.mrf.mxu1 }
 0x1df   : > { %v1506_v33 = vadd.f32 %v1443_v38, %v1156_v5  ;;  %v1796_v63 = vpop.f32.mrf.mxu0  ;;  %v788_v17 = vadd.f32 %v787_v50, %v4602_v15  ;;  %v2577_v5 = vld [vmem:[%s4314_s30 + $0x7a] sm:$0xff] }
 0x1e1   : > { %v5028_v9 = vadd.f32 %v1793_v22, %v1506_v33  ;;  %4055 = vmatmul.msk.f32.gmra.mxu1 %vm283_vm1, %v2221_v11  ;;  %4098 = vmatmul.msk.f32.gmra.mxu2 %vm283_vm1, %v2223_v6  ;;  %v3401_v11 = vld [vmem:[%s5805_s3 + $0x38] sm:$0xff]  ;;  %v2224_v22 = vld [vmem:[%s4314_s30 + $0x61] sm:$0xff] }
 0x1e2   : > { %4184 = vmatmul.msk.f32.gmra.mxu0 %vm283_vm1, %v2923_v39  ;;  %4144 = vmatmul.msk.f32.gmra.mxu3 %vm283_vm1, %v2576_v3  ;;  %v3399_v33 = vld [vmem:[%s5805_s3 + $0x28] sm:$0xff] }
 0x1e3   : > { %3472 = vperm.xlu1 %4236, %v3401_v11   ;;  %v2225_v39 = vld [vmem:[%s4314_s30 + $0x69] sm:$0xff]  ;;  %3462 = vperm.xlu2 %4237, %v3399_v33  }
 0x1e4   : > { %v1096_v57 = vpop.f32.mrf.mxu2 }
 0x1e5   : > { %v1157_v38 = vadd.f32 %v1096_v57, %v788_v17  ;;  %v1455_v60 = vpop.f32.mrf.mxu3  ;;  %v2925_v17 = vld [vmem:[%s4314_s30 + $0x6b] sm:$0xff] }
 0x1e6   : > { %v790_v54 = vpop.f32.mrf.mxu1 }
 0x1e7   : > { %v1507_v12 = vadd.f32 %v1446_v61, %v1157_v38  ;;  %v1799_v15 = vpop.f32.mrf.mxu0  ;;  %v791_v26 = vadd.f32 %v790_v54, %v4618_v31  ;;  %v2578_v31 = vld [vmem:[%s4314_s30 + $0x82] sm:$0xff] }
 0x1e8   : > { %v3403_v54 = vld [vmem:[%s5805_s3 + $0x48] sm:$0xff] }
 0x1e9   : > { %v5044_v41 = vadd.f32 %v1796_v63, %v1507_v12  ;;  %4056 = vmatmul.msk.f32.gmra.mxu1 %vm283_vm1, %v2222_v18  ;;  %4099 = vmatmul.msk.f32.gmra.mxu2 %vm283_vm1, %v2224_v22 }
 0x1ea   : > { %4185 = vmatmul.msk.f32.gmra.mxu0 %vm283_vm1, %v2924_v4  ;;  %4145 = vmatmul.msk.f32.gmra.mxu3 %vm283_vm1, %v2577_v5  ;;  %v2926_v5 = vld [vmem:[%s4314_s30 + $0x73] sm:$0xff] }
 0x1eb   : > { %3482 = vperm.xlu0 %4235, %v3403_v54  }
 0x1ec   : > { %v1099_v50 = vpop.f32.mrf.mxu2 }
 0x1ed   : > { %v1158_v61 = vadd.f32 %v1099_v50, %v791_v26  ;;  %v1458_v57 = vpop.f32.mrf.mxu3 }
 0x1ee   : > { %v793_v63 = vpop.f32.mrf.mxu1 }
 0x1ef   : > { %v1508_v18 = vadd.f32 %v1449_v46, %v1158_v61  ;;  %v1802_v3 = vpop.f32.mrf.mxu0  ;;  %v794_v24 = vadd.f32 %v793_v63, %v4476_v16  ;;  %v2579_v16 = vld [vmem:[%s4314_s30 + $0x8a] sm:$0xff] }
 0x1f0   : > { %v3404_v63 = vld [vmem:[%s5805_s3 + $0x50] sm:$0xff] }
 0x1f1   : > { %v5057_v38 = vadd.f32 %v1799_v15, %v1508_v18  ;;  %4057 = vmatmul.msk.f32.gmra.mxu1 %vm283_vm1, %v2223_v6  ;;  %4100 = vmatmul.msk.f32.gmra.mxu2 %vm283_vm1, %v2225_v39  ;;  %v2226_v15 = vld [vmem:[%s4314_s30 + $0x71] sm:$0xff] }
 0x1f2   : > { %4186 = vmatmul.msk.f32.gmra.mxu0 %vm283_vm1, %v2925_v17  ;;  %4146 = vmatmul.msk.f32.gmra.mxu3 %vm283_vm1, %v2578_v31  ;;  %v2927_v31 = vld [vmem:[%s4314_s30 + $0x7b] sm:$0xff] }
 0x1f3   : > { %3487 = vperm.xlu1 %4236, %v3404_v63  }
 0x1f4   : > { %v1102_v11 = vpop.f32.mrf.mxu2 }
 0x1f5   : > { %v1159_v46 = vadd.f32 %v1102_v11, %v794_v24  ;;  %v1461_v26 = vpop.f32.mrf.mxu3 }
 0x1f6   : > { %v796_v12 = vpop.f32.mrf.mxu1 }
 0x1f7   : > { %v1509_v6 = vadd.f32 %v1452_v53, %v1159_v46  ;;  %v1805_v4 = vpop.f32.mrf.mxu0  ;;  %v797_v61 = vadd.f32 %v796_v12, %v4491_v23  ;;  %v2580_v23 = vld [vmem:[%s4314_s30 + $0x92] sm:$0xff]  ;;  %v3402_v12 = vld [vmem:[%s5805_s3 + $0x40] sm:$0xff] }
 0x1f8   : > { %3477 = vperm.xlu2 %4237, %v3402_v12  }
 0x1f9   : > { %v5070_v50 = vadd.f32 %v1802_v3, %v1509_v6  ;;  %4058 = vmatmul.msk.f32.gmra.mxu1 %vm283_vm1, %v2224_v22  ;;  %4101 = vmatmul.msk.f32.gmra.mxu2 %vm283_vm1, %v2226_v15  ;;  %v2227_v3 = vld [vmem:[%s4314_s30 + $0x79] sm:$0xff] }
 0x1fa   : > { %4187 = vmatmul.msk.f32.gmra.mxu0 %vm283_vm1, %v2926_v5  ;;  %4147 = vmatmul.msk.f32.gmra.mxu3 %vm283_vm1, %v2579_v16  ;;  %v2928_v16 = vld [vmem:[%s4314_s30 + $0x83] sm:$0xff] }
 0x1fc   : > { %v1105_v33 = vpop.f32.mrf.mxu2 }
 0x1fd   : > { %v1160_v53 = vadd.f32 %v1105_v33, %v797_v61  ;;  %v1464_v24 = vpop.f32.mrf.mxu3 }
 0x1fe   : > { %v799_v18 = vpop.f32.mrf.mxu1 }
 0x1ff   : > { %v1510_v22 = vadd.f32 %v1455_v60, %v1160_v53  ;;  %v1808_v17 = vpop.f32.mrf.mxu0  ;;  %v800_v46 = vadd.f32 %v799_v18, %v4506_v30  ;;  %v2581_v30 = vld [vmem:[%s4314_s30 + $0x9a] sm:$0xff] }
 0x200   : > { %v3406_v18 = vld [vmem:[%s5805_s3 + $0x60] sm:$0xff] }
 0x201   : > { %v5083_v11 = vadd.f32 %v1805_v4, %v1510_v22  ;;  %4059 = vmatmul.msk.f32.gmra.mxu1 %vm283_vm1, %v2225_v39  ;;  %4102 = vmatmul.msk.f32.gmra.mxu2 %vm283_vm1, %v2227_v3  ;;  %v2228_v4 = vld [vmem:[%s4314_s30 + $0x81] sm:$0xff] }
 0x202   : > { %4188 = vmatmul.msk.f32.gmra.mxu0 %vm283_vm1, %v2927_v31  ;;  %4148 = vmatmul.msk.f32.gmra.mxu3 %vm283_vm1, %v2580_v23  ;;  %v2929_v23 = vld [vmem:[%s4314_s30 + $0x8b] sm:$0xff] }
 0x203   : > { %3497 = vperm.xlu0 %4235, %v3406_v18  }
 0x204   : > { %v1108_v54 = vpop.f32.mrf.mxu2 }
 0x205   : > { %v1161_v60 = vadd.f32 %v1108_v54, %v800_v46  ;;  %v1467_v61 = vpop.f32.mrf.mxu3 }
 0x206   : > { %v802_v6 = vpop.f32.mrf.mxu1 }
 0x207   : > { %v1511_v39 = vadd.f32 %v1458_v57, %v1161_v60  ;;  %v1811_v5 = vpop.f32.mrf.mxu0  ;;  %v803_v53 = vadd.f32 %v802_v6, %v4521_v37  ;;  %v2582_v37 = vld [vmem:[%s4314_s30 + $0xa2] sm:$0xff] }
 0x208   : > { %v3407_v6 = vld [vmem:[%s5805_s3 + $0x68] sm:$0xff] }
 0x209   : > { %v5096_v33 = vadd.f32 %v1808_v17, %v1511_v39  ;;  %4060 = vmatmul.msk.f32.gmra.mxu1 %vm283_vm1, %v2226_v15  ;;  %4103 = vmatmul.msk.f32.gmra.mxu2 %vm283_vm1, %v2228_v4  ;;  %v2229_v17 = vld [vmem:[%s4314_s30 + $0x89] sm:$0xff] }
 0x20a   : > { %4189 = vmatmul.msk.f32.gmra.mxu0 %vm283_vm1, %v2928_v16  ;;  %4149 = vmatmul.msk.f32.gmra.mxu3 %vm283_vm1, %v2581_v30  ;;  %v2930_v30 = vld [vmem:[%s4314_s30 + $0x93] sm:$0xff] }
 0x20b   : > { %3502 = vperm.xlu1 %4236, %v3407_v6  }
 0x20c   : > { %v1111_v63 = vpop.f32.mrf.mxu2 }
 0x20d   : > { %v1162_v57 = vadd.f32 %v1111_v63, %v803_v53  ;;  %v1470_v46 = vpop.f32.mrf.mxu3 }
 0x20e   : > { %v805_v22 = vpop.f32.mrf.mxu1 }
 0x20f   : > { %v1512_v15 = vadd.f32 %v1461_v26, %v1162_v57  ;;  %v1814_v31 = vpop.f32.mrf.mxu0  ;;  %v806_v60 = vadd.f32 %v805_v22, %v4536_v44  ;;  %v2583_v44 = vld [vmem:[%s4314_s30 + $0xaa] sm:$0xff]  ;;  %v3405_v22 = vld [vmem:[%s5805_s3 + $0x58] sm:$0xff] }
 0x210   : > { %3492 = vperm.xlu2 %4237, %v3405_v22  }
 0x211   : > { %v5109_v54 = vadd.f32 %v1811_v5, %v1512_v15  ;;  %4061 = vmatmul.msk.f32.gmra.mxu1 %vm283_vm1, %v2227_v3  ;;  %4104 = vmatmul.msk.f32.gmra.mxu2 %vm283_vm1, %v2229_v17  ;;  %v2230_v5 = vld [vmem:[%s4314_s30 + $0x91] sm:$0xff] }
 0x212   : > { %4190 = vmatmul.msk.f32.gmra.mxu0 %vm283_vm1, %v2929_v23  ;;  %4150 = vmatmul.msk.f32.gmra.mxu3 %vm283_vm1, %v2582_v37  ;;  %v2931_v23 = vld [vmem:[%s4314_s30 + $0x9b] sm:$0xff] }
 0x214   : > { %v1114_v12 = vpop.f32.mrf.mxu2 }
 0x215   : > { %v1163_v26 = vadd.f32 %v1114_v12, %v806_v60  ;;  %v5122_v53 = vpop.f32.mrf.mxu3  ;;  %v4249_v60 = vmov 0.0  }
 0x216   : > { %v808_v39 = vpop.f32.mrf.mxu1  ;;  %3685 = vst.msk [vmem:[%s5140_s23 + $0x18] sm:$0xff] %vm3681_vm2, %v4249_v60 }
 0x217   : > { %v1513_v3 = vadd.f32 %v1464_v24, %v1163_v26  ;;  %v1817_v16 = vpop.f32.mrf.mxu0  ;;  %v809_v57 = vadd.f32 %v808_v39, %v4551_v51  ;;  %v2231_v51 = vld [vmem:[%s4314_s30 + $0x99] sm:$0xff]  ;;  %3682 = vst.msk [vmem:[%s5140_s23] sm:$0xff] %vm3681_vm2, %v4249_v60 }
 0x218   : > { %3683 = vst.msk [vmem:[%s5140_s23 + $0x8] sm:$0xff] %vm3681_vm2, %v4249_v60 }
 0x219   : > { %v5124_v63 = vadd.f32 %v1814_v31, %v1513_v3  ;;  %4062 = vmatmul.msk.f32.gmra.mxu1 %vm283_vm1, %v2228_v4  ;;  %4105 = vmatmul.msk.f32.gmra.mxu2 %vm283_vm1, %v2230_v5  ;;  %3684 = vst.msk [vmem:[%s5140_s23 + $0x10] sm:$0xff] %vm3681_vm2, %v4249_v60  ;;  %v2232_v3 = vld [vmem:[%s4314_s30 + $0xa1] sm:$0xff] }
 0x21a   : > { %4191 = vmatmul.msk.f32.gmra.mxu0 %vm283_vm1, %v2930_v30  ;;  %4151 = vmatmul.msk.f32.gmra.mxu3 %vm283_vm1, %v2583_v44  ;;  %3686 = vst.msk [vmem:[%s5140_s23 + $0x20] sm:$0xff] %vm3681_vm2, %v4249_v60  ;;  %v2932_v44 = vld [vmem:[%s4314_s30 + $0xa3] sm:$0xff] }
 0x21b   : > { %3687 = vst.msk [vmem:[%s5140_s23 + $0x28] sm:$0xff] %vm3681_vm2, %v4249_v60 }
 0x21c   : > { %v1117_v18 = vpop.f32.mrf.mxu2  ;;  %3688 = vst.msk [vmem:[%s5140_s23 + $0x30] sm:$0xff] %vm3681_vm2, %v4249_v60 }
 0x21d   : > { %v1164_v24 = vadd.f32 %v1117_v18, %v809_v57  ;;  %v5144_v37 = vpop.f32.mrf.mxu3  ;;  %3689 = vst.msk [vmem:[%s5140_s23 + $0x38] sm:$0xff] %vm3681_vm2, %v4249_v60 }
 0x21e   : > { %v811_v4 = vpop.f32.mrf.mxu1  ;;  %3690 = vst.msk [vmem:[%s5140_s23 + $0x40] sm:$0xff] %vm3681_vm2, %v4249_v60 }
 0x21f   : > { %v1514_v15 = vadd.f32 %v1467_v61, %v1164_v24  ;;  %v1820_v31 = vpop.f32.mrf.mxu0  ;;  %v2584_v61 = vld [vmem:[%s4314_s30 + $0xb2] sm:$0xff]  ;;  %v812_v26 = vadd.f32 %v811_v4, %v4566_v58  ;;  %3691 = vst.msk [vmem:[%s5140_s23 + $0x48] sm:$0xff] %vm3681_vm2, %v4249_v60 }
 0x220   : > { %v3409_v58 = vld [vmem:[%s5805_s3 + $0x78] sm:$0xff]  ;;  %3692 = vst.msk [vmem:[%s5140_s23 + $0x50] sm:$0xff] %vm3681_vm2, %v4249_v60 }
 0x221   : > { %v5149_v12 = vadd.f32 %v1817_v16, %v1514_v15  ;;  %4063 = vmatmul.msk.f32.gmra.mxu1 %vm283_vm1, %v2229_v17  ;;  %4106 = vmatmul.msk.f32.gmra.mxu2 %vm283_vm1, %v2231_v51  ;;  %3693 = vst.msk [vmem:[%s5140_s23 + $0x58] sm:$0xff] %vm3681_vm2, %v4249_v60  ;;  %v5212_v15 = vld [vmem:[%s4314_s30 + $0xa9] sm:$0xff] }
 0x222   : > { %4192 = vmatmul.msk.f32.gmra.mxu0 %vm283_vm1, %v2931_v23  ;;  %4152 = vmatmul.msk.f32.gmra.mxu3 %vm283_vm1, %v2584_v61  ;;  %3694 = vst.msk [vmem:[%s5140_s23 + $0x60] sm:$0xff] %vm3681_vm2, %v4249_v60  ;;  %v2933_v23 = vld [vmem:[%s4314_s30 + $0xab] sm:$0xff] }
 0x223   : > { %3512 = vperm.xlu0 %4235, %v3409_v58   ;;  %3695 = vst.msk [vmem:[%s5140_s23 + $0x68] sm:$0xff] %vm3681_vm2, %v4249_v60 }
 0x224   : > { %v1120_v17 = vpop.f32.mrf.mxu2  ;;  %3696 = vst.msk [vmem:[%s5140_s23 + $0x70] sm:$0xff] %vm3681_vm2, %v4249_v60 }
 0x225   : > { %v1165_v6 = vadd.f32 %v1120_v17, %v812_v26  ;;  %v5180_v57 = vpop.f32.mrf.mxu3  ;;  %3697 = vst.msk [vmem:[%s5140_s23 + $0x78] sm:$0xff] %vm3681_vm2, %v4249_v60  ;;  %v3410_v26 = vld [vmem:[%s5805_s3 + $0x80] sm:$0xff] }
 0x226   : > { %v814_v39 = vpop.f32.mrf.mxu1  ;;  %3698 = vst.msk [vmem:[%s5140_s23 + $0x80] sm:$0xff] %vm3681_vm2, %v4249_v60  ;;  %3517 = vperm.xlu1 %4236, %v3410_v26  }
 0x227   : > { %v1515_v16 = vadd.f32 %v1470_v46, %v1165_v6  ;;  %v1823_v30 = vpop.f32.mrf.mxu0  ;;  %v2585_v46 = vld [vmem:[%s4314_s30 + $0xba] sm:$0xff]  ;;  %v815_v24 = vadd.f32 %v814_v39, %v4581_v1  ;;  %3699 = vst.msk [vmem:[%s5140_s23 + $0x88] sm:$0xff] %vm3681_vm2, %v4249_v60 }
 0x228   : > { %3700 = vst.msk [vmem:[%s5140_s23 + $0x90] sm:$0xff] %vm3681_vm2, %v4249_v60 }
 0x229   : > { %v5188_v18 = vadd.f32 %v1820_v31, %v1515_v16  ;;  %4064 = vmatmul.msk.f32.gmra.mxu1 %vm283_vm1, %v2230_v5  ;;  %4107 = vmatmul.msk.f32.gmra.mxu2 %vm283_vm1, %v2232_v3  ;;  %3701 = vst.msk [vmem:[%s5140_s23 + $0x98] sm:$0xff] %vm3681_vm2, %v4249_v60  ;;  %v5258_v16 = vld [vmem:[%s4314_s30 + $0xb1] sm:$0xff] }
 0x22a   : > { %4193 = vmatmul.msk.f32.gmra.mxu0 %vm283_vm1, %v2932_v44  ;;  %4153 = vmatmul.msk.f32.gmra.mxu3 %vm283_vm1, %v2585_v46  ;;  %3702 = vst.msk [vmem:[%s5140_s23 + $0xa0] sm:$0xff] %vm3681_vm2, %v4249_v60  ;;  %v5267_v44 = vld [vmem:[%s5804_s2] ss:$0 sm:$0xff] }
 0x22b   : > { %3703 = vst.msk [vmem:[%s5140_s23 + $0xa8] sm:$0xff] %vm3681_vm2, %v4249_v60 }
 0x22c   : > { %v1123_v5 = vpop.f32.mrf.mxu2  ;;  %3704 = vst.msk [vmem:[%s5140_s23 + $0xb0] sm:$0xff] %vm3681_vm2, %v4249_v60 }
 0x22d   : > { %v1166_v22 = vadd.f32 %v1123_v5, %v815_v24  ;;  %v5222_v61 = vpop.f32.mrf.mxu3  ;;  %3705 = vst.msk [vmem:[%s5140_s23 + $0xb8] sm:$0xff] %vm3681_vm2, %v4249_v60  ;;  %v2934_v24 = vld [vmem:[%s4314_s30 + $0xb3] sm:$0xff] }
 0x22e   : > { %v2053_v4 = vpop.f32.mrf.mxu1  ;;  %3706 = vst.msk [vmem:[%s5140_s23 + $0xc0] sm:$0xff] %vm3681_vm2, %v4249_v60 }
 0x22f   : > { %v1516_v1 = vadd.f32 %v5122_v53, %v1166_v22  ;;  %v3103_v31 = vpop.f32.mrf.mxu0  ;;  %v2586_v53 = vld [vmem:[%s4314_s30 + $0xc2] sm:$0xff]  ;;  %v2176_v6 = vadd.f32 %v2053_v4, %v4635_v20  ;;  %v3408_v20 = vld [vmem:[%s5805_s3 + $0x70] sm:$0xff]  ;;  %3707 = vst.msk [vmem:[%s5140_s23 + $0xc8] sm:$0xff] %vm3681_vm2, %v4249_v60 }
 0x230   : > { %3507 = vperm.xlu2 %4237, %v3408_v20   ;;  %3708 = vst.msk [vmem:[%s5140_s23 + $0xd0] sm:$0xff] %vm3681_vm2, %v4249_v60 }
 0x231   : > { %v5230_v17 = vadd.f32 %v1823_v30, %v1516_v1  ;;  %4065 = vmatmul.msk.f32.gmra.mxu1 %vm283_vm1, %v2231_v51  ;;  %4108 = vmatmul.msk.f32.gmra.mxu2 %vm283_vm1, %v5212_v15  ;;  %3709 = vst.msk [vmem:[%s5140_s23 + $0xd8] sm:$0xff] %vm3681_vm2, %v4249_v60 }
 0x232   : > { %4194 = vmatmul.msk.f32.gmra.mxu0 %vm283_vm1, %v2933_v23  ;;  %4154 = vmatmul.msk.f32.gmra.mxu3 %vm283_vm1, %v2586_v53  ;;  %3710 = vst.msk [vmem:[%s5140_s23 + $0xe0] sm:$0xff] %vm3681_vm2, %v4249_v60  ;;  %v3438_v53 = vpop.permute.xlu0 %3437 }
 0x233   : > { %3711 = vst.msk [vmem:[%s5140_s23 + $0xe8] sm:$0xff] %vm3681_vm2, %v4249_v60 }
 0x234   : > { %v2403_v51 = vpop.f32.mrf.mxu2  ;;  %3712 = vst.msk [vmem:[%s5140_s23 + $0xf0] sm:$0xff] %vm3681_vm2, %v4249_v60 }
 0x235   : > { %v2526_v58 = vadd.f32 %v2403_v51, %v2176_v6  ;;  %v5273_v5 = vpop.f32.mrf.mxu3  ;;  %v5308_v6 = vld [vmem:[%s4314_s30 + $0xb9] sm:$0xff]  ;;  %3713 = vst.msk [vmem:[%s5140_s23 + $0xf8] sm:$0xff] %vm3681_vm2, %v4249_v60 }
 0x236   : > { %v2056_v39 = vpop.f32.mrf.mxu1  ;;  %3714 = vst.msk [vmem:[%s5140_s23 + $0x100] sm:$0xff] %vm3681_vm2, %v4249_v60 }
 0x237   : > { %v2876_v30 = vadd.f32 %v5144_v37, %v2526_v58  ;;  %v3106_v46 = vpop.f32.mrf.mxu0  ;;  %v2587_v37 = vld [vmem:[%s4314_s30 + $0xca] sm:$0xff]  ;;  %v2177_v4 = vadd.f32 %v2056_v39, %v4648_v55  ;;  %v2935_v39 = vld [vmem:[%s4314_s30 + $0xbb] sm:$0xff]  ;;  %3715 = vst.msk [vmem:[%s5140_s23 + $0x108] sm:$0xff] %vm3681_vm2, %v4249_v60 }
 0x238   : > { %v3412_v55 = vld [vmem:[%s5805_s3 + $0x90] sm:$0xff]  ;;  %3716 = vst.msk [vmem:[%s5140_s23 + $0x110] sm:$0xff] %vm3681_vm2, %v4249_v60 }
 0x239   : > { %v3226_v22 = vadd.f32 %v3103_v31, %v2876_v30  ;;  %4066 = vmatmul.msk.f32.gmra.mxu1 %vm283_vm1, %v2232_v3  ;;  %4109 = vmatmul.msk.f32.gmra.mxu2 %vm283_vm1, %v5258_v16  ;;  %3717 = vst.msk [vmem:[%s5140_s23 + $0x118] sm:$0xff] %vm3681_vm2, %v4249_v60 }
 0x23a   : > { %4195 = vmatmul.msk.f32.gmra.mxu0 %vm283_vm1, %v2934_v24  ;;  %4155 = vmatmul.msk.f32.gmra.mxu3 %vm283_vm1, %v2587_v37  ;;  %3718 = vst.msk [vmem:[%s5140_s23 + $0x120] sm:$0xff] %vm3681_vm2, %v4249_v60 }
 0x23b   : > { %v3271_v1 = vadd.f32 %v5267_v44, %v3226_v22  ;;  %3527 = vperm.xlu0 %4235, %v3412_v55   ;;  %3719 = vst.msk [vmem:[%s5140_s23 + $0x128] sm:$0xff] %vm3681_vm2, %v4249_v60 }
 0x23c   : > { %v2406_v3 = vpop.f32.mrf.mxu2  ;;  %3720 = vst.msk [vmem:[%s5140_s23 + $0x130] sm:$0xff] %vm3681_vm2, %v4249_v60 }
 0x23d   : > { %v2527_v31 = vadd.f32 %v2406_v3, %v2177_v4  ;;  %v3312_v23 = vmul.f32 0.2, %v3271_v1  ;;  %v5315_v30 = vpop.f32.mrf.mxu3  ;;  %3721 = vst.msk [vmem:[%s5140_s23 + $0x138] sm:$0xff] %vm3681_vm2, %v4249_v60 }
 0x23e   : > { %v2059_v26 = vpop.f32.mrf.mxu1  ;;  %3722 = vst.msk [vmem:[%s5140_s23 + $0x140] sm:$0xff] %vm3681_vm2, %v4249_v60 }
 0x23f   : > { %v2877_v51 = vadd.f32 %v5180_v57, %v2527_v31  ;;  %v3353_v58 = vmax.f32 %v3271_v1, %v3312_v23  ;;  %v3109_v20 = vpop.f32.mrf.mxu0  ;;  %v2588_v57 = vld [vmem:[%s4314_s30 + $0xd2] sm:$0xff]  ;;  %v2178_v37 = vadd.f32 %v2059_v26, %v4661_v10  ;;  %v5350_v31 = vld [vmem:[%s4314_s30 + $0xc1] sm:$0xff]  ;;  %3723 = vst.msk [vmem:[%s5140_s23 + $0x148] sm:$0xff] %vm3681_vm2, %v4249_v60 }
 0x240   : > { %v3413_v10 = vld [vmem:[%s5805_s3 + $0x98] sm:$0xff]  ;;  %3724 = vst.msk [vmem:[%s5140_s23 + $0x150] sm:$0xff] %vm3681_vm2, %v4249_v60 }
 0x241   : > { %v3640_v24 = vmul.f32 %v3438_v53, %v3353_v58  ;;  %v3227_v22 = vadd.f32 %v3106_v46, %v2877_v51  ;;  %4067 = vmatmul.msk.f32.gmra.mxu1 %vm283_vm1, %v5212_v15  ;;  %4110 = vmatmul.msk.f32.gmra.mxu2 %vm283_vm1, %v5308_v6  ;;  %v2936_v53 = vld [vmem:[%s4314_s30 + $0xc3] sm:$0xff]  ;;  %v3443_v58 = vpop.permute.xlu0 %3442  ;;  %3725 = vst.msk [vmem:[%s5140_s23 + $0x158] sm:$0xff] %vm3681_vm2, %v4249_v60 }
 0x242   : > { %4196 = vmatmul.msk.f32.gmra.mxu0 %vm283_vm1, %v2935_v39  ;;  %4156 = vmatmul.msk.f32.gmra.mxu3 %vm283_vm1, %v2588_v57  ;;  %v3448_v57 = vpop.permute.xlu1 %3447  ;;  %3726 = vst.msk [vmem:[%s5140_s23 + $0x160] sm:$0xff] %vm3681_vm2, %v4249_v60 }
 0x243   : > { %3730 = vst.msk [vmem:[%s5140_s23 + $0x18] sm:$0xff] %vm3681_vm2, %v3640_v24  ;;  %v3272_v46 = vadd.f32 %v5267_v44, %v3227_v22  ;;  %3532 = vperm.xlu1 %4236, %v3413_v10  }
 0x244   : > { %v2409_v15 = vpop.f32.mrf.mxu2  ;;  %3727 = vst.msk [vmem:[%s5140_s23 + $0x168] sm:$0xff] %vm3681_vm2, %v4249_v60 }
 0x245   : > { %v2528_v4 = vadd.f32 %v2409_v15, %v2178_v37  ;;  %v3313_v1 = vmul.f32 0.2, %v3272_v46  ;;  %v5357_v51 = vpop.f32.mrf.mxu3  ;;  %3729 = vst.msk [vmem:[%s5140_s23 + $0x170] sm:$0xf] %vm3728_vm3, %v4249_v60 }
 0x246   : > { %v2062_v3 = vpop.f32.mrf.mxu1 }
 0x247   : > { %v2878_v23 = vadd.f32 %v5222_v61, %v2528_v4  ;;  %v3354_v55 = vmax.f32 %v3272_v46, %v3313_v1  ;;  %v3112_v26 = vpop.f32.mrf.mxu0  ;;  %v2589_v61 = vld [vmem:[%s4314_s30 + $0xda] sm:$0xff]  ;;  %v2237_v4 = vld [vmem:[%s4314_s30 + $0xc9] sm:$0xff] }
 0x249   : > { %v3228_v39 = vadd.f32 %v3109_v20, %v2878_v23  ;;  %4068 = vmatmul.msk.f32.gmra.mxu1 %vm283_vm1, %v5258_v16  ;;  %4111 = vmatmul.msk.f32.gmra.mxu2 %vm283_vm1, %v5350_v31  ;;  %v2179_v20 = vadd.f32 %v2062_v3, %v4675_v27  ;;  %v3641_v24 = vmul.f32 %v3443_v58, %v3354_v55  ;;  %v3411_v27 = vld [vmem:[%s5805_s3 + $0x88] sm:$0xff] }
 0x24a   : > { %4197 = vmatmul.msk.f32.gmra.mxu0 %vm283_vm1, %v2936_v53  ;;  %4157 = vmatmul.msk.f32.gmra.mxu3 %vm283_vm1, %v2589_v61  ;;  %v2937_v23 = vld [vmem:[%s4314_s30 + $0xcb] sm:$0xff] }
 0x24b   : > { %v3273_v16 = vadd.f32 %v5267_v44, %v3228_v39  ;;  %3522 = vperm.xlu2 %4237, %v3411_v27   ;;  %3731 = vst.msk [vmem:[%s5140_s23 + $0x20] sm:$0xff] %vm3681_vm2, %v3641_v24  ;;  %v2590_v39 = vld [vmem:[%s4314_s30 + $0xe2] sm:$0xff] }
 0x24c   : > { %v2412_v22 = vpop.f32.mrf.mxu2 }
 0x24d   : > { %v2529_v37 = vadd.f32 %v2412_v22, %v2179_v20  ;;  %v3314_v46 = vmul.f32 0.2, %v3273_v16  ;;  %v5397_v55 = vpop.f32.mrf.mxu3  ;;  %v3453_v22 = vpop.permute.xlu1 %3452 }
 0x24e   : > { %v2065_v15 = vpop.f32.mrf.mxu1 }
 0x24f   : > { %v2879_v1 = vadd.f32 %v5273_v5, %v2529_v37  ;;  %v3355_v10 = vmax.f32 %v3273_v16, %v3314_v46  ;;  %v3115_v3 = vpop.f32.mrf.mxu0  ;;  %v2180_v61 = vadd.f32 %v2065_v15, %v4689_v43  ;;  %v3415_v16 = vld [vmem:[%s5805_s3 + $0xa8] sm:$0xff]  ;;  %v2938_v15 = vld [vmem:[%s4314_s30 + $0xd3] sm:$0xff] }
 0x250   : > { %3542 = vperm.xlu0 %4235, %v3415_v16  }
 0x251   : > { %v3642_v53 = vmul.f32 %v3448_v57, %v3355_v10  ;;  %v3229_v58 = vadd.f32 %v3112_v26, %v2879_v1  ;;  %4069 = vmatmul.msk.f32.gmra.mxu1 %vm283_vm1, %v5308_v6  ;;  %4112 = vmatmul.msk.f32.gmra.mxu2 %vm283_vm1, %v2237_v4  ;;  %v3416_v6 = vld [vmem:[%s5805_s3 + $0xb0] sm:$0xff] }
 0x252   : > { %4198 = vmatmul.msk.f32.gmra.mxu0 %vm283_vm1, %v2937_v23  ;;  %4158 = vmatmul.msk.f32.gmra.mxu3 %vm283_vm1, %v2590_v39  ;;  %v2238_v57 = vld [vmem:[%s4314_s30 + $0xd1] sm:$0xff] }
 0x253   : > { %3732 = vst.msk [vmem:[%s5140_s23 + $0x28] sm:$0xff] %vm3681_vm2, %v3642_v53  ;;  %v3274_v5 = vadd.f32 %v5267_v44, %v3229_v58  ;;  %3547 = vperm.xlu1 %4236, %v3416_v6   ;;  %v2591_v53 = vld [vmem:[%s4314_s30 + $0xea] sm:$0xff] }
 0x254   : > { %v2415_v20 = vpop.f32.mrf.mxu2 }
 0x255   : > { %v2530_v26 = vadd.f32 %v2415_v20, %v2180_v61  ;;  %v3315_v24 = vmul.f32 0.2, %v3274_v5  ;;  %v5418_v1 = vpop.f32.mrf.mxu3  ;;  %v3458_v61 = vpop.permute.xlu2 %3457 }
 0x256   : > { %v2068_v43 = vpop.f32.mrf.mxu1 }
 0x257   : > { %v2880_v37 = vadd.f32 %v5315_v30, %v2530_v26  ;;  %v3356_v46 = vmax.f32 %v3274_v5, %v3315_v24  ;;  %v3118_v27 = vpop.f32.mrf.mxu0  ;;  %v2181_v58 = vadd.f32 %v2068_v43, %v4703_v52  ;;  %v3418_v52 = vld [vmem:[%s5805_s3 + $0xc0] sm:$0xff] }
 0x258   : > { %v2239_v26 = vld [vmem:[%s4314_s30 + $0xd9] sm:$0xff]  ;;  %3557 = vperm.xlu0 %4235, %v3418_v52   ;;  %v2940_v52 = vld [vmem:[%s4314_s30 + $0xe3] sm:$0xff] }
 0x259   : > { %v3643_v10 = vmul.f32 %v3453_v22, %v3356_v46  ;;  %v3230_v23 = vadd.f32 %v3115_v3, %v2880_v37  ;;  %4070 = vmatmul.msk.f32.gmra.mxu1 %vm283_vm1, %v5350_v31  ;;  %4113 = vmatmul.msk.f32.gmra.mxu2 %vm283_vm1, %v2238_v57  ;;  %v3419_v31 = vld [vmem:[%s5805_s3 + $0xc8] sm:$0xff]  ;;  %v2939_v43 = vld [vmem:[%s4314_s30 + $0xdb] sm:$0xff] }
 0x25a   : > { %4199 = vmatmul.msk.f32.gmra.mxu0 %vm283_vm1, %v2938_v15  ;;  %4159 = vmatmul.msk.f32.gmra.mxu3 %vm283_vm1, %v2591_v53  ;;  %v2592_v15 = vld [vmem:[%s4314_s30 + $0xf2] sm:$0xff] }
 0x25b   : > { %3733 = vst.msk [vmem:[%s5140_s23 + $0x30] sm:$0xff] %vm3681_vm2, %v3643_v10  ;;  %v3275_v30 = vadd.f32 %v5267_v44, %v3230_v23  ;;  %3562 = vperm.xlu1 %4236, %v3419_v31  }
 0x25c   : > { %v2418_v39 = vpop.f32.mrf.mxu2 }
 0x25d   : > { %v2531_v3 = vadd.f32 %v2418_v39, %v2181_v58  ;;  %v3316_v5 = vmul.f32 0.2, %v3275_v30  ;;  %v5439_v22 = vpop.f32.mrf.mxu3  ;;  %v3422_v58 = vld [vmem:[%s5805_s3 + $0xe0] sm:$0xff]  ;;  %v3463_v39 = vpop.permute.xlu2 %3462 }
 0x25e   : > { %v2071_v20 = vpop.f32.mrf.mxu1 }
 0x25f   : > { %v2881_v24 = vadd.f32 %v5357_v51, %v2531_v3  ;;  %v3357_v6 = vmax.f32 %v3275_v30, %v3316_v5  ;;  %v3121_v16 = vpop.f32.mrf.mxu0  ;;  %v2182_v10 = vadd.f32 %v2071_v20, %v4717_v59  ;;  %v3421_v59 = vld [vmem:[%s5805_s3 + $0xd8] sm:$0xff] }
 0x260   : > { %3572 = vperm.xlu0 %4235, %v3421_v59  }
 0x261   : > { %v3644_v37 = vmul.f32 %v3458_v61, %v3357_v6  ;;  %v3231_v46 = vadd.f32 %v3118_v27, %v2881_v24  ;;  %4071 = vmatmul.msk.f32.gmra.mxu1 %vm283_vm1, %v2237_v4  ;;  %4114 = vmatmul.msk.f32.gmra.mxu2 %vm283_vm1, %v2239_v26  ;;  %v3414_v4 = vld [vmem:[%s5805_s3 + $0xa0] sm:$0xff] }
 0x262   : > { %4200 = vmatmul.msk.f32.gmra.mxu0 %vm283_vm1, %v2939_v43  ;;  %4160 = vmatmul.msk.f32.gmra.mxu3 %vm283_vm1, %v2592_v15  ;;  %v2240_v61 = vld [vmem:[%s4314_s30 + $0xe1] sm:$0xff] }
 0x263   : > { %3734 = vst.msk [vmem:[%s5140_s23 + $0x38] sm:$0xff] %vm3681_vm2, %v3644_v37  ;;  %v3276_v51 = vadd.f32 %v5267_v44, %v3231_v46  ;;  %3537 = vperm.xlu2 %4237, %v3414_v4   ;;  %3577 = vperm.xlu1 %4236, %v3422_v58   ;;  %v2593_v43 = vld [vmem:[%s4314_s30 + $0xfa] sm:$0xff]  ;;  %v2941_v58 = vld [vmem:[%s4314_s30 + $0xeb] sm:$0xff] }
 0x264   : > { %v2421_v23 = vpop.f32.mrf.mxu2 }
 0x265   : > { %v2532_v53 = vadd.f32 %v2421_v23, %v2182_v10  ;;  %v3317_v27 = vmul.f32 0.2, %v3276_v51  ;;  %v5462_v20 = vpop.f32.mrf.mxu3  ;;  %v3424_v10 = vld [vmem:[%s5805_s3 + $0xf0] sm:$0xff] }
 0x266   : > { %v2074_v30 = vpop.f32.mrf.mxu1  ;;  %v2241_v23 = vld [vmem:[%s4314_s30 + $0xe9] sm:$0xff] }
 0x267   : > { %v2882_v3 = vadd.f32 %v5397_v55, %v2532_v53  ;;  %v3358_v5 = vmax.f32 %v3276_v51, %v3317_v27  ;;  %v3124_v31 = vpop.f32.mrf.mxu0  ;;  %v2183_v37 = vadd.f32 %v2074_v30, %v4731_v2  ;;  %v3468_v51 = vpop.permute.xlu0 %3467 }
 0x268   : > { %3587 = vperm.xlu0 %4235, %v3424_v10  }
 0x269   : > { %v3645_v24 = vmul.f32 %v3463_v39, %v3358_v5  ;;  %v3232_v6 = vadd.f32 %v3121_v16, %v2882_v3  ;;  %4072 = vmatmul.msk.f32.gmra.mxu1 %vm283_vm1, %v2238_v57  ;;  %4115 = vmatmul.msk.f32.gmra.mxu2 %vm283_vm1, %v2240_v61  ;;  %v3425_v57 = vld [vmem:[%s5805_s3 + $0xf8] sm:$0xff]  ;;  %v2594_v3 = vld [vmem:[%s4314_s30 + $0x102] sm:$0xff] }
 0x26a   : > { %4201 = vmatmul.msk.f32.gmra.mxu0 %vm283_vm1, %v2940_v52  ;;  %4161 = vmatmul.msk.f32.gmra.mxu3 %vm283_vm1, %v2593_v43  ;;  %v3473_v43 = vpop.permute.xlu1 %3472 }
 0x26b   : > { %3735 = vst.msk [vmem:[%s5140_s23 + $0x40] sm:$0xff] %vm3681_vm2, %v3645_v24  ;;  %v3277_v55 = vadd.f32 %v5267_v44, %v3232_v6  ;;  %3592 = vperm.xlu1 %4236, %v3425_v57   ;;  %v3427_v6 = vld [vmem:[%s5805_s3 + $0x108] sm:$0xff] }
 0x26c   : > { %v2424_v46 = vpop.f32.mrf.mxu2 }
 0x26d   : > { %v2533_v15 = vadd.f32 %v2424_v46, %v2183_v37  ;;  %v3318_v16 = vmul.f32 0.2, %v3277_v55  ;;  %v5482_v59 = vpop.f32.mrf.mxu3  ;;  %v5500_v37 = vld [vmem:[%s4314_s30 + $0xf1] sm:$0xff] }
 0x26e   : > { %v2077_v2 = vpop.f32.mrf.mxu1 }
 0x26f   : > { %v2883_v53 = vadd.f32 %v5418_v1, %v2533_v15  ;;  %v3359_v27 = vmax.f32 %v3277_v55, %v3318_v16  ;;  %v3127_v4 = vpop.f32.mrf.mxu0  ;;  %v2184_v5 = vadd.f32 %v2077_v2, %v4745_v13  ;;  %v2942_v16 = vld [vmem:[%s4314_s30 + $0xf3] sm:$0xff] }
 0x270   : > { %3602 = vperm.xlu0 %4235, %v3427_v6  }
 0x271   : > { %v3646_v30 = vmul.f32 %v3468_v51, %v3359_v27  ;;  %v3233_v39 = vadd.f32 %v3124_v31, %v2883_v53  ;;  %4073 = vmatmul.msk.f32.gmra.mxu1 %vm283_vm1, %v2239_v26  ;;  %4116 = vmatmul.msk.f32.gmra.mxu2 %vm283_vm1, %v2241_v23  ;;  %v3428_v26 = vld [vmem:[%s5805_s3 + $0x110] sm:$0xff] }
 0x272   : > { %4202 = vmatmul.msk.f32.gmra.mxu0 %vm283_vm1, %v2941_v58  ;;  %4162 = vmatmul.msk.f32.gmra.mxu3 %vm283_vm1, %v2594_v3  ;;  %v2595_v51 = vld [vmem:[%s4314_s30 + $0x10a] sm:$0xff]  ;;  %v3478_v3 = vpop.permute.xlu2 %3477 }
 0x273   : > { %3736 = vst.msk [vmem:[%s5140_s23 + $0x48] sm:$0xff] %vm3681_vm2, %v3646_v30  ;;  %v3278_v1 = vadd.f32 %v5267_v44, %v3233_v39  ;;  %3607 = vperm.xlu1 %4236, %v3428_v26   ;;  %v3431_v30 = vld [vmem:[%s5805_s3 + $0x128] sm:$0xff] }
 0x274   : > { %v2427_v52 = vpop.f32.mrf.mxu2 }
 0x275   : > { %v2534_v24 = vadd.f32 %v2427_v52, %v2184_v5  ;;  %v3319_v31 = vmul.f32 0.2, %v3278_v1  ;;  %v5504_v57 = vpop.f32.mrf.mxu3  ;;  %v2243_v5 = vld [vmem:[%s4314_s30 + $0xf9] sm:$0xff] }
 0x276   : > { %v2080_v13 = vpop.f32.mrf.mxu1 }
 0x277   : > { %v2884_v55 = vadd.f32 %v5439_v22, %v2534_v24  ;;  %v3360_v46 = vmax.f32 %v3278_v1, %v3319_v31  ;;  %v3130_v15 = vpop.f32.mrf.mxu0  ;;  %v2185_v53 = vadd.f32 %v2080_v13, %v4759_v29  ;;  %v3430_v29 = vld [vmem:[%s5805_s3 + $0x120] sm:$0xff] }
 0x278   : > { %v2943_v31 = vld [vmem:[%s4314_s30 + $0xfb] sm:$0xff]  ;;  %3617 = vperm.xlu0 %4235, %v3430_v29  }
 0x279   : > { %v3647_v10 = vmul.f32 %v3473_v43, %v3360_v46  ;;  %v3234_v2 = vadd.f32 %v3127_v4, %v2884_v55  ;;  %4074 = vmatmul.msk.f32.gmra.mxu1 %vm283_vm1, %v2240_v61  ;;  %4117 = vmatmul.msk.f32.gmra.mxu2 %vm283_vm1, %v5500_v37  ;;  %v3417_v61 = vld [vmem:[%s5805_s3 + $0xb8] sm:$0xff] }
 0x27a   : > { %4203 = vmatmul.msk.f32.gmra.mxu0 %vm283_vm1, %v2942_v16  ;;  %4163 = vmatmul.msk.f32.gmra.mxu3 %vm283_vm1, %v2595_v51  ;;  %v2596_v43 = vld [vmem:[%s4314_s30 + $0x112] sm:$0xff]  ;;  %v3483_v51 = vpop.permute.xlu0 %3482 }
 0x27b   : > { %3737 = vst.msk [vmem:[%s5140_s23 + $0x50] sm:$0xff] %vm3681_vm2, %v3647_v10  ;;  %v3279_v22 = vadd.f32 %v5267_v44, %v3234_v2  ;;  %3552 = vperm.xlu2 %4237, %v3417_v61   ;;  %3622 = vperm.xlu1 %4236, %v3431_v30   ;;  %v3434_v10 = vld [vmem:[%s5805_s3 + $0x140] sm:$0xf] }
 0x27c   : > { %v2430_v27 = vpop.f32.mrf.mxu2 }
 0x27d   : > { %v2535_v4 = vadd.f32 %v2430_v27, %v2185_v53  ;;  %v3320_v58 = vmul.f32 0.2, %v3279_v22  ;;  %v5528_v26 = vpop.f32.mrf.mxu3  ;;  %v2244_v53 = vld [vmem:[%s4314_s30 + $0x101] sm:$0xff] }
 0x27e   : > { %v2083_v39 = vpop.f32.mrf.mxu1 }
 0x27f   : > { %v2885_v1 = vadd.f32 %v5462_v20, %v2535_v4  ;;  %v3361_v52 = vmax.f32 %v3279_v22, %v3320_v58  ;;  %v3133_v24 = vpop.f32.mrf.mxu0  ;;  %v2186_v55 = vadd.f32 %v2083_v39, %v4773_v45  ;;  %v3433_v45 = vld [vmem:[%s5805_s3 + $0x138] sm:$0xff]  ;;  %v2944_v58 = vld [vmem:[%s4314_s30 + $0x103] sm:$0xff] }
 0x280   : > { %3632 = vperm.xlu0 %4235, %v3433_v45   ;;  %v2597_v39 = vld [vmem:[%s4314_s30 + $0x11a] sm:$0xff] }
 0x281   : > { %v3648_v6 = vmul.f32 %v3478_v3, %v3361_v52  ;;  %v3235_v13 = vadd.f32 %v3130_v15, %v2885_v1  ;;  %4075 = vmatmul.msk.f32.gmra.mxu1 %vm283_vm1, %v2241_v23  ;;  %4118 = vmatmul.msk.f32.gmra.mxu2 %vm283_vm1, %v2243_v5  ;;  %v3420_v23 = vld [vmem:[%s5805_s3 + $0xd0] sm:$0xff] }
 0x282   : > { %4204 = vmatmul.msk.f32.gmra.mxu0 %vm283_vm1, %v2943_v31  ;;  %4164 = vmatmul.msk.f32.gmra.mxu3 %vm283_vm1, %v2596_v43 }
 0x283   : > { %3738 = vst.msk [vmem:[%s5140_s23 + $0x58] sm:$0xff] %vm3681_vm2, %v3648_v6  ;;  %v3280_v20 = vadd.f32 %v5267_v44, %v3235_v13  ;;  %3567 = vperm.xlu2 %4237, %v3420_v23   ;;  %3637 = vperm.xlu1 %4236, %v3434_v10   ;;  %v3488_v6 = vpop.permute.xlu1 %3487  ;;  %v2245_v13 = vld [vmem:[%s4314_s30 + $0x109] sm:$0xff] }
 0x284   : > { %v2433_v46 = vpop.f32.mrf.mxu2  ;;  %v2598_v23 = vld [vmem:[%s4314_s30 + $0x122] sm:$0xff] }
 0x285   : > { %v2536_v16 = vadd.f32 %v2433_v46, %v2186_v55  ;;  %v3321_v15 = vmul.f32 0.2, %v3280_v20  ;;  %v5551_v61 = vpop.f32.mrf.mxu3 }
 0x286   : > { %v2086_v2 = vpop.f32.mrf.mxu1 }
 0x287   : > { %v2886_v22 = vadd.f32 %v5482_v59, %v2536_v16  ;;  %v3362_v27 = vmax.f32 %v3280_v20, %v3321_v15  ;;  %v3136_v4 = vpop.f32.mrf.mxu0  ;;  %v2187_v59 = vadd.f32 %v2086_v2, %v4787_v8  ;;  %v2945_v20 = vld [vmem:[%s4314_s30 + $0x10b] sm:$0xff] }
 0x289   : > { %v3649_v30 = vmul.f32 %v3483_v51, %v3362_v27  ;;  %v3236_v29 = vadd.f32 %v3133_v24, %v2886_v22  ;;  %4076 = vmatmul.msk.f32.gmra.mxu1 %vm283_vm1, %v5500_v37  ;;  %4119 = vmatmul.msk.f32.gmra.mxu2 %vm283_vm1, %v2244_v53  ;;  %v3423_v37 = vld [vmem:[%s5805_s3 + $0xe8] sm:$0xff]  ;;  %v3493_v27 = vpop.permute.xlu2 %3492 }
 0x28a   : > { %4205 = vmatmul.msk.f32.gmra.mxu0 %vm283_vm1, %v2944_v58  ;;  %4165 = vmatmul.msk.f32.gmra.mxu3 %vm283_vm1, %v2597_v39 }
 0x28b   : > { %3739 = vst.msk [vmem:[%s5140_s23 + $0x60] sm:$0xff] %vm3681_vm2, %v3649_v30  ;;  %v3281_v3 = vadd.f32 %v5267_v44, %v3236_v29  ;;  %3582 = vperm.xlu2 %4237, %v3423_v37   ;;  %v2946_v29 = vld [vmem:[%s4314_s30 + $0x113] sm:$0xff] }
 0x28c   : > { %v2436_v1 = vpop.f32.mrf.mxu2 }
 0x28d   : > { %v2537_v52 = vadd.f32 %v2436_v1, %v2187_v59  ;;  %v3322_v24 = vmul.f32 0.2, %v3281_v3  ;;  %v5569_v46 = vpop.f32.mrf.mxu3  ;;  %v2599_v1 = vld [vmem:[%s4314_s30 + $0x12a] sm:$0xff] }
 0x28e   : > { %v2089_v31 = vpop.f32.mrf.mxu1 }
 0x28f   : > { %v2887_v8 = vadd.f32 %v5504_v57, %v2537_v52  ;;  %v3363_v43 = vmax.f32 %v3281_v3, %v3322_v24  ;;  %v3139_v55 = vpop.f32.mrf.mxu0  ;;  %v2188_v10 = vadd.f32 %v2089_v31, %v4801_v14 }
 0x291   : > { %v3650_v16 = vmul.f32 %v3488_v6, %v3363_v43  ;;  %v3237_v15 = vadd.f32 %v3136_v4, %v2887_v8  ;;  %4077 = vmatmul.msk.f32.gmra.mxu1 %vm283_vm1, %v2243_v5  ;;  %4120 = vmatmul.msk.f32.gmra.mxu2 %vm283_vm1, %v2245_v13  ;;  %v3426_v5 = vld [vmem:[%s5805_s3 + $0x100] sm:$0xff]  ;;  %v2246_v4 = vld [vmem:[%s4314_s30 + $0x111] sm:$0xff]  ;;  %v3498_v8 = vpop.permute.xlu0 %3497 }
 0x292   : > { %4206 = vmatmul.msk.f32.gmra.mxu0 %vm283_vm1, %v2945_v20  ;;  %4166 = vmatmul.msk.f32.gmra.mxu3 %vm283_vm1, %v2598_v23  ;;  %v2247_v43 = vld [vmem:[%s4314_s30 + $0x119] sm:$0xff] }
 0x293   : > { %3740 = vst.msk [vmem:[%s5140_s23 + $0x68] sm:$0xff] %vm3681_vm2, %v3650_v16  ;;  %v3282_v57 = vadd.f32 %v5267_v44, %v3237_v15  ;;  %3597 = vperm.xlu2 %4237, %v3426_v5   ;;  %v2947_v16 = vld [vmem:[%s4314_s30 + $0x11b] sm:$0xff] }
 0x294   : > { %v2439_v45 = vpop.f32.mrf.mxu2 }
 0x295   : > { %v2538_v2 = vadd.f32 %v2439_v45, %v2188_v10  ;;  %v3323_v51 = vmul.f32 0.2, %v3282_v57  ;;  %v5586_v39 = vpop.f32.mrf.mxu3 }
 0x296   : > { %v2092_v22 = vpop.f32.mrf.mxu1 }
 0x297   : > { %v2888_v14 = vadd.f32 %v5528_v26, %v2538_v2  ;;  %v3364_v58 = vmax.f32 %v3282_v57, %v3323_v51  ;;  %v3142_v30 = vpop.f32.mrf.mxu0  ;;  %v2189_v52 = vadd.f32 %v2092_v22, %v4815_v21  ;;  %v2600_v57 = vld [vmem:[%s4314_s30 + $0x132] sm:$0xff] }
 0x299   : > { %v3651_v59 = vmul.f32 %v3493_v27, %v3364_v58  ;;  %v3238_v3 = vadd.f32 %v3139_v55, %v2888_v14  ;;  %4078 = vmatmul.msk.f32.gmra.mxu1 %vm283_vm1, %v2244_v53  ;;  %4121 = vmatmul.msk.f32.gmra.mxu2 %vm283_vm1, %v2246_v4  ;;  %v3429_v53 = vld [vmem:[%s5805_s3 + $0x118] sm:$0xff]  ;;  %v3503_v27 = vpop.permute.xlu1 %3502  ;;  %v2248_v14 = vld [vmem:[%s4314_s30 + $0x121] sm:$0xff] }
 0x29a   : > { %4207 = vmatmul.msk.f32.gmra.mxu0 %vm283_vm1, %v2946_v29  ;;  %4167 = vmatmul.msk.f32.gmra.mxu3 %vm283_vm1, %v2599_v1  ;;  %v2948_v29 = vld [vmem:[%s4314_s30 + $0x123] sm:$0xff] }
 0x29b   : > { %3741 = vst.msk [vmem:[%s5140_s23 + $0x70] sm:$0xff] %vm3681_vm2, %v3651_v59  ;;  %v3283_v26 = vadd.f32 %v5267_v44, %v3238_v3  ;;  %3612 = vperm.xlu2 %4237, %v3429_v53   ;;  %v3508_v53 = vpop.permute.xlu2 %3507 }
 0x29c   : > { %v2442_v24 = vpop.f32.mrf.mxu2 }
 0x29d   : > { %v2539_v37 = vadd.f32 %v2442_v24, %v2189_v52  ;;  %v3324_v31 = vmul.f32 0.2, %v3283_v26  ;;  %v2801_v15 = vpop.f32.mrf.mxu3  ;;  %v2601_v52 = vld [vmem:[%s4314_s30 + $0x13a] sm:$0xff] }
 0x29e   : > { %v2095_v6 = vpop.f32.mrf.mxu1 }
 0x29f   : > { %v2889_v21 = vadd.f32 %v5551_v61, %v2539_v37  ;;  %v3365_v55 = vmax.f32 %v3283_v26, %v3324_v31  ;;  %v3145_v20 = vpop.f32.mrf.mxu0  ;;  %v2190_v45 = vadd.f32 %v2095_v6, %v4829_v28  ;;  %v2249_v6 = vld [vmem:[%s4314_s30 + $0x129] sm:$0xff] }
 0x2a1   : > { %v3652_v23 = vmul.f32 %v3498_v8, %v3365_v55  ;;  %v3239_v10 = vadd.f32 %v3142_v30, %v2889_v21  ;;  %4079 = vmatmul.msk.f32.gmra.mxu1 %vm283_vm1, %v2245_v13  ;;  %4122 = vmatmul.msk.f32.gmra.mxu2 %vm283_vm1, %v2247_v43  ;;  %v3432_v13 = vld [vmem:[%s5805_s3 + $0x130] sm:$0xff] }
 0x2a2   : > { %4208 = vmatmul.msk.f32.gmra.mxu0 %vm283_vm1, %v2947_v16  ;;  %4168 = vmatmul.msk.f32.gmra.mxu3 %vm283_vm1, %v2600_v57 }
 0x2a3   : > { %3742 = vst.msk [vmem:[%s5140_s23 + $0x78] sm:$0xff] %vm3681_vm2, %v3652_v23  ;;  %v3284_v61 = vadd.f32 %v5267_v44, %v3239_v10  ;;  %3627 = vperm.xlu2 %4237, %v3432_v13   ;;  %v2602_v10 = vld [vmem:[%s4314_s30 + $0x142] sm:$0xff] }
 0x2a4   : > { %v2445_v2 = vpop.f32.mrf.mxu2 }
 0x2a5   : > { %v2540_v51 = vadd.f32 %v2445_v2, %v2190_v45  ;;  %v3325_v5 = vmul.f32 0.2, %v3284_v61  ;;  %v2804_v59 = vpop.f32.mrf.mxu3 }
 0x2a6   : > { %v2098_v22 = vpop.f32.mrf.mxu1 }
 0x2a7   : > { %v2890_v28 = vadd.f32 %v5569_v46, %v2540_v51  ;;  %v3366_v58 = vmax.f32 %v3284_v61, %v3325_v5  ;;  %v3148_v30 = vpop.f32.mrf.mxu0  ;;  %v2191_v26 = vadd.f32 %v2098_v22, %v4843_v35  ;;  %v3513_v51 = vpop.permute.xlu0 %3512  ;;  %v2250_v5 = vld [vmem:[%s4314_s30 + $0x131] sm:$0xff] }
 0x2a9   : > { %v3653_v3 = vmul.f32 %v3503_v27, %v3366_v58  ;;  %v3240_v1 = vadd.f32 %v3145_v20, %v2890_v28  ;;  %4080 = vmatmul.msk.f32.gmra.mxu1 %vm283_vm1, %v2246_v4  ;;  %4123 = vmatmul.msk.f32.gmra.mxu2 %vm283_vm1, %v2248_v14  ;;  %v2949_v20 = vld [vmem:[%s4314_s30 + $0x12b] sm:$0xff]  ;;  %v2950_v28 = vld [vmem:[%s4314_s30 + $0x133] sm:$0xff] }
 0x2aa   : > { %4209 = vmatmul.msk.f32.gmra.mxu0 %vm283_vm1, %v2948_v29  ;;  %4169 = vmatmul.msk.f32.gmra.mxu3 %vm283_vm1, %v2601_v52  ;;  %v2603_v29 = vld [vmem:[%s4314_s30 + $0x14a] sm:$0xff] }
 0x2ab   : > { %3743 = vst.msk [vmem:[%s5140_s23 + $0x80] sm:$0xff] %vm3681_vm2, %v3653_v3  ;;  %v3285_v46 = vadd.f32 %v5267_v44, %v3240_v1 }
 0x2ac   : > { %v2448_v24 = vpop.f32.mrf.mxu2 }
 0x2ad   : > { %v2541_v37 = vadd.f32 %v2448_v24, %v2191_v26  ;;  %v3326_v31 = vmul.f32 0.2, %v3285_v46  ;;  %v2807_v35 = vpop.f32.mrf.mxu3  ;;  %v2251_v24 = vld [vmem:[%s4314_s30 + $0x139] sm:$0xff] }
 0x2ae   : > { %v2101_v4 = vpop.f32.mrf.mxu1 }
 0x2af   : > { %v2891_v8 = vadd.f32 %v5586_v39, %v2541_v37  ;;  %v3367_v21 = vmax.f32 %v3285_v46, %v3326_v31  ;;  %v3151_v55 = vpop.f32.mrf.mxu0  ;;  %v2192_v57 = vadd.f32 %v2101_v4, %v4857_v42  ;;  %v3518_v46 = vpop.permute.xlu1 %3517 }
 0x2b1   : > { %v3654_v16 = vmul.f32 %v3508_v53, %v3367_v21  ;;  %v3241_v23 = vadd.f32 %v3148_v30, %v2891_v8  ;;  %4081 = vmatmul.msk.f32.gmra.mxu1 %vm283_vm1, %v2247_v43  ;;  %4124 = vmatmul.msk.f32.gmra.mxu2 %vm283_vm1, %v2249_v6  ;;  %v2951_v53 = vld [vmem:[%s4314_s30 + $0x13b] sm:$0xff] }
 0x2b2   : > { %4210 = vmatmul.msk.f32.gmra.mxu0 %vm283_vm1, %v2949_v20  ;;  %4170 = vmatmul.msk.f32.gmra.mxu3 %vm283_vm1, %v2602_v10 }
 0x2b3   : > { %3744 = vst.msk [vmem:[%s5140_s23 + $0x88] sm:$0xff] %vm3681_vm2, %v3654_v16  ;;  %v3286_v39 = vadd.f32 %v5267_v44, %v3241_v23 }
 0x2b4   : > { %v2451_v45 = vpop.f32.mrf.mxu2 }
 0x2b5   : > { %v2542_v61 = vadd.f32 %v2451_v45, %v2192_v57  ;;  %v3327_v2 = vmul.f32 0.2, %v3286_v39  ;;  %v2810_v58 = vpop.f32.mrf.mxu3  ;;  %v3523_v57 = vpop.permute.xlu2 %3522 }
 0x2b6   : > { %v2104_v43 = vpop.f32.mrf.mxu1 }
 0x2b7   : > { %v2892_v13 = vadd.f32 %v2801_v15, %v2542_v61  ;;  %v3368_v22 = vmax.f32 %v3286_v39, %v3327_v2  ;;  %v3154_v27 = vpop.f32.mrf.mxu0  ;;  %v2193_v3 = vadd.f32 %v2104_v43, %v4871_v49  ;;  %v2252_v39 = vld [vmem:[%s4314_s30 + $0x141] sm:$0xff] }
 0x2b8   : > { %v2952_v43 = vld [vmem:[%s4314_s30 + $0x143] sm:$0xff] }
 0x2b9   : > { %v3655_v42 = vmul.f32 %v3513_v51, %v3368_v22  ;;  %v3242_v30 = vadd.f32 %v3151_v55, %v2892_v13  ;;  %4082 = vmatmul.msk.f32.gmra.mxu1 %vm283_vm1, %v2248_v14  ;;  %4125 = vmatmul.msk.f32.gmra.mxu2 %vm283_vm1, %v2250_v5  ;;  %v2604_v55 = vld [vmem:[%s4314_s30 + $0x152] sm:$0xff]  ;;  %v2605_v22 = vld [vmem:[%s4314_s30 + $0x15a] sm:$0xff] }
 0x2ba   : > { %4211 = vmatmul.msk.f32.gmra.mxu0 %vm283_vm1, %v2950_v28  ;;  %4171 = vmatmul.msk.f32.gmra.mxu3 %vm283_vm1, %v2603_v29  ;;  %v3528_v29 = vpop.permute.xlu0 %3527 }
 0x2bb   : > { %3745 = vst.msk [vmem:[%s5140_s23 + $0x90] sm:$0xff] %vm3681_vm2, %v3655_v42  ;;  %v3287_v15 = vadd.f32 %v5267_v44, %v3242_v30 }
 0x2bc   : > { %v2454_v1 = vpop.f32.mrf.mxu2 }
 0x2bd   : > { %v2543_v52 = vadd.f32 %v2454_v1, %v2193_v3  ;;  %v3328_v26 = vmul.f32 0.2, %v3287_v15  ;;  %v2813_v8 = vpop.f32.mrf.mxu3  ;;  %v2253_v3 = vld [vmem:[%s4314_s30 + $0x149] sm:$0xff] }
 0x2be   : > { %v2107_v14 = vpop.f32.mrf.mxu1 }
 0x2bf   : > { %v2893_v37 = vadd.f32 %v2804_v59, %v2543_v52  ;;  %v3369_v31 = vmax.f32 %v3287_v15, %v3328_v26  ;;  %v3157_v4 = vpop.f32.mrf.mxu0  ;;  %v2194_v20 = vadd.f32 %v2107_v14, %v4885_v56  ;;  %v2953_v26 = vld [vmem:[%s4314_s30 + $0x14b] sm:$0xff] }
 0x2c1   : > { %v3656_v49 = vmul.f32 %v3518_v46, %v3369_v31  ;;  %v3243_v21 = vadd.f32 %v3154_v27, %v2893_v37  ;;  %4083 = vmatmul.msk.f32.gmra.mxu1 %vm283_vm1, %v2249_v6  ;;  %4126 = vmatmul.msk.f32.gmra.mxu2 %vm283_vm1, %v2251_v24  ;;  %v2606_v37 = vld [vmem:[%s4314_s30 + $0x162] sm:$0xff] }
 0x2c2   : > { %4212 = vmatmul.msk.f32.gmra.mxu0 %vm283_vm1, %v2951_v53  ;;  %4172 = vmatmul.msk.f32.gmra.mxu3 %vm283_vm1, %v2604_v55  ;;  %v2254_v55 = vld [vmem:[%s4314_s30 + $0x151] sm:$0xff] }
 0x2c3   : > { %3746 = vst.msk [vmem:[%s5140_s23 + $0x98] sm:$0xff] %vm3681_vm2, %v3656_v49  ;;  %v3288_v59 = vadd.f32 %v5267_v44, %v3243_v21  ;;  %v3533_v21 = vpop.permute.xlu1 %3532 }
 0x2c4   : > { %v2457_v16 = vpop.f32.mrf.mxu2 }
 0x2c5   : > { %v2544_v23 = vadd.f32 %v2457_v16, %v2194_v20  ;;  %v3329_v10 = vmul.f32 0.2, %v3288_v59  ;;  %v2816_v51 = vpop.f32.mrf.mxu3 }
 0x2c6   : > { %v2110_v6 = vpop.f32.mrf.mxu1 }
 0x2c7   : > { %v2894_v45 = vadd.f32 %v2807_v35, %v2544_v23  ;;  %v3370_v61 = vmax.f32 %v3288_v59, %v3329_v10  ;;  %v3160_v2 = vpop.f32.mrf.mxu0  ;;  %v2195_v27 = vadd.f32 %v2110_v6, %v4896_v36  ;;  %v2954_v23 = vld [vmem:[%s4314_s30 + $0x153] sm:$0xff] }
 0x2c9   : > { %v3657_v56 = vmul.f32 %v3523_v57, %v3370_v61  ;;  %v3244_v13 = vadd.f32 %v3157_v4, %v2894_v45  ;;  %4084 = vmatmul.msk.f32.gmra.mxu1 %vm283_vm1, %v2250_v5  ;;  %4127 = vmatmul.msk.f32.gmra.mxu2 %vm283_vm1, %v2252_v39  ;;  %v2607_v57 = vld [vmem:[%s4314_s30 + $0x16a] sm:$0xf] }
 0x2ca   : > { %4213 = vmatmul.msk.f32.gmra.mxu0 %vm283_vm1, %v2952_v43  ;;  %4173 = vmatmul.msk.f32.gmra.mxu3 %vm283_vm1, %v2605_v22 }
 0x2cb   : > { %3747 = vst.msk [vmem:[%s5140_s23 + $0xa0] sm:$0xff] %vm3681_vm2, %v3657_v56  ;;  %v3289_v35 = vadd.f32 %v5267_v44, %v3244_v13  ;;  %v2255_v13 = vld [vmem:[%s4314_s30 + $0x159] sm:$0xff] }
 0x2cc   : > { %v2460_v28 = vpop.f32.mrf.mxu2 }
 0x2cd   : > { %v2545_v42 = vadd.f32 %v2460_v28, %v2195_v27  ;;  %v3330_v30 = vmul.f32 0.2, %v3289_v35  ;;  %v2819_v14 = vpop.f32.mrf.mxu3  ;;  %v2955_v28 = vld [vmem:[%s4314_s30 + $0x15b] sm:$0xff] }
 0x2ce   : > { %v2113_v5 = vpop.f32.mrf.mxu1 }
 0x2cf   : > { %v2895_v15 = vadd.f32 %v2810_v58, %v2545_v42  ;;  %v3371_v1 = vmax.f32 %v3289_v35, %v3330_v30  ;;  %v3163_v52 = vpop.f32.mrf.mxu0  ;;  %v2196_v31 = vadd.f32 %v2113_v5, %v4907_v7 }
 0x2d1   : > { %v3658_v36 = vmul.f32 %v3528_v29, %v3371_v1  ;;  %v3245_v46 = vadd.f32 %v3160_v2, %v2895_v15  ;;  %4085 = vmatmul.msk.f32.gmra.mxu1 %vm283_vm1, %v2251_v24  ;;  %4128 = vmatmul.msk.f32.gmra.mxu2 %vm283_vm1, %v2253_v3 }
 0x2d2   : > { %4214 = vmatmul.msk.f32.gmra.mxu0 %vm283_vm1, %v2953_v26  ;;  %4174 = vmatmul.msk.f32.gmra.mxu3 %vm283_vm1, %v2606_v37  ;;  %v2256_v26 = vld [vmem:[%s4314_s30 + $0x161] sm:$0xff] }
 0x2d3   : > { %3748 = vst.msk [vmem:[%s5140_s23 + $0xa8] sm:$0xff] %vm3681_vm2, %v3658_v36  ;;  %v3290_v58 = vadd.f32 %v5267_v44, %v3245_v46  ;;  %v2956_v37 = vld [vmem:[%s4314_s30 + $0x163] sm:$0xff] }
 0x2d4   : > { %v2463_v4 = vpop.f32.mrf.mxu2 }
 0x2d5   : > { %v2546_v53 = vadd.f32 %v2463_v4, %v2196_v31  ;;  %v3331_v49 = vmul.f32 0.2, %v3290_v58  ;;  %v2822_v10 = vpop.f32.mrf.mxu3 }
 0x2d6   : > { %v2116_v24 = vpop.f32.mrf.mxu1 }
 0x2d7   : > { %v2896_v20 = vadd.f32 %v2813_v8, %v2546_v53  ;;  %v3372_v59 = vmax.f32 %v3290_v58, %v3331_v49  ;;  %v3166_v16 = vpop.f32.mrf.mxu0  ;;  %v2197_v45 = vadd.f32 %v2116_v24, %v4918_v34 }
 0x2d9   : > { %v3659_v7 = vmul.f32 %v3533_v21, %v3372_v59  ;;  %v3246_v6 = vadd.f32 %v3163_v52, %v2896_v20  ;;  %4086 = vmatmul.msk.f32.gmra.mxu1 %vm283_vm1, %v2252_v39  ;;  %4129 = vmatmul.msk.f32.gmra.mxu2 %vm283_vm1, %v2254_v55  ;;  %v3538_v39 = vpop.permute.xlu2 %3537  ;;  %v3543_v52 = vpop.permute.xlu0 %3542  ;;  %v1907_v59 = vld [vmem:[%s4314_s30 + $0x159] sm:$0xf] }
 0x2da   : > { %4215 = vmatmul.msk.f32.gmra.mxu0 %vm283_vm1, %v2954_v23  ;;  %4175 = vmatmul.msk.f32.gmra.mxu3 %vm283_vm1, %v2607_v57 }
 0x2db   : > { %3749 = vst.msk [vmem:[%s5140_s23 + $0xb0] sm:$0xff] %vm3681_vm2, %v3659_v7  ;;  %v3291_v8 = vadd.f32 %v5267_v44, %v3246_v6  ;;  %v2957_v6 = vld [vmem:[%s4314_s30 + $0x16b] sm:$0xf] }
 0x2dc   : > { %v2466_v61 = vpop.f32.mrf.mxu2 }
 0x2dd   : > { %v2547_v2 = vadd.f32 %v2466_v61, %v2197_v45  ;;  %v3332_v43 = vmul.f32 0.2, %v3291_v8  ;;  %v2825_v42 = vpop.f32.mrf.mxu3  ;;  %v3548_v45 = vpop.permute.xlu1 %3547 }
 0x2de   : > { %v2119_v56 = vpop.f32.mrf.mxu1 }
 0x2df   : > { %v2897_v22 = vadd.f32 %v2816_v51, %v2547_v2  ;;  %v3373_v27 = vmax.f32 %v3291_v8, %v3332_v43  ;;  %v3169_v35 = vpop.f32.mrf.mxu0  ;;  %v2198_v44 = vadd.f32 %v2119_v56, %v4929_v40  ;;  %v5705_v51 = vld [vmem:[%s5804_s2] ss:$0 sm:$0xff] }
 0x2e1   : > { %v3660_v34 = vmul.f32 %v3538_v39, %v3373_v27  ;;  %v3247_v30 = vadd.f32 %v3166_v16, %v2897_v22  ;;  %4087 = vmatmul.msk.f32.gmra.mxu1 %vm283_vm1, %v2253_v3  ;;  %4130 = vmatmul.msk.f32.gmra.mxu2 %vm283_vm1, %v2255_v13  ;;  %v2257_v16 = vld [vmem:[%s4314_s30 + $0x169] sm:$0xf]  ;;  %v3553_v13 = vpop.permute.xlu2 %3552 }
 0x2e2   : > { %4216 = vmatmul.msk.f32.gmra.mxu0 %vm283_vm1, %v2955_v28 }
 0x2e3   : > { %3750 = vst.msk [vmem:[%s5140_s23 + $0xb8] sm:$0xff] %vm3681_vm2, %v3660_v34  ;;  %v3292_v5 = vadd.f32 %v5705_v51, %v3247_v30 }
 0x2e4   : > { %v2469_v29 = vpop.f32.mrf.mxu2 }
 0x2e5   : > { %v2548_v15 = vadd.f32 %v2469_v29, %v2198_v44  ;;  %v3333_v3 = vmul.f32 0.2, %v3292_v5  ;;  %v2828_v31 = vpop.f32.mrf.mxu3 }
 0x2e6   : > { %v2122_v1 = vpop.f32.mrf.mxu1 }
 0x2e7   : > { %v2898_v36 = vadd.f32 %v2819_v14, %v2548_v15  ;;  %v3374_v46 = vmax.f32 %v3292_v5, %v3333_v3  ;;  %v3172_v40 = vpop.f32.mrf.mxu0  ;;  %v2199_v53 = vadd.f32 %v2122_v1, %v4941_v47 }
 0x2e9   : > { %v3661_v58 = vmul.f32 %v3543_v52, %v3374_v46  ;;  %v3248_v4 = vadd.f32 %v3169_v35, %v2898_v36  ;;  %4088 = vmatmul.msk.f32.gmra.mxu1 %vm283_vm1, %v2254_v55  ;;  %4131 = vmatmul.msk.f32.gmra.mxu2 %vm283_vm1, %v2256_v26  ;;  %v3558_v36 = vpop.permute.xlu0 %3557 }
 0x2ea   : > { %4217 = vmatmul.msk.f32.gmra.mxu0 %vm283_vm1, %v2956_v37 }
 0x2eb   : > { %3751 = vst.msk [vmem:[%s5140_s23 + $0xc0] sm:$0xff] %vm3681_vm2, %v3661_v58  ;;  %v3293_v14 = vadd.f32 %v5705_v51, %v3248_v4 }
 0x2ec   : > { %v2472_v49 = vpop.f32.mrf.mxu2 }
 0x2ed   : > { %v3334_v24 = vmul.f32 0.2, %v3293_v14  ;;  %v2549_v21 = vadd.f32 %v2472_v49, %v2199_v53  ;;  %v2831_v57 = vpop.f32.mrf.mxu3 }
 0x2ee   : > { %v2125_v20 = vpop.f32.mrf.mxu1 }
 0x2ef   : > { %v3375_v23 = vmax.f32 %v3293_v14, %v3334_v24  ;;  %v2899_v7 = vadd.f32 %v2822_v10, %v2549_v21  ;;  %v3175_v55 = vpop.f32.mrf.mxu0  ;;  %v2200_v47 = vadd.f32 %v2125_v20, %v4955_v62  ;;  %v3563_v20 = vpop.permute.xlu1 %3562 }
 0x2f1   : > { %v3662_v8 = vmul.f32 %v3548_v45, %v3375_v23  ;;  %v3249_v61 = vadd.f32 %v3172_v40, %v2899_v7  ;;  %4089 = vmatmul.msk.f32.gmra.mxu1 %vm283_vm1, %v1907_v59  ;;  %4132 = vmatmul.msk.f32.gmra.mxu2 %vm283_vm1, %v2257_v16 }
 0x2f2   : > { %4218 = vmatmul.msk.f32.gmra.mxu0 %vm283_vm1, %v2957_v6 }
 0x2f3   : > { %3752 = vst.msk [vmem:[%s5140_s23 + $0xc8] sm:$0xff] %vm3681_vm2, %v3662_v8  ;;  %v3294_v2 = vadd.f32 %v5705_v51, %v3249_v61 }
 0x2f4   : > { %v2475_v10 = vpop.f32.mrf.mxu2 }
 0x2f5   : > { %v2550_v43 = vadd.f32 %v2475_v10, %v2200_v47  ;;  %v3335_v56 = vmul.f32 0.2, %v3294_v2  ;;  %v2834_v28 = vpop.f32.mrf.mxu3 }
 0x2f6   : > { %v2128_v39 = vpop.f32.mrf.mxu1 }
 0x2f7   : > { %v2900_v22 = vadd.f32 %v2825_v42, %v2550_v43  ;;  %v3376_v27 = vmax.f32 %v3294_v2, %v3335_v56  ;;  %v3178_v35 = vpop.f32.mrf.mxu0  ;;  %v2201_v44 = vadd.f32 %v2128_v39, %v4969_v32 }
 0x2f9   : > { %v3663_v34 = vmul.f32 %v3553_v13, %v3376_v27  ;;  %v3250_v30 = vadd.f32 %v3175_v55, %v2900_v22 }
 0x2fb   : > { %3753 = vst.msk [vmem:[%s5140_s23 + $0xd0] sm:$0xff] %vm3681_vm2, %v3663_v34  ;;  %v3295_v62 = vadd.f32 %v5705_v51, %v3250_v30 }
 0x2fc   : > { %v2478_v5 = vpop.f32.mrf.mxu2 }
 0x2fd   : > { %v3336_v29 = vmul.f32 0.2, %v3295_v62  ;;  %v2551_v15 = vadd.f32 %v2478_v5, %v2201_v44  ;;  %v2837_v42 = vpop.f32.mrf.mxu3 }
 0x2fe   : > { %v2131_v3 = vpop.f32.mrf.mxu1 }
 0x2ff   : > { %v3377_v1 = vmax.f32 %v3295_v62, %v3336_v29  ;;  %v2901_v52 = vadd.f32 %v2828_v31, %v2551_v15  ;;  %v3181_v26 = vpop.f32.mrf.mxu0  ;;  %v2202_v32 = vadd.f32 %v2131_v3, %v4982_v19 }
 0x301   : > { %v3664_v46 = vmul.f32 %v3558_v36, %v3377_v1  ;;  %v3251_v40 = vadd.f32 %v3178_v35, %v2901_v52 }
 0x303   : > { %3754 = vst.msk [vmem:[%s5140_s23 + $0xd8] sm:$0xff] %vm3681_vm2, %v3664_v46  ;;  %v3296_v37 = vadd.f32 %v5705_v51, %v3251_v40 }
 0x304   : > { %v2481_v58 = vpop.f32.mrf.mxu2 }
 0x305   : > { %v3337_v4 = vmul.f32 0.2, %v3296_v37  ;;  %v2552_v53 = vadd.f32 %v2481_v58, %v2202_v32  ;;  %v2840_v31 = vpop.f32.mrf.mxu3 }
 0x306   : > { %v2134_v14 = vpop.f32.mrf.mxu1 }
 0x307   : > { %v3378_v49 = vmax.f32 %v3296_v37, %v3337_v4  ;;  %v2902_v24 = vadd.f32 %v2831_v57, %v2552_v53  ;;  %v3184_v21 = vpop.f32.mrf.mxu0  ;;  %v2203_v23 = vadd.f32 %v2134_v14, %v4995_v48  ;;  %v3568_v57 = vpop.permute.xlu2 %3567 }
 0x309   : > { %v3665_v59 = vmul.f32 %v3563_v20, %v3378_v49  ;;  %v3252_v16 = vadd.f32 %v3181_v26, %v2902_v24 }
 0x30b   : > { %3755 = vst.msk [vmem:[%s5140_s23 + $0xe0] sm:$0xff] %vm3681_vm2, %v3665_v59  ;;  %v3297_v19 = vadd.f32 %v5705_v51, %v3252_v16 }
 0x30c   : > { %v2484_v7 = vpop.f32.mrf.mxu2 }
 0x30d   : > { %v3338_v55 = vmul.f32 0.2, %v3297_v19  ;;  %v2553_v6 = vadd.f32 %v2484_v7, %v2203_v23  ;;  %v2843_v2 = vpop.f32.mrf.mxu3 }
 0x30e   : > { %v2137_v45 = vpop.f32.mrf.mxu1 }
 0x30f   : > { %v3379_v8 = vmax.f32 %v3297_v19, %v3338_v55  ;;  %v2903_v61 = vadd.f32 %v2834_v28, %v2553_v6  ;;  %v3187_v47 = vpop.f32.mrf.mxu0  ;;  %v2204_v56 = vadd.f32 %v2137_v45, %v5005_v0  ;;  %v3573_v28 = vpop.permute.xlu0 %3572 }
 0x311   : > { %v3666_v10 = vmul.f32 %v3568_v57, %v3379_v8  ;;  %v3253_v43 = vadd.f32 %v3184_v21, %v2903_v61 }
 0x313   : > { %3756 = vst.msk [vmem:[%s5140_s23 + $0xe8] sm:$0xff] %vm3681_vm2, %v3666_v10  ;;  %v3298_v48 = vadd.f32 %v5705_v51, %v3253_v43 }
 0x314   : > { %v2487_v39 = vpop.f32.mrf.mxu2 }
 0x315   : > { %v3339_v13 = vmul.f32 0.2, %v3298_v48  ;;  %v2554_v22 = vadd.f32 %v2487_v39, %v2204_v56  ;;  %v2846_v5 = vpop.f32.mrf.mxu3 }
 0x316   : > { %v2140_v27 = vpop.f32.mrf.mxu1 }
 0x317   : > { %v3380_v35 = vmax.f32 %v3298_v48, %v3339_v13  ;;  %v2904_v34 = vadd.f32 %v2837_v42, %v2554_v22  ;;  %v3190_v30 = vpop.f32.mrf.mxu0  ;;  %v2205_v29 = vadd.f32 %v2140_v27, %v5015_v25  ;;  %v3578_v42 = vpop.permute.xlu1 %3577 }
 0x318   : > { %v3588_v57 = vpop.permute.xlu0 %3587 }
 0x319   : > { %v3667_v44 = vmul.f32 %v3573_v28, %v3380_v35  ;;  %v3254_v62 = vadd.f32 %v3187_v47, %v2904_v34 }
 0x31b   : > { %3757 = vst.msk [vmem:[%s5140_s23 + $0xf0] sm:$0xff] %vm3681_vm2, %v3667_v44  ;;  %v3299_v0 = vadd.f32 %v5705_v51, %v3254_v62 }
 0x31c   : > { %v2490_v15 = vpop.f32.mrf.mxu2 }
 0x31d   : > { %v3340_v3 = vmul.f32 0.2, %v3299_v0  ;;  %v2555_v1 = vadd.f32 %v2490_v15, %v2205_v29  ;;  %v2849_v4 = vpop.f32.mrf.mxu3 }
 0x31e   : > { %v2143_v52 = vpop.f32.mrf.mxu1 }
 0x31f   : > { %v3381_v26 = vmax.f32 %v3299_v0, %v3340_v3  ;;  %v2905_v36 = vadd.f32 %v2840_v31, %v2555_v1  ;;  %v3193_v46 = vpop.f32.mrf.mxu0  ;;  %v2206_v37 = vadd.f32 %v2143_v52, %v5028_v9  ;;  %v3583_v31 = vpop.permute.xlu2 %3582 }
 0x320   : > { %v3593_v34 = vpop.permute.xlu1 %3592 }
 0x321   : > { %v3668_v40 = vmul.f32 %v3578_v42, %v3381_v26  ;;  %v3255_v32 = vadd.f32 %v3190_v30, %v2905_v36 }
 0x323   : > { %3758 = vst.msk [vmem:[%s5140_s23 + $0xf8] sm:$0xff] %vm3681_vm2, %v3668_v40  ;;  %v3300_v58 = vadd.f32 %v5705_v51, %v3255_v32 }
 0x324   : > { %v2493_v25 = vpop.f32.mrf.mxu2 }
 0x325   : > { %v3341_v53 = vmul.f32 0.2, %v3300_v58  ;;  %v2556_v14 = vadd.f32 %v2493_v25, %v2206_v37  ;;  %v2852_v45 = vpop.f32.mrf.mxu3 }
 0x326   : > { %v2146_v49 = vpop.f32.mrf.mxu1 }
 0x327   : > { %v3382_v24 = vmax.f32 %v3300_v58, %v3341_v53  ;;  %v2906_v21 = vadd.f32 %v2843_v2, %v2556_v14  ;;  %v3196_v20 = vpop.f32.mrf.mxu0  ;;  %v2207_v23 = vadd.f32 %v2146_v49, %v5044_v41  ;;  %v3598_v26 = vpop.permute.xlu2 %3597 }
 0x328   : > { %v3603_v49 = vpop.permute.xlu0 %3602 }
 0x329   : > { %v3669_v59 = vmul.f32 %v3583_v31, %v3382_v24  ;;  %v3256_v16 = vadd.f32 %v3193_v46, %v2906_v21 }
 0x32b   : > { %3759 = vst.msk [vmem:[%s5140_s23 + $0x100] sm:$0xff] %vm3681_vm2, %v3669_v59  ;;  %v3301_v9 = vadd.f32 %v5705_v51, %v3256_v16 }
 0x32c   : > { %v2496_v19 = vpop.f32.mrf.mxu2 }
 0x32d   : > { %v3342_v7 = vmul.f32 0.2, %v3301_v9  ;;  %v2557_v55 = vadd.f32 %v2496_v19, %v2207_v23  ;;  %v2855_v30 = vpop.f32.mrf.mxu3 }
 0x32e   : > { %v2149_v6 = vpop.f32.mrf.mxu1 }
 0x32f   : > { %v3383_v8 = vmax.f32 %v3301_v9, %v3342_v7  ;;  %v2907_v61 = vadd.f32 %v2846_v5, %v2557_v55  ;;  %v3199_v47 = vpop.f32.mrf.mxu0  ;;  %v2208_v43 = vadd.f32 %v2149_v6, %v5057_v38  ;;  %v3608_v6 = vpop.permute.xlu1 %3607 }
 0x331   : > { %v3670_v2 = vmul.f32 %v3588_v57, %v3383_v8  ;;  %v3257_v10 = vadd.f32 %v3196_v20, %v2907_v61 }
 0x333   : > { %3760 = vst.msk [vmem:[%s5140_s23 + $0x108] sm:$0xff] %vm3681_vm2, %v3670_v2  ;;  %v3302_v41 = vadd.f32 %v5705_v51, %v3257_v10 }
 0x334   : > { %v2499_v56 = vpop.f32.mrf.mxu2 }
 0x335   : > { %v3343_v48 = vmul.f32 0.2, %v3302_v41  ;;  %v2558_v39 = vadd.f32 %v2499_v56, %v2208_v43  ;;  %v2858_v42 = vpop.f32.mrf.mxu3 }
 0x336   : > { %v2152_v13 = vpop.f32.mrf.mxu1 }
 0x337   : > { %v3384_v22 = vmax.f32 %v3302_v41, %v3343_v48  ;;  %v2908_v27 = vadd.f32 %v2849_v4, %v2558_v39  ;;  %v3202_v35 = vpop.f32.mrf.mxu0  ;;  %v2209_v62 = vadd.f32 %v2152_v13, %v5070_v50  ;;  %v3613_v48 = vpop.permute.xlu2 %3612 }
 0x339   : > { %v3671_v28 = vmul.f32 %v3593_v34, %v3384_v22  ;;  %v3258_v44 = vadd.f32 %v3199_v47, %v2908_v27 }
 0x33b   : > { %3761 = vst.msk [vmem:[%s5140_s23 + $0x110] sm:$0xff] %vm3681_vm2, %v3671_v28  ;;  %v3303_v38 = vadd.f32 %v5705_v51, %v3258_v44 }
 0x33c   : > { %v2502_v5 = vpop.f32.mrf.mxu2 }
 0x33d   : > { %v3344_v29 = vmul.f32 0.2, %v3303_v38  ;;  %v2559_v0 = vadd.f32 %v2502_v5, %v2209_v62  ;;  %v2861_v59 = vpop.f32.mrf.mxu3 }
 0x33e   : > { %v2155_v15 = vpop.f32.mrf.mxu1 }
 0x33f   : > { %v3385_v3 = vmax.f32 %v3303_v38, %v3344_v29  ;;  %v2909_v1 = vadd.f32 %v2852_v45, %v2559_v0  ;;  %v3205_v52 = vpop.f32.mrf.mxu0  ;;  %v2210_v40 = vadd.f32 %v2155_v15, %v5083_v11  ;;  %v3618_v38 = vpop.permute.xlu0 %3617 }
 0x341   : > { %v3672_v36 = vmul.f32 %v3598_v26, %v3385_v3  ;;  %v3259_v46 = vadd.f32 %v3202_v35, %v2909_v1 }
 0x343   : > { %3762 = vst.msk [vmem:[%s5140_s23 + $0x118] sm:$0xff] %vm3681_vm2, %v3672_v36  ;;  %v3304_v50 = vadd.f32 %v5705_v51, %v3259_v46 }
 0x344   : > { %v2505_v32 = vpop.f32.mrf.mxu2 }
 0x345   : > { %v3345_v37 = vmul.f32 0.2, %v3304_v50  ;;  %v2560_v58 = vadd.f32 %v2505_v32, %v2210_v40  ;;  %v2864_v43 = vpop.f32.mrf.mxu3  ;;  %v3623_v40 = vpop.permute.xlu1 %3622 }
 0x346   : > { %v2158_v25 = vpop.f32.mrf.mxu1 }
 0x347   : > { %v3386_v4 = vmax.f32 %v3304_v50, %v3345_v37  ;;  %v2910_v53 = vadd.f32 %v2855_v30, %v2560_v58  ;;  %v3208_v14 = vpop.f32.mrf.mxu0  ;;  %v2211_v20 = vadd.f32 %v2158_v25, %v5096_v33 }
 0x349   : > { %v3673_v24 = vmul.f32 %v3603_v49, %v3386_v4  ;;  %v3260_v21 = vadd.f32 %v3205_v52, %v2910_v53 }
 0x34b   : > { %3763 = vst.msk [vmem:[%s5140_s23 + $0x120] sm:$0xff] %vm3681_vm2, %v3673_v24  ;;  %v3305_v31 = vadd.f32 %v5705_v51, %v3260_v21  ;;  %v3628_v24 = vpop.permute.xlu2 %3627 }
 0x34c   : > { %v2508_v11 = vpop.f32.mrf.mxu2 }
 0x34d   : > { %v3346_v16 = vmul.f32 0.2, %v3305_v31  ;;  %v2561_v23 = vadd.f32 %v2508_v11, %v2211_v20  ;;  %v2867_v5 = vpop.f32.mrf.mxu3 }
 0x34e   : > { %v2161_v9 = vpop.f32.mrf.mxu1 }
 0x34f   : > { %v3387_v19 = vmax.f32 %v3305_v31, %v3346_v16  ;;  %v2911_v7 = vadd.f32 %v2858_v42, %v2561_v23  ;;  %v3211_v55 = vpop.f32.mrf.mxu0  ;;  %v2212_v61 = vadd.f32 %v2161_v9, %v5109_v54 }
 0x351   : > { %v3674_v45 = vmul.f32 %v3608_v6, %v3387_v19  ;;  %v3261_v8 = vadd.f32 %v3208_v14, %v2911_v7  ;;  %v3633_v6 = vpop.permute.xlu0 %3632 }
 0x353   : > { %3764 = vst.msk [vmem:[%s5140_s23 + $0x128] sm:$0xff] %vm3681_vm2, %v3674_v45  ;;  %v3306_v33 = vadd.f32 %v5705_v51, %v3261_v8 }
 0x354   : > { %v2511_v47 = vpop.f32.mrf.mxu2 }
 0x355   : > { %v3347_v57 = vmul.f32 0.2, %v3306_v33  ;;  %v2562_v2 = vadd.f32 %v2511_v47, %v2212_v61  ;;  %v2870_v37 = vpop.f32.mrf.mxu3 }
 0x356   : > { %v2164_v10 = vpop.f32.mrf.mxu1 }
 0x357   : > { %v3388_v41 = vmax.f32 %v3306_v33, %v3347_v57  ;;  %v2912_v56 = vadd.f32 %v2861_v59, %v2562_v2  ;;  %v3214_v39 = vpop.f32.mrf.mxu0  ;;  %v2213_v27 = vadd.f32 %v2164_v10, %v5124_v63 }
 0x359   : > { %v3675_v13 = vmul.f32 %v3613_v48, %v3388_v41  ;;  %v3262_v22 = vadd.f32 %v3211_v55, %v2912_v56 }
 0x35b   : > { %3765 = vst.msk [vmem:[%s5140_s23 + $0x130] sm:$0xff] %vm3681_vm2, %v3675_v13  ;;  %v3307_v54 = vadd.f32 %v5705_v51, %v3262_v22 }
 0x35c   : > { %v2514_v35 = vpop.f32.mrf.mxu2 }
 0x35d   : > { %v3348_v34 = vmul.f32 0.2, %v3307_v54  ;;  %v2563_v30 = vadd.f32 %v2514_v35, %v2213_v27  ;;  %v2873_v16 = vpop.f32.mrf.mxu3 }
 0x35e   : > { %v2167_v28 = vpop.f32.mrf.mxu1 }
 0x35f   : > { %v3389_v44 = vmax.f32 %v3307_v54, %v3348_v34  ;;  %v2913_v62 = vadd.f32 %v2864_v43, %v2563_v30  ;;  %v3217_v15 = vpop.f32.mrf.mxu0  ;;  %v2214_v63 = vadd.f32 %v2167_v28, %v5149_v12 }
 0x361   : > { %v3676_v29 = vmul.f32 %v3618_v38, %v3389_v44  ;;  %v3263_v0 = vadd.f32 %v3214_v39, %v2913_v62 }
 0x363   : > { %3766 = vst.msk [vmem:[%s5140_s23 + $0x138] sm:$0xff] %vm3681_vm2, %v3676_v29  ;;  %v3308_v3 = vadd.f32 %v5705_v51, %v3263_v0 }
 0x364   : > { %v2517_v1 = vpop.f32.mrf.mxu2 }
 0x365   : > { %v3349_v52 = vmul.f32 0.2, %v3308_v3  ;;  %v2564_v26 = vadd.f32 %v2517_v1, %v2214_v63 }
 0x366   : > { %v2170_v36 = vpop.f32.mrf.mxu1 }
 0x367   : > { %v3390_v46 = vmax.f32 %v3308_v3, %v3349_v52  ;;  %v2914_v42 = vadd.f32 %v2867_v5, %v2564_v26  ;;  %v2215_v60 = vadd.f32 %v2170_v36, %v5188_v18  ;;  %v3220_v25 = vpop.f32.mrf.mxu0 }
 0x369   : > { %v3677_v50 = vmul.f32 %v3623_v40, %v3390_v46  ;;  %v3264_v32 = vadd.f32 %v3217_v15, %v2914_v42 }
 0x36b   : > { %3767 = vst.msk [vmem:[%s5140_s23 + $0x140] sm:$0xff] %vm3681_vm2, %v3677_v50  ;;  %v3309_v58 = vadd.f32 %v5705_v51, %v3264_v32 }
 0x36c   : > { %v2520_v12 = vpop.f32.mrf.mxu2 }
 0x36d   : > { %v3350_v4 = vmul.f32 0.2, %v3309_v58  ;;  %v2565_v53 = vadd.f32 %v2520_v12, %v2215_v60 }
 0x36e   : > { %v2173_v21 = vpop.f32.mrf.mxu1 }
 0x36f   : > { %v3391_v14 = vmax.f32 %v3309_v58, %v3350_v4  ;;  %v2915_v49 = vadd.f32 %v2870_v37, %v2565_v53  ;;  %v2216_v11 = vadd.f32 %v2173_v21, %v5230_v17  ;;  %v3223_v19 = vpop.f32.mrf.mxu0  ;;  %v3638_v17 = vpop.permute.xlu1 %3637 }
 0x371   : > { %v3678_v20 = vmul.f32 %v3628_v24, %v3391_v14  ;;  %v3265_v31 = vadd.f32 %v3220_v25, %v2915_v49 }
 0x373   : > { %3768 = vst.msk [vmem:[%s5140_s23 + $0x148] sm:$0xff] %vm3681_vm2, %v3678_v20  ;;  %v3310_v59 = vadd.f32 %v5705_v51, %v3265_v31 }
 0x374   : > { %v2523_v18 = vpop.f32.mrf.mxu2 }
 0x375   : > { %v3351_v23 = vmul.f32 0.2, %v3310_v59  ;;  %v2566_v9 = vadd.f32 %v2523_v18, %v2216_v11 }
 0x377   : > { %v3392_v7 = vmax.f32 %v3310_v59, %v3351_v23  ;;  %v2916_v55 = vadd.f32 %v2873_v16, %v2566_v9 }
 0x379   : > { %v3679_v45 = vmul.f32 %v3633_v6, %v3392_v7  ;;  %v3266_v8 = vadd.f32 %v3223_v19, %v2916_v55 }
 0x37b   : > { %3769 = vst.msk [vmem:[%s5140_s23 + $0x150] sm:$0xff] %vm3681_vm2, %v3679_v45  ;;  %v3311_v61 = vadd.f32 %v5705_v51, %v3266_v8 }
 0x37d   : > { %v3352_v33 = vmul.f32 0.2, %v3311_v61 }
 0x37f   : > { %v3393_v47 = vmax.f32 %v3311_v61, %v3352_v33 }
 0x381   : > { %v3680_v57 = vmul.f32 %v3638_v17, %v3393_v47 }
 0x383   : > { %3770 = vst.msk [vmem:[%s5140_s23 + $0x158] sm:$0xf] %vm3728_vm3, %v3680_v57 }
 0x384 PF: > { %s14_s15 = sadd.s32 1, %s4246_s15  }
 0x385   : > { %p11_p4 = scmp.ge.s32.totalorder %s14_s15, 4  }
 0x387   :  { %13 = sbr.rel (!%p11_p4) target bundleno = 1 (0x1), region = 74 }

</bundles_post_ra>
